<compile_context>
chip_gen: v7x
topology: tpu7x:2x2x1
jax: 0.10.0
libtpu: 0.0.40
codegen_flags: <defaults>
</compile_context>

<pallas_src>
import functools

import jax
import jax.numpy as jnp
from jax.experimental import pallas as pl
from jax.experimental.pallas import tpu as pltpu

LANE = 128                       # TPU lane width: channel dims padded to this
VMEM_BUDGET = 32 * 1024 * 1024   # explicit scoped-VMEM budget (safe on v5e/v6e/v7x)


def _round_up(x, m):
    return (x + m - 1) // m * m


def _row_chunk(ho, max_rows=16):
    """Largest row chunk <= max_rows that divides the pooled height."""
    th = min(ho, max_rows)
    while ho % th:
        th -= 1
    return th


def _cout_tile(cout_p):
    """MXU-friendly Cout tile: 256 fills the v6e/v7x MXU, otherwise 128 (v5e)."""
    return 256 if cout_p % 256 == 0 else 128


# ----------------------------------------------------------------------------
# Shared in-kernel body: 3x3 conv (padding=1) + folded BN + ReLU on one block
# ----------------------------------------------------------------------------
def _conv3x3_bn_relu_tile(x_val, w_ref, s_ref, b_ref, o_ref, pad_ref, col_ref,
                          *, ho, wo, cin, th):
    """ReLU(scale * conv3x3(x) + bias) for one (batch, cout-tile) block.

    x_val:   (ho, wo, cin)      activation value
    w_ref:   (9*cin, tco)       bf16 im2col weights (row = (dy*3+dx)*cin + ci)
    s_ref/b_ref: (1, tco)       f32 folded BatchNorm scale / bias
    o_ref:   (1, ho, wo, tco)   output block
    pad_ref: (ho+2, wo+2, cin)  bf16 VMEM scratch (zero halo)
    col_ref: (th, wo, 9*cin)    bf16 VMEM scratch (im2col patches, one chunk)
    """
    tco = w_ref.shape[1]
    # 1-px zero halo staged in VMEM (replaces a wrapper-side jnp.pad HBM pass).
    pad_ref[...] = jnp.zeros_like(pad_ref)
    pad_ref[1:ho + 1, 1:wo + 1, :] = x_val.astype(pad_ref.dtype)

    # Row-chunked im2col -> a single MXU dot with K = 9*cin per chunk.
    for r in range(ho // th):
        r0 = r * th
        for dy in range(3):
            for dx in range(3):
                t = dy * 3 + dx
                col_ref[:, :, t * cin:(t + 1) * cin] = \
                    pad_ref[r0 + dy:r0 + dy + th, dx:dx + wo, :]
        patches = col_ref[...].reshape(th * wo, 9 * cin)
        acc = jnp.dot(patches, w_ref[...], preferred_element_type=jnp.float32)
        y = acc * s_ref[...] + b_ref[...]          # folded BN (eval), f32
        y = jnp.maximum(y, 0.0)                    # ReLU
        o_ref[0, r0:r0 + th, :, :] = y.reshape(th, wo, tco).astype(o_ref.dtype)


# ----------------------------------------------------------------------------
# Kernel A: fused MaxPool2d(2,2) + Conv3x3 + folded BN + ReLU
# ----------------------------------------------------------------------------
def _pool_conv_kernel(x_ref, w_ref, s_ref, b_ref, o_ref, pad_ref, col_ref,
                      *, ho, wo, cin, th):
    # x_ref: (1, ho, 2, wo, 2*cin) -- metadata-only regroup of the NHWC input
    # exposing the 2x2 pool windows (row pair on a major axis, column pair
    # folded into the lane axis, so loads stay sublane dense).
    x = x_ref[...]
    rows = jnp.maximum(x[0, :, 0], x[0, :, 1])               # (ho, wo, 2*cin)
    pooled = jnp.maximum(rows[..., :cin], rows[..., cin:])   # (ho, wo, cin)
    _conv3x3_bn_relu_tile(pooled, w_ref, s_ref, b_ref, o_ref, pad_ref, col_ref,
                          ho=ho, wo=wo, cin=cin, th=th)


# ----------------------------------------------------------------------------
# Kernel B: Conv3x3 + folded BN + ReLU
# ----------------------------------------------------------------------------
def _conv_kernel(x_ref, w_ref, s_ref, b_ref, o_ref, pad_ref, col_ref,
                 *, ho, wo, cin, th):
    _conv3x3_bn_relu_tile(x_ref[0], w_ref, s_ref, b_ref, o_ref, pad_ref,
                          col_ref, ho=ho, wo=wo, cin=cin, th=th)


# ----------------------------------------------------------------------------
# pallas_call wrappers
# ----------------------------------------------------------------------------
def _fused_conv_call(kernel_body, x, w, scale, bias, *, in_block, in_index_map,
                     ho, wo, cin, out_dtype):
    n = x.shape[0]
    k9cin, cout_p = w.shape
    assert k9cin == 9 * cin, (k9cin, cin)
    assert cout_p % LANE == 0
    tco = _cout_tile(cout_p)
    th = _row_chunk(ho)
    kernel = functools.partial(kernel_body, ho=ho, wo=wo, cin=cin, th=th)
    return pl.pallas_call(
        kernel,
        out_shape=jax.ShapeDtypeStruct((n, ho, wo, cout_p), out_dtype),
        grid=(n, cout_p // tco),
        in_specs=[
            pl.BlockSpec(in_block, in_index_map),
            pl.BlockSpec((k9cin, tco), lambda b, co: (0, co)),
            pl.BlockSpec((1, tco), lambda b, co: (0, co)),
            pl.BlockSpec((1, tco), lambda b, co: (0, co)),
        ],
        out_specs=pl.BlockSpec((1, ho, wo, tco), lambda b, co: (b, 0, 0, co)),
        scratch_shapes=[
            pltpu.VMEM((ho + 2, wo + 2, cin), jnp.bfloat16),   # halo-padded input
            pltpu.VMEM((th, wo, 9 * cin), jnp.bfloat16),       # im2col patches
        ],
        compiler_params=pltpu.CompilerParams(
            dimension_semantics=("parallel", "parallel"),      # v7x megacore
            vmem_limit_bytes=VMEM_BUDGET),
    )(x, w, scale, bias)


def pool_conv_bn_relu(x6, w, scale, bias, *, out_dtype=jnp.bfloat16):
    """Fused MaxPool2d(2,2) + Conv2d(3x3, pad=1) + folded BN + ReLU.

    x6: (N, Ho, 2, Wo, 2*Cin) regrouped NHWC input (see down_conv_forward).
    """
    n, ho, _, wo, two_cin = x6.shape
    cin = two_cin // 2
    return _fused_conv_call(
        _pool_conv_kernel, x6, w, scale, bias,
        in_block=(1, ho, 2, wo, two_cin),
        in_index_map=lambda b, co: (b, 0, 0, 0, 0),
        ho=ho, wo=wo, cin=cin, out_dtype=out_dtype)


def conv_bn_relu(x, w, scale, bias, *, out_dtype=jnp.float32):
    """Conv2d(3x3, pad=1) + folded BN + ReLU on an NHWC (lane-padded) input."""
    n, ho, wo, cin = x.shape
    return _fused_conv_call(
        _conv_kernel, x, w, scale, bias,
        in_block=(1, ho, wo, cin),
        in_index_map=lambda b, co: (b, 0, 0, 0),
        ho=ho, wo=wo, cin=cin, out_dtype=out_dtype)


# ----------------------------------------------------------------------------
# Parameter construction (deterministic, synthetic) + BN folding + kernel layout
# ----------------------------------------------------------------------------
def init_downconv_params(key, in_channels, out_channels, eps=1e-5):
    """Synthetic DoubleConv params with BatchNorm (eval) folded, pre-laid-out:
       w:          (9*Cin_kernel, Cout_padded) bf16 im2col weights
       scale/bias: (1, Cout_padded) f32
    conv1 keeps its real Cin (tiny first-stage channel counts would blow up
    HBM traffic if lane-padded); conv2's Cin equals the lane-padded Cout.
    """
    cout_p = _round_up(out_channels, LANE)

    def make_block(key, cin, cin_kernel, cout):
        k = jax.random.split(key, 6)
        w = jax.random.normal(k[0], (cout, cin, 3, 3), jnp.float32) * 0.1  # OIHW
        conv_b = jax.random.normal(k[1], (cout,), jnp.float32) * 0.1
        gamma = 1.0 + 0.1 * jax.random.normal(k[2], (cout,), jnp.float32)
        beta = 0.1 * jax.random.normal(k[3], (cout,), jnp.float32)
        run_mean = 0.1 * jax.random.normal(k[4], (cout,), jnp.float32)
        run_var = jnp.abs(jax.random.normal(k[5], (cout,), jnp.float32)) + 0.5
        # fold conv bias + BN(eval) into per-channel scale / bias
        scale = gamma / jnp.sqrt(run_var + eps)
        bias = beta + (conv_b - run_mean) * scale
        # OIHW -> HWIO -> pad channels -> im2col (9*Cin_kernel, Cout_p) -> bf16
        w_hwio = jnp.transpose(w, (2, 3, 1, 0))                      # (3,3,Ci,Co)
        w_hwio = jnp.pad(w_hwio, ((0, 0), (0, 0),
                                  (0, cin_kernel - cin), (0, cout_p - cout)))
        w_mat = w_hwio.reshape(9 * cin_kernel, cout_p).astype(jnp.bfloat16)
        scale = jnp.pad(scale, (0, cout_p - cout)).reshape(1, cout_p)
        bias = jnp.pad(bias, (0, cout_p - cout)).reshape(1, cout_p)
        return {"w": w_mat, "scale": scale, "bias": bias}

    k1, k2 = jax.random.split(key)
    return {
        "block1": make_block(k1, in_channels, in_channels, out_channels),
        "block2": make_block(k2, out_channels, cout_p, out_channels),
    }


# ----------------------------------------------------------------------------
# DownConv forward (NCHW in / NCHW out, matching PyTorch)
# ----------------------------------------------------------------------------
@functools.partial(jax.jit, static_argnames=("out_channels",))
def down_conv_forward(x_nchw, params, *, out_channels):
    n, cin, h, w = x_nchw.shape
    # PyTorch MaxPool2d(2,2) floors odd spatial dims: crop to even.
    h2, w2 = (h // 2) * 2, (w // 2) * 2
    x_nchw = x_nchw[:, :, :h2, :w2]
    ho, wo = h2 // 2, w2 // 2
    # NCHW -> NHWC layout glue (single XLA transpose), then a metadata-only
    # regroup exposing the 2x2 pool windows for the fused pool+conv kernel.
    x = jnp.transpose(x_nchw, (0, 2, 3, 1))
    x6 = x.reshape(n, ho, 2, wo, 2 * cin)
    b1, b2 = params["block1"], params["block2"]
    h1 = pool_conv_bn_relu(x6, b1["w"], b1["scale"], b1["bias"],
                           out_dtype=jnp.bfloat16)          # bf16 intermediate
    y = conv_bn_relu(h1, b2["w"], b2["scale"], b2["bias"],
                     out_dtype=jnp.float32)
    y = y[..., :out_channels]                               # strip lane padding
    return jnp.transpose(y, (0, 3, 1, 2))                   # NHWC -> NCHW


# ----------------------------------------------------------------------------
# Pure-JAX reference (same folded params) for a correctness check
# ----------------------------------------------------------------------------
def reference_forward(x_nchw, params, out_channels):
    x = jnp.transpose(x_nchw, (0, 2, 3, 1)).astype(jnp.float32)
    n, h, w, c = x.shape
    ho, wo = h // 2, w // 2
    x = x[:, :2 * ho, :2 * wo, :]
    pooled = x.reshape(n, ho, 2, wo, 2, c).max(axis=(2, 4))

    def block(z, p):
        wmat = p["w"].astype(jnp.float32)
        cin_p = wmat.shape[0] // 9
        whwio = wmat.reshape(3, 3, cin_p, wmat.shape[1])
        zp = jnp.pad(z, ((0, 0), (1, 1), (1, 1), (0, cin_p - z.shape[-1])))
        y = jax.lax.conv_general_dilated(
            zp, whwio, window_strides=(1, 1), padding="VALID",
            dimension_numbers=("NHWC", "HWIO", "NHWC"))
        y = y * p["scale"][0] + p["bias"][0]
        return jnp.maximum(y, 0.0)

    hmid = block(pooled, params["block1"])
    y = block(hmid, params["block2"])[..., :out_channels]
    return jnp.transpose(y, (0, 3, 1, 2))


if __name__ == "__main__":
    key = jax.random.PRNGKey(0)
    k_x, k_p = jax.random.split(key)

    batch, in_channels, out_channels, spatial = 2, 4, 8, 16
    x = jax.random.normal(k_x, (batch, in_channels, spatial, spatial),
                          jnp.float32)
    params = init_downconv_params(k_p, in_channels, out_channels)

    out = down_conv_forward(x, params, out_channels=out_channels)
    jax.block_until_ready(out)

    expected_shape = (batch, out_channels, spatial // 2, spatial // 2)
    assert out.shape == expected_shape, (out.shape, expected_shape)
    assert bool(jnp.all(jnp.isfinite(out)))

    ref = reference_forward(x, params, out_channels)
    max_err = float(jnp.max(jnp.abs(out - ref)))
    assert bool(jnp.allclose(out, ref, atol=5e-2, rtol=5e-2)), max_err

    print("KERNEL_OK")
</pallas_src>

<mosaic_0001>
module attributes {stable_mosaic.version = 11 : i64} {
  func.func @_pool_conv_kernel(%arg0: i32, %arg1: i32, %arg2: memref<1x8x2x8x8xf32, #tpu.memory_space<vmem>>, %arg3: memref<36x128xbf16, #tpu.memory_space<vmem>>, %arg4: memref<1x128xf32, #tpu.memory_space<vmem>>, %arg5: memref<1x128xf32, #tpu.memory_space<vmem>>, %arg6: memref<1x8x8x128xbf16, #tpu.memory_space<vmem>>, %arg7: memref<10x10x4xbf16, #tpu.memory_space<vmem>>, %arg8: memref<8x8x36xbf16, #tpu.memory_space<vmem>>) attributes {dimension_semantics = [#tpu.dimension_semantics<parallel>, #tpu.dimension_semantics<parallel>], iteration_bounds = array<i64: 2, 1>, scalar_prefetch = 0 : i64, scratch_operands = 2 : i64, tpu.core_type = #tpu.core_type<tc>, window_params = [{transform_indices = @transform_0, window_bounds = array<i64: 1, 8, 2, 8, 8>}, {transform_indices = @transform_1, window_bounds = array<i64: 36, 128>}, {transform_indices = @transform_2, window_bounds = array<i64: 1, 128>}, {transform_indices = @transform_3, window_bounds = array<i64: 1, 128>}, {transform_indices = @transform_4, window_bounds = array<i64: 1, 8, 8, 128>}]} {
    %c0 = arith.constant 0 : index
    %c0_0 = arith.constant 0 : index
    %c0_1 = arith.constant 0 : index
    %c0_2 = arith.constant 0 : index
    %c0_3 = arith.constant 0 : index
    %0 = vector.load %arg2[%c0, %c0_0, %c0_1, %c0_2, %c0_3] : memref<1x8x2x8x8xf32, #tpu.memory_space<vmem>>, vector<1x8x2x8x8xf32>
    %1 = vector.extract_strided_slice %0 {offsets = [0, 0, 0, 0, 0], sizes = [1, 8, 1, 8, 8], strides = [1, 1, 1, 1, 1]} : vector<1x8x2x8x8xf32> to vector<1x8x1x8x8xf32>
    %2 = vector.shape_cast %1 : vector<1x8x1x8x8xf32> to vector<8x8x8xf32>
    %3 = vector.extract_strided_slice %0 {offsets = [0, 0, 1, 0, 0], sizes = [1, 8, 1, 8, 8], strides = [1, 1, 1, 1, 1]} : vector<1x8x2x8x8xf32> to vector<1x8x1x8x8xf32>
    %4 = vector.shape_cast %3 : vector<1x8x1x8x8xf32> to vector<8x8x8xf32>
    %5 = arith.maximumf %2, %4 : vector<8x8x8xf32>
    %6 = vector.extract_strided_slice %5 {offsets = [0, 0, 0], sizes = [8, 8, 4], strides = [1, 1, 1]} : vector<8x8x8xf32> to vector<8x8x4xf32>
    %7 = vector.extract_strided_slice %5 {offsets = [0, 0, 4], sizes = [8, 8, 4], strides = [1, 1, 1]} : vector<8x8x8xf32> to vector<8x8x4xf32>
    %8 = arith.maximumf %6, %7 : vector<8x8x4xf32>
    %cst = arith.constant 0.000000e+00 : bf16
    %9 = vector.broadcast %cst : bf16 to vector<10x10x4xbf16>
    %c0_4 = arith.constant 0 : index
    %c0_5 = arith.constant 0 : index
    %c0_6 = arith.constant 0 : index
    %10 = vector.load %arg7[%c0_4, %c0_5, %c0_6] : memref<10x10x4xbf16, #tpu.memory_space<vmem>>, vector<10x10x4xbf16>
    tpu.vector_store %arg7[%c0_4, %c0_5, %c0_6], %9 {strides = array<i32>} : memref<10x10x4xbf16, #tpu.memory_space<vmem>>, vector<10x10x4xbf16>,
    %11 = arith.truncf %8 : vector<8x8x4xf32> to vector<8x8x4xbf16>
    %c1 = arith.constant 1 : index
    %c1_7 = arith.constant 1 : index
    %c0_8 = arith.constant 0 : index
    %12 = vector.load %arg7[%c1, %c1_7, %c0_8] : memref<10x10x4xbf16, #tpu.memory_space<vmem>>, vector<8x8x4xbf16>
    tpu.vector_store %arg7[%c1, %c1_7, %c0_8], %11 {strides = array<i32>} : memref<10x10x4xbf16, #tpu.memory_space<vmem>>, vector<8x8x4xbf16>,
    %c0_9 = arith.constant 0 : index
    %c0_10 = arith.constant 0 : index
    %c0_11 = arith.constant 0 : index
    %13 = vector.load %arg7[%c0_9, %c0_10, %c0_11] : memref<10x10x4xbf16, #tpu.memory_space<vmem>>, vector<8x8x4xbf16>
    %c0_12 = arith.constant 0 : index
    %c0_13 = arith.constant 0 : index
    %c0_14 = arith.constant 0 : index
    %14 = vector.load %arg8[%c0_12, %c0_13, %c0_14] : memref<8x8x36xbf16, #tpu.memory_space<vmem>>, vector<8x8x4xbf16>
    tpu.vector_store %arg8[%c0_12, %c0_13, %c0_14], %13 {strides = array<i32>} : memref<8x8x36xbf16, #tpu.memory_space<vmem>>, vector<8x8x4xbf16>,
    %c0_15 = arith.constant 0 : index
    %c1_16 = arith.constant 1 : index
    %c0_17 = arith.constant 0 : index
    %15 = vector.load %arg7[%c0_15, %c1_16, %c0_17] : memref<10x10x4xbf16, #tpu.memory_space<vmem>>, vector<8x8x4xbf16>
    %c0_18 = arith.constant 0 : index
    %c0_19 = arith.constant 0 : index
    %c4 = arith.constant 4 : index
    %16 = vector.load %arg8[%c0_18, %c0_19, %c4] : memref<8x8x36xbf16, #tpu.memory_space<vmem>>, vector<8x8x4xbf16>
    tpu.vector_store %arg8[%c0_18, %c0_19, %c4], %15 {strides = array<i32>} : memref<8x8x36xbf16, #tpu.memory_space<vmem>>, vector<8x8x4xbf16>,
    %c0_20 = arith.constant 0 : index
    %c2 = arith.constant 2 : index
    %c0_21 = arith.constant 0 : index
    %17 = vector.load %arg7[%c0_20, %c2, %c0_21] : memref<10x10x4xbf16, #tpu.memory_space<vmem>>, vector<8x8x4xbf16>
    %c0_22 = arith.constant 0 : index
    %c0_23 = arith.constant 0 : index
    %c8 = arith.constant 8 : index
    %18 = vector.load %arg8[%c0_22, %c0_23, %c8] : memref<8x8x36xbf16, #tpu.memory_space<vmem>>, vector<8x8x4xbf16>
    tpu.vector_store %arg8[%c0_22, %c0_23, %c8], %17 {strides = array<i32>} : memref<8x8x36xbf16, #tpu.memory_space<vmem>>, vector<8x8x4xbf16>,
    %c1_24 = arith.constant 1 : index
    %c0_25 = arith.constant 0 : index
    %c0_26 = arith.constant 0 : index
    %19 = vector.load %arg7[%c1_24, %c0_25, %c0_26] : memref<10x10x4xbf16, #tpu.memory_space<vmem>>, vector<8x8x4xbf16>
    %c0_27 = arith.constant 0 : index
    %c0_28 = arith.constant 0 : index
    %c12 = arith.constant 12 : index
    %20 = vector.load %arg8[%c0_27, %c0_28, %c12] : memref<8x8x36xbf16, #tpu.memory_space<vmem>>, vector<8x8x4xbf16>
    tpu.vector_store %arg8[%c0_27, %c0_28, %c12], %19 {strides = array<i32>} : memref<8x8x36xbf16, #tpu.memory_space<vmem>>, vector<8x8x4xbf16>,
    %c1_29 = arith.constant 1 : index
    %c1_30 = arith.constant 1 : index
    %c0_31 = arith.constant 0 : index
    %21 = vector.load %arg7[%c1_29, %c1_30, %c0_31] : memref<10x10x4xbf16, #tpu.memory_space<vmem>>, vector<8x8x4xbf16>
    %c0_32 = arith.constant 0 : index
    %c0_33 = arith.constant 0 : index
    %c16 = arith.constant 16 : index
    %22 = vector.load %arg8[%c0_32, %c0_33, %c16] : memref<8x8x36xbf16, #tpu.memory_space<vmem>>, vector<8x8x4xbf16>
    tpu.vector_store %arg8[%c0_32, %c0_33, %c16], %21 {strides = array<i32>} : memref<8x8x36xbf16, #tpu.memory_space<vmem>>, vector<8x8x4xbf16>,
    %c1_34 = arith.constant 1 : index
    %c2_35 = arith.constant 2 : index
    %c0_36 = arith.constant 0 : index
    %23 = vector.load %arg7[%c1_34, %c2_35, %c0_36] : memref<10x10x4xbf16, #tpu.memory_space<vmem>>, vector<8x8x4xbf16>
    %c0_37 = arith.constant 0 : index
    %c0_38 = arith.constant 0 : index
    %c20 = arith.constant 20 : index
    %24 = vector.load %arg8[%c0_37, %c0_38, %c20] : memref<8x8x36xbf16, #tpu.memory_space<vmem>>, vector<8x8x4xbf16>
    tpu.vector_store %arg8[%c0_37, %c0_38, %c20], %23 {strides = array<i32>} : memref<8x8x36xbf16, #tpu.memory_space<vmem>>, vector<8x8x4xbf16>,
    %c2_39 = arith.constant 2 : index
    %c0_40 = arith.constant 0 : index
    %c0_41 = arith.constant 0 : index
    %25 = vector.load %arg7[%c2_39, %c0_40, %c0_41] : memref<10x10x4xbf16, #tpu.memory_space<vmem>>, vector<8x8x4xbf16>
    %c0_42 = arith.constant 0 : index
    %c0_43 = arith.constant 0 : index
    %c24 = arith.constant 24 : index
    %26 = vector.load %arg8[%c0_42, %c0_43, %c24] : memref<8x8x36xbf16, #tpu.memory_space<vmem>>, vector<8x8x4xbf16>
    tpu.vector_store %arg8[%c0_42, %c0_43, %c24], %25 {strides = array<i32>} : memref<8x8x36xbf16, #tpu.memory_space<vmem>>, vector<8x8x4xbf16>,
    %c2_44 = arith.constant 2 : index
    %c1_45 = arith.constant 1 : index
    %c0_46 = arith.constant 0 : index
    %27 = vector.load %arg7[%c2_44, %c1_45, %c0_46] : memref<10x10x4xbf16, #tpu.memory_space<vmem>>, vector<8x8x4xbf16>
    %c0_47 = arith.constant 0 : index
    %c0_48 = arith.constant 0 : index
    %c28 = arith.constant 28 : index
    %28 = vector.load %arg8[%c0_47, %c0_48, %c28] : memref<8x8x36xbf16, #tpu.memory_space<vmem>>, vector<8x8x4xbf16>
    tpu.vector_store %arg8[%c0_47, %c0_48, %c28], %27 {strides = array<i32>} : memref<8x8x36xbf16, #tpu.memory_space<vmem>>, vector<8x8x4xbf16>,
    %c2_49 = arith.constant 2 : index
    %c2_50 = arith.constant 2 : index
    %c0_51 = arith.constant 0 : index
    %29 = vector.load %arg7[%c2_49, %c2_50, %c0_51] : memref<10x10x4xbf16, #tpu.memory_space<vmem>>, vector<8x8x4xbf16>
    %c0_52 = arith.constant 0 : index
    %c0_53 = arith.constant 0 : index
    %c32 = arith.constant 32 : index
    %30 = vector.load %arg8[%c0_52, %c0_53, %c32] : memref<8x8x36xbf16, #tpu.memory_space<vmem>>, vector<8x8x4xbf16>
    tpu.vector_store %arg8[%c0_52, %c0_53, %c32], %29 {strides = array<i32>} : memref<8x8x36xbf16, #tpu.memory_space<vmem>>, vector<8x8x4xbf16>,
    %c0_54 = arith.constant 0 : index
    %c0_55 = arith.constant 0 : index
    %c0_56 = arith.constant 0 : index
    %31 = vector.load %arg8[%c0_54, %c0_55, %c0_56] : memref<8x8x36xbf16, #tpu.memory_space<vmem>>, vector<8x8x36xbf16>
    %32 = vector.shape_cast %31 : vector<8x8x36xbf16> to vector<64x36xbf16>
    %c0_57 = arith.constant 0 : index
    %c0_58 = arith.constant 0 : index
    %33 = vector.load %arg3[%c0_57, %c0_58] : memref<36x128xbf16, #tpu.memory_space<vmem>>, vector<36x128xbf16>
    %cst_59 = arith.constant dense<0.000000e+00> : vector<64x128xf32>
    %34 = tpu.matmul %32, %33, %cst_59 {dimension_numbers = #tpu.dot_dimension_numbers<[1], [0], [0], [1], [0, 0, 1, 1], [], []>} : vector<64x36xbf16>, vector<36x128xbf16>, vector<64x128xf32> -> vector<64x128xf32>
    %c0_60 = arith.constant 0 : index
    %c0_61 = arith.constant 0 : index
    %35 = vector.load %arg4[%c0_60, %c0_61] : memref<1x128xf32, #tpu.memory_space<vmem>>, vector<1x128xf32>
    %36 = vector.broadcast %35 : vector<1x128xf32> to vector<64x128xf32>
    %37 = arith.mulf %34, %36 : vector<64x128xf32>
    %c0_62 = arith.constant 0 : index
    %c0_63 = arith.constant 0 : index
    %38 = vector.load %arg5[%c0_62, %c0_63] : memref<1x128xf32, #tpu.memory_space<vmem>>, vector<1x128xf32>
    %39 = vector.broadcast %38 : vector<1x128xf32> to vector<64x128xf32>
    %40 = arith.addf %37, %39 : vector<64x128xf32>
    %cst_64 = arith.constant 0.000000e+00 : f32
    %41 = vector.broadcast %cst_64 : f32 to vector<64x128xf32>
    %42 = arith.maximumf %40, %41 : vector<64x128xf32>
    %43 = vector.shape_cast %42 : vector<64x128xf32> to vector<8x8x128xf32>
    %44 = arith.truncf %43 : vector<8x8x128xf32> to vector<8x8x128xbf16>
    %c0_65 = arith.constant 0 : index
    %c0_66 = arith.constant 0 : index
    %c0_67 = arith.constant 0 : index
    %c0_68 = arith.constant 0 : index
    %45 = vector.load %arg6[%c0_65, %c0_66, %c0_67, %c0_68] : memref<1x8x8x128xbf16, #tpu.memory_space<vmem>>, vector<1x8x8x128xbf16>
    %46 = vector.shape_cast %45 : vector<1x8x8x128xbf16> to vector<8x8x128xbf16>
    %47 = vector.shape_cast %44 : vector<8x8x128xbf16> to vector<1x8x8x128xbf16>
    tpu.vector_store %arg6[%c0_65, %c0_66, %c0_67, %c0_68], %47 {strides = array<i32>} : memref<1x8x8x128xbf16, #tpu.memory_space<vmem>>, vector<1x8x8x128xbf16>,
    return
  }
  func.func @transform_0(%arg0: i32, %arg1: i32) -> (i32, i32, i32, i32, i32) {
    %c0_i32 = arith.constant 0 : i32
    %c0_i32_0 = arith.constant 0 : i32
    %c0_i32_1 = arith.constant 0 : i32
    %c0_i32_2 = arith.constant 0 : i32
    %c0_i32_3 = arith.constant 0 : i32
    return %arg0, %c0_i32, %c0_i32_0, %c0_i32_1, %c0_i32_2 : i32, i32, i32, i32, i32
  }
  func.func @transform_1(%arg0: i32, %arg1: i32) -> (i32, i32) {
    %c0_i32 = arith.constant 0 : i32
    %c0_i32_0 = arith.constant 0 : i32
    return %c0_i32, %arg1 : i32, i32
  }
  func.func @transform_2(%arg0: i32, %arg1: i32) -> (i32, i32) {
    %c0_i32 = arith.constant 0 : i32
    %c0_i32_0 = arith.constant 0 : i32
    return %c0_i32, %arg1 : i32, i32
  }
  func.func @transform_3(%arg0: i32, %arg1: i32) -> (i32, i32) {
    %c0_i32 = arith.constant 0 : i32
    %c0_i32_0 = arith.constant 0 : i32
    return %c0_i32, %arg1 : i32, i32
  }
  func.func @transform_4(%arg0: i32, %arg1: i32) -> (i32, i32, i32, i32) {
    %c0_i32 = arith.constant 0 : i32
    %c0_i32_0 = arith.constant 0 : i32
    %c0_i32_1 = arith.constant 0 : i32
    return %arg0, %c0_i32, %c0_i32_0, %arg1 : i32, i32, i32, i32
  }
}

module attributes {stable_mosaic.version = 11 : i64} {
  func.func @_conv_kernel(%arg0: i32, %arg1: i32, %arg2: memref<1x8x8x128xbf16, #tpu.memory_space<vmem>>, %arg3: memref<1152x128xbf16, #tpu.memory_space<vmem>>, %arg4: memref<1x128xf32, #tpu.memory_space<vmem>>, %arg5: memref<1x128xf32, #tpu.memory_space<vmem>>, %arg6: memref<1x8x8x128xf32, #tpu.memory_space<vmem>>, %arg7: memref<10x10x128xbf16, #tpu.memory_space<vmem>>, %arg8: memref<8x8x1152xbf16, #tpu.memory_space<vmem>>) attributes {dimension_semantics = [#tpu.dimension_semantics<parallel>, #tpu.dimension_semantics<parallel>], iteration_bounds = array<i64: 2, 1>, scalar_prefetch = 0 : i64, scratch_operands = 2 : i64, tpu.core_type = #tpu.core_type<tc>, window_params = [{transform_indices = @transform_0, window_bounds = array<i64: 1, 8, 8, 128>}, {transform_indices = @transform_1, window_bounds = array<i64: 1152, 128>}, {transform_indices = @transform_2, window_bounds = array<i64: 1, 128>}, {transform_indices = @transform_3, window_bounds = array<i64: 1, 128>}, {transform_indices = @transform_4, window_bounds = array<i64: 1, 8, 8, 128>}]} {
    %c0 = arith.constant 0 : index
    %c0_0 = arith.constant 0 : index
    %c0_1 = arith.constant 0 : index
    %c0_2 = arith.constant 0 : index
    %0 = vector.load %arg2[%c0, %c0_0, %c0_1, %c0_2] : memref<1x8x8x128xbf16, #tpu.memory_space<vmem>>, vector<1x8x8x128xbf16>
    %1 = vector.shape_cast %0 : vector<1x8x8x128xbf16> to vector<8x8x128xbf16>
    %cst = arith.constant 0.000000e+00 : bf16
    %2 = vector.broadcast %cst : bf16 to vector<10x10x128xbf16>
    %c0_3 = arith.constant 0 : index
    %c0_4 = arith.constant 0 : index
    %c0_5 = arith.constant 0 : index
    %3 = vector.load %arg7[%c0_3, %c0_4, %c0_5] : memref<10x10x128xbf16, #tpu.memory_space<vmem>>, vector<10x10x128xbf16>
    tpu.vector_store %arg7[%c0_3, %c0_4, %c0_5], %2 {strides = array<i32>} : memref<10x10x128xbf16, #tpu.memory_space<vmem>>, vector<10x10x128xbf16>,
    %c1 = arith.constant 1 : index
    %c1_6 = arith.constant 1 : index
    %c0_7 = arith.constant 0 : index
    %4 = vector.load %arg7[%c1, %c1_6, %c0_7] : memref<10x10x128xbf16, #tpu.memory_space<vmem>>, vector<8x8x128xbf16>
    tpu.vector_store %arg7[%c1, %c1_6, %c0_7], %1 {strides = array<i32>} : memref<10x10x128xbf16, #tpu.memory_space<vmem>>, vector<8x8x128xbf16>,
    %c0_8 = arith.constant 0 : index
    %c0_9 = arith.constant 0 : index
    %c0_10 = arith.constant 0 : index
    %5 = vector.load %arg7[%c0_8, %c0_9, %c0_10] : memref<10x10x128xbf16, #tpu.memory_space<vmem>>, vector<8x8x128xbf16>
    %c0_11 = arith.constant 0 : index
    %c0_12 = arith.constant 0 : index
    %c0_13 = arith.constant 0 : index
    %6 = vector.load %arg8[%c0_11, %c0_12, %c0_13] : memref<8x8x1152xbf16, #tpu.memory_space<vmem>>, vector<8x8x128xbf16>
    tpu.vector_store %arg8[%c0_11, %c0_12, %c0_13], %5 {strides = array<i32>} : memref<8x8x1152xbf16, #tpu.memory_space<vmem>>, vector<8x8x128xbf16>,
    %c0_14 = arith.constant 0 : index
    %c1_15 = arith.constant 1 : index
    %c0_16 = arith.constant 0 : index
    %7 = vector.load %arg7[%c0_14, %c1_15, %c0_16] : memref<10x10x128xbf16, #tpu.memory_space<vmem>>, vector<8x8x128xbf16>
    %c0_17 = arith.constant 0 : index
    %c0_18 = arith.constant 0 : index
    %c128 = arith.constant 128 : index
    %8 = vector.load %arg8[%c0_17, %c0_18, %c128] : memref<8x8x1152xbf16, #tpu.memory_space<vmem>>, vector<8x8x128xbf16>
    tpu.vector_store %arg8[%c0_17, %c0_18, %c128], %7 {strides = array<i32>} : memref<8x8x1152xbf16, #tpu.memory_space<vmem>>, vector<8x8x128xbf16>,
    %c0_19 = arith.constant 0 : index
    %c2 = arith.constant 2 : index
    %c0_20 = arith.constant 0 : index
    %9 = vector.load %arg7[%c0_19, %c2, %c0_20] : memref<10x10x128xbf16, #tpu.memory_space<vmem>>, vector<8x8x128xbf16>
    %c0_21 = arith.constant 0 : index
    %c0_22 = arith.constant 0 : index
    %c256 = arith.constant 256 : index
    %10 = vector.load %arg8[%c0_21, %c0_22, %c256] : memref<8x8x1152xbf16, #tpu.memory_space<vmem>>, vector<8x8x128xbf16>
    tpu.vector_store %arg8[%c0_21, %c0_22, %c256], %9 {strides = array<i32>} : memref<8x8x1152xbf16, #tpu.memory_space<vmem>>, vector<8x8x128xbf16>,
    %c1_23 = arith.constant 1 : index
    %c0_24 = arith.constant 0 : index
    %c0_25 = arith.constant 0 : index
    %11 = vector.load %arg7[%c1_23, %c0_24, %c0_25] : memref<10x10x128xbf16, #tpu.memory_space<vmem>>, vector<8x8x128xbf16>
    %c0_26 = arith.constant 0 : index
    %c0_27 = arith.constant 0 : index
    %c384 = arith.constant 384 : index
    %12 = vector.load %arg8[%c0_26, %c0_27, %c384] : memref<8x8x1152xbf16, #tpu.memory_space<vmem>>, vector<8x8x128xbf16>
    tpu.vector_store %arg8[%c0_26, %c0_27, %c384], %11 {strides = array<i32>} : memref<8x8x1152xbf16, #tpu.memory_space<vmem>>, vector<8x8x128xbf16>,
    %c1_28 = arith.constant 1 : index
    %c1_29 = arith.constant 1 : index
    %c0_30 = arith.constant 0 : index
    %13 = vector.load %arg7[%c1_28, %c1_29, %c0_30] : memref<10x10x128xbf16, #tpu.memory_space<vmem>>, vector<8x8x128xbf16>
    %c0_31 = arith.constant 0 : index
    %c0_32 = arith.constant 0 : index
    %c512 = arith.constant 512 : index
    %14 = vector.load %arg8[%c0_31, %c0_32, %c512] : memref<8x8x1152xbf16, #tpu.memory_space<vmem>>, vector<8x8x128xbf16>
    tpu.vector_store %arg8[%c0_31, %c0_32, %c512], %13 {strides = array<i32>} : memref<8x8x1152xbf16, #tpu.memory_space<vmem>>, vector<8x8x128xbf16>,
    %c1_33 = arith.constant 1 : index
    %c2_34 = arith.constant 2 : index
    %c0_35 = arith.constant 0 : index
    %15 = vector.load %arg7[%c1_33, %c2_34, %c0_35] : memref<10x10x128xbf16, #tpu.memory_space<vmem>>, vector<8x8x128xbf16>
    %c0_36 = arith.constant 0 : index
    %c0_37 = arith.constant 0 : index
    %c640 = arith.constant 640 : index
    %16 = vector.load %arg8[%c0_36, %c0_37, %c640] : memref<8x8x1152xbf16, #tpu.memory_space<vmem>>, vector<8x8x128xbf16>
    tpu.vector_store %arg8[%c0_36, %c0_37, %c640], %15 {strides = array<i32>} : memref<8x8x1152xbf16, #tpu.memory_space<vmem>>, vector<8x8x128xbf16>,
    %c2_38 = arith.constant 2 : index
    %c0_39 = arith.constant 0 : index
    %c0_40 = arith.constant 0 : index
    %17 = vector.load %arg7[%c2_38, %c0_39, %c0_40] : memref<10x10x128xbf16, #tpu.memory_space<vmem>>, vector<8x8x128xbf16>
    %c0_41 = arith.constant 0 : index
    %c0_42 = arith.constant 0 : index
    %c768 = arith.constant 768 : index
    %18 = vector.load %arg8[%c0_41, %c0_42, %c768] : memref<8x8x1152xbf16, #tpu.memory_space<vmem>>, vector<8x8x128xbf16>
    tpu.vector_store %arg8[%c0_41, %c0_42, %c768], %17 {strides = array<i32>} : memref<8x8x1152xbf16, #tpu.memory_space<vmem>>, vector<8x8x128xbf16>,
    %c2_43 = arith.constant 2 : index
    %c1_44 = arith.constant 1 : index
    %c0_45 = arith.constant 0 : index
    %19 = vector.load %arg7[%c2_43, %c1_44, %c0_45] : memref<10x10x128xbf16, #tpu.memory_space<vmem>>, vector<8x8x128xbf16>
    %c0_46 = arith.constant 0 : index
    %c0_47 = arith.constant 0 : index
    %c896 = arith.constant 896 : index
    %20 = vector.load %arg8[%c0_46, %c0_47, %c896] : memref<8x8x1152xbf16, #tpu.memory_space<vmem>>, vector<8x8x128xbf16>
    tpu.vector_store %arg8[%c0_46, %c0_47, %c896], %19 {strides = array<i32>} : memref<8x8x1152xbf16, #tpu.memory_space<vmem>>, vector<8x8x128xbf16>,
    %c2_48 = arith.constant 2 : index
    %c2_49 = arith.constant 2 : index
    %c0_50 = arith.constant 0 : index
    %21 = vector.load %arg7[%c2_48, %c2_49, %c0_50] : memref<10x10x128xbf16, #tpu.memory_space<vmem>>, vector<8x8x128xbf16>
    %c0_51 = arith.constant 0 : index
    %c0_52 = arith.constant 0 : index
    %c1024 = arith.constant 1024 : index
    %22 = vector.load %arg8[%c0_51, %c0_52, %c1024] : memref<8x8x1152xbf16, #tpu.memory_space<vmem>>, vector<8x8x128xbf16>
    tpu.vector_store %arg8[%c0_51, %c0_52, %c1024], %21 {strides = array<i32>} : memref<8x8x1152xbf16, #tpu.memory_space<vmem>>, vector<8x8x128xbf16>,
    %c0_53 = arith.constant 0 : index
    %c0_54 = arith.constant 0 : index
    %c0_55 = arith.constant 0 : index
    %23 = vector.load %arg8[%c0_53, %c0_54, %c0_55] : memref<8x8x1152xbf16, #tpu.memory_space<vmem>>, vector<8x8x1152xbf16>
    %24 = vector.shape_cast %23 : vector<8x8x1152xbf16> to vector<64x1152xbf16>
    %c0_56 = arith.constant 0 : index
    %c0_57 = arith.constant 0 : index
    %25 = vector.load %arg3[%c0_56, %c0_57] : memref<1152x128xbf16, #tpu.memory_space<vmem>>, vector<1152x128xbf16>
    %cst_58 = arith.constant dense<0.000000e+00> : vector<64x128xf32>
    %26 = tpu.matmul %24, %25, %cst_58 {dimension_numbers = #tpu.dot_dimension_numbers<[1], [0], [0], [1], [0, 0, 1, 1], [], []>} : vector<64x1152xbf16>, vector<1152x128xbf16>, vector<64x128xf32> -> vector<64x128xf32>
    %c0_59 = arith.constant 0 : index
    %c0_60 = arith.constant 0 : index
    %27 = vector.load %arg4[%c0_59, %c0_60] : memref<1x128xf32, #tpu.memory_space<vmem>>, vector<1x128xf32>
    %28 = vector.broadcast %27 : vector<1x128xf32> to vector<64x128xf32>
    %29 = arith.mulf %26, %28 : vector<64x128xf32>
    %c0_61 = arith.constant 0 : index
    %c0_62 = arith.constant 0 : index
    %30 = vector.load %arg5[%c0_61, %c0_62] : memref<1x128xf32, #tpu.memory_space<vmem>>, vector<1x128xf32>
    %31 = vector.broadcast %30 : vector<1x128xf32> to vector<64x128xf32>
    %32 = arith.addf %29, %31 : vector<64x128xf32>
    %cst_63 = arith.constant 0.000000e+00 : f32
    %33 = vector.broadcast %cst_63 : f32 to vector<64x128xf32>
    %34 = arith.maximumf %32, %33 : vector<64x128xf32>
    %35 = vector.shape_cast %34 : vector<64x128xf32> to vector<8x8x128xf32>
    %c0_64 = arith.constant 0 : index
    %c0_65 = arith.constant 0 : index
    %c0_66 = arith.constant 0 : index
    %c0_67 = arith.constant 0 : index
    %36 = vector.load %arg6[%c0_64, %c0_65, %c0_66, %c0_67] : memref<1x8x8x128xf32, #tpu.memory_space<vmem>>, vector<1x8x8x128xf32>
    %37 = vector.shape_cast %36 : vector<1x8x8x128xf32> to vector<8x8x128xf32>
    %38 = vector.shape_cast %35 : vector<8x8x128xf32> to vector<1x8x8x128xf32>
    tpu.vector_store %arg6[%c0_64, %c0_65, %c0_66, %c0_67], %38 {strides = array<i32>} : memref<1x8x8x128xf32, #tpu.memory_space<vmem>>, vector<1x8x8x128xf32>,
    return
  }
  func.func @transform_0(%arg0: i32, %arg1: i32) -> (i32, i32, i32, i32) {
    %c0_i32 = arith.constant 0 : i32
    %c0_i32_0 = arith.constant 0 : i32
    %c0_i32_1 = arith.constant 0 : i32
    %c0_i32_2 = arith.constant 0 : i32
    return %arg0, %c0_i32, %c0_i32_0, %c0_i32_1 : i32, i32, i32, i32
  }
  func.func @transform_1(%arg0: i32, %arg1: i32) -> (i32, i32) {
    %c0_i32 = arith.constant 0 : i32
    %c0_i32_0 = arith.constant 0 : i32
    return %c0_i32, %arg1 : i32, i32
  }
  func.func @transform_2(%arg0: i32, %arg1: i32) -> (i32, i32) {
    %c0_i32 = arith.constant 0 : i32
    %c0_i32_0 = arith.constant 0 : i32
    return %c0_i32, %arg1 : i32, i32
  }
  func.func @transform_3(%arg0: i32, %arg1: i32) -> (i32, i32) {
    %c0_i32 = arith.constant 0 : i32
    %c0_i32_0 = arith.constant 0 : i32
    return %c0_i32, %arg1 : i32, i32
  }
  func.func @transform_4(%arg0: i32, %arg1: i32) -> (i32, i32, i32, i32) {
    %c0_i32 = arith.constant 0 : i32
    %c0_i32_0 = arith.constant 0 : i32
    %c0_i32_1 = arith.constant 0 : i32
    return %arg0, %c0_i32, %c0_i32_0, %arg1 : i32, i32, i32, i32
  }
}

</mosaic_0001>

<bundles_post_ra>
// kernel: down_conv_forward.2
= control target key start
LH: loop header
LB: loop body
LE: loop exit
PB: predicated region body
PF: predicated region fallthrough
CT: control target
= control target key end

     0   :  { %s1954_s15 = smov 0   ;;  %s1956_s16 = smov 0   ;;  %s2455_s0 = inlined_call_operand.vmem [shape: f32[2,8,2,8,8], index: 0, kind: input, shape index: {}]   ;;  %s2456_s1 = inlined_call_operand.vmem [shape: bf16[36,128], index: 1, kind: input, shape index: {}]   ;;  %s2457_s2 = inlined_call_operand.vmem [shape: f32[1,128], index: 2, kind: input, shape index: {}]   ;;  %s2458_s3 = inlined_call_operand.vmem [shape: f32[1,128], index: 3, kind: input, shape index: {}]   ;;  %s2459_s4 = inlined_call_operand.vmem [shape: bf16[2,8,8,128], index: 4, kind: output, shape index: {}]  }
   0x1   :  { %s1958_s17 = smov 0  }
   0x2 LB: > { %s26_s18 = sadd.s32 1, %s1913_s16  ;;  %p1720_p0 = scmp.ge.s32.totalorder %s1917_s17, 1  ;;  %s1917_s17 = sphi %s1958_s17, %s14_s17   ;;  %s1913_s16 = sphi %s1956_s16, %s2469_s16   ;;  %s1909_s15 = sphi %s1954_s15, %s2468_s15  }
   0x3   : > { %p28_p1 = scmp.ge.s32.totalorder %s26_s18, 2  ;;  %p201_p2 = scmp.lt.s32.totalorder %s1917_s17, 3 }
   0x5   : > { %s2471_s18 = smov (%p28_p1, %s26_s18), 0  ;;  %p202_p3 = pnand %p1720_p0, %p201_p2 }
   0x6   : > { %p240_p4 = scmp.lt.s32.totalorder (!%p202_p3), %s1909_s15, 1  ;;  %vm328_vm0 = vcmask (!%p202_p3), 27648   ;;  %vm330_vm1 = vcmask (!%p202_p3), 24576   ;;  %v1919_v0 = vmov (!%p202_p3), 0   ;;  %s1920_s23 = smov (!%p202_p3), 124   ;;  %vm729_vm2 = vcmask (!%p202_p3), 1042432  }
   0x7   : > { %205 = sbr.rel (%p202_p3) target bundleno = 632 (0x278), region = 36  ;;  %332 = vst.msk [vmem:[#allocation2 + $0x8] sm:$0xf] (!%p202_p3), %vm328_vm0, %v1919_v0  ;;  %338 = vst.msk [vmem:[#allocation2 + $0x20] sm:$0xf] (!%p202_p3), %vm328_vm0, %v1919_v0  ;;  %vm730_vm3 = vcmask (!%p202_p3), 1046532  }
   0x8   : > { %333 = vst.msk [vmem:[#allocation2 + $0xc] sm:$0x1] (!%p202_p3), %vm330_vm1, %v1919_v0  ;;  %339 = vst.msk [vmem:[#allocation2 + $0x24] sm:$0x1] (!%p202_p3), %vm330_vm1, %v1919_v0  ;;  %vm549_vm5 = vsmask.f32 (!%p202_p3), 3328 }
   0x9   : > { %329 = vst.msk [vmem:[#allocation2] sm:$0xf] (!%p202_p3), %vm328_vm0, %v1919_v0  ;;  %334 = vst.msk [vmem:[#allocation2 + $0x10] sm:$0xf] (!%p202_p3), %vm328_vm0, %v1919_v0  ;;  %vm550_vm6 = vsmask.f32 (!%p202_p3), 7440 }
   0xa   : > { %331 = vst.msk [vmem:[#allocation2 + $0x4] sm:$0x1] (!%p202_p3), %vm330_vm1, %v1919_v0  ;;  %335 = vst.msk [vmem:[#allocation2 + $0x14] sm:$0x1] (!%p202_p3), %vm330_vm1, %v1919_v0  ;;  %s1921_s24 = smov (!%p202_p3), 8   ;;  %s1922_s25 = smov (!%p202_p3), 24  }
   0xb   : > { %336 = vst.msk [vmem:[#allocation2 + $0x18] sm:$0xf] (!%p202_p3), %vm328_vm0, %v1919_v0  ;;  %340 = vst.msk [vmem:[#allocation2 + $0x28] sm:$0xf] (!%p202_p3), %vm328_vm0, %v1919_v0  ;;  %s1923_s26 = smov (!%p202_p3), 4   ;;  %s1924_s27 = smov (!%p202_p3), 28  }
   0xc   : > { %337 = vst.msk [vmem:[#allocation2 + $0x1c] sm:$0x1] (!%p202_p3), %vm330_vm1, %v1919_v0  ;;  %341 = vst.msk [vmem:[#allocation2 + $0x2c] sm:$0x1] (!%p202_p3), %vm330_vm1, %v1919_v0  ;;  %vm464_vm8 = vsmask.f32 (!%p202_p3), 7938 }
   0xd   : > { %342 = vst.msk [vmem:[#allocation2 + $0x30] sm:$0xf] (!%p202_p3), %vm328_vm0, %v1919_v0  ;;  %344 = vst.msk [vmem:[#allocation2 + $0x38] sm:$0xf] (!%p202_p3), %vm328_vm0, %v1919_v0  ;;  %vm470_vm9 = vsmask.f32 (!%p202_p3), 256 }
   0xe   : > { %343 = vst.msk [vmem:[#allocation2 + $0x34] sm:$0x1] %vm330_vm1, %v1919_v0  ;;  %345 = vst.msk [vmem:[#allocation2 + $0x3c] sm:$0x1] %vm330_vm1, %v1919_v0  ;;  %s2473_s15 = smov (!%p240_p4, %s1909_s15), 1  ;;  %vm688_vm12 = vcmask 60448  }
   0xf   : > { %346 = vst.msk [vmem:[#allocation2 + $0x40] sm:$0xf] %vm328_vm0, %v1919_v0  ;;  %348 = vst.msk [vmem:[#allocation2 + $0x48] sm:$0xf] %vm328_vm0, %v1919_v0  ;;  %s1772_s19 = sshll.u32 %s2473_s15, 7  ;;  %vm788_vm13 = vcmask 93248  }
  0x10   : > { %347 = vst.msk [vmem:[#allocation2 + $0x44] sm:$0x1] %vm330_vm1, %v1919_v0  ;;  %349 = vst.msk [vmem:[#allocation2 + $0x4c] sm:$0x1] %vm330_vm1, %v1919_v0  ;;  %s244_s22 = scalar_lea.vmem %s2455_s0, %s1772_s19  ;;  %v697_v29 = vld [vmem:[#allocation2] sm:$0xe] }
  0x11   : > { %v264_v1 = vld [vmem:[%s244_s22] sm:$0xff]  ;;  %v265_v2 = vld [vmem:[%s244_s22 + $0x8] sm:$0xff]  ;;  %v270_v3 = vld [vmem:[%s244_s22 + $0x30] sm:$0xff]  ;;  %v1733_v31 = vrot.slane %v697_v29, 9  ;;  %s1925_s28 = smov 12   ;;  %s1926_s29 = smov 20  }
  0x12   : > { %v271_v4 = vld [vmem:[%s244_s22 + $0x38] sm:$0xff]  ;;  %v2004_v5 = vmax.f32 %v264_v1, %v265_v2  ;;  %v268_v6 = vld [vmem:[%s244_s22 + $0x20] sm:$0xff]  ;;  %v269_v7 = vld [vmem:[%s244_s22 + $0x28] sm:$0xff]  ;;  %s1927_s30 = smov 32   ;;  %s1928_s5 = smov 16   ;;  %vm837_vm14 = vcmask 126048  }
  0x13   : > { %v2006_v8 = vmax.f32 %v270_v3, %v271_v4  ;;  %v274_v9 = vld [vmem:[%s244_s22 + $0x50] sm:$0xff]  ;;  %v275_v10 = vld [vmem:[%s244_s22 + $0x58] sm:$0xff]  ;;  %v2008_v11 = vmax.f32 %v268_v6, %v269_v7  ;;  %v272_v15 = vld [vmem:[%s244_s22 + $0x40] sm:$0xff]  ;;  %vm1473_vm15 = vcmask 1041408   ;;  %s1773_s20 = sshll.u32 %s2473_s15, 5 }
  0x14   : > { %v266_v12 = vld [vmem:[%s244_s22 + $0x10] sm:$0xff]  ;;  %v2010_v13 = vmax.f32 %v274_v9, %v275_v10  ;;  %v267_v14 = vld [vmem:[%s244_s22 + $0x18] sm:$0xff]  ;;  %v273_v16 = vld [vmem:[%s244_s22 + $0x48] sm:$0xff] }
  0x15   : > { %v1868_v17 = vpack.i.bf16 %v2006_v8, %v2004_v5  ;;  %v2014_v18 = vmax.f32 %v266_v12, %v267_v14  ;;  %v2016_v19 = vmax.f32 %v272_v15, %v273_v16  ;;  %v276_v20 = vld [vmem:[%s244_s22 + $0x60] sm:$0xff]  ;;  %v277_v21 = vld [vmem:[%s244_s22 + $0x68] sm:$0xff]  ;;  %v278_v22 = vld [vmem:[%s244_s22 + $0x70] sm:$0xff] }
  0x16   : > { %v1878_v23 = vpack.i.bf16 %v2010_v13, %v2008_v11  ;;  %v279_v24 = vld [vmem:[%s244_s22 + $0x78] sm:$0xff]  ;;  %v2020_v25 = vmax.f32 %v276_v20, %v277_v21  ;;  %v698_v30 = vld [vmem:[#allocation2 + $0x4] sm:$0x1]  ;;  %vm2028_vm4 = vmor %vm729_vm2, %vm730_vm3  ;;  %vm1145_vm2 = vcmask 224448   ;;  %vm1306_vm3 = vcmask 257248  }
  0x17   : > { %1869 = vrot.lane.b32.xlu0 %v1868_v17, %s1920_s23  ;;  %v1873_v26 = vpack.i.bf16 %v2014_v18, %v2016_v19  ;;  %v2024_v27 = vmax.f32 %v278_v22, %v279_v24  ;;  %v734_v32 = vrot.slane %v698_v30, 5  ;;  %v533_v34 = vld [vmem:[#allocation2] sm:$0xf]  ;;  %v534_v35 = vld [vmem:[#allocation2 + $0x4] sm:$0x1]  ;;  %vm2038_vm7 = vmor %vm549_vm5, %vm550_vm6  ;;  %vm1460_vm5 = vcmask 293888  }
  0x18   : > { %1879 = vrot.lane.b32.xlu1 %v1878_v23, %s1920_s23  ;;  %v553_v37 = vshrl.u32 %v533_v34, 16  ;;  %v556_v38 = vshll.u32 %v533_v34, 16  ;;  %v562_v39 = vshll.u32 %v534_v35, 16  ;;  %v1168_v40 = vld [vmem:[#allocation2 + $0x48] sm:$0xf]  ;;  %vm2054_vm10 = vmand %vm328_vm0, %vm464_vm8 }
  0x19   : > { %v1883_v28 = vpack.i.bf16 %v2024_v27, %v2020_v25  ;;  %v735_v36 = vsel %vm2028_vm4, %v1733_v31, %v734_v32  ;;  %v1169_v42 = vld [vmem:[#allocation2 + $0x4c] sm:$0x1]  ;;  %v1269_v43 = vshrl.u32 %v1168_v40, 16  ;;  %v1272_v44 = vshll.u32 %v1168_v40, 16  ;;  %v1112_v46 = vld [vmem:[#allocation2 + $0x48] sm:$0xf]  ;;  %vm2063_vm11 = vmand %vm330_vm1, %vm470_vm9 }
  0x1a   : > { %v555_v41 = vrot.slane %v553_v37, 4  ;;  %v558_v45 = vrot.slane %v556_v38, 5  ;;  %v1278_v47 = vshll.u32 %v1169_v42, 16  ;;  %v564_v49 = vrot.slane %v562_v39, 5  ;;  %v466_v23 = vld [vmem:[#allocation2 + $0x8] sm:$0xf] }
  0x1b   : > { %1874 = vrot.lane.b32.xlu0 %v1873_v26, %s1920_s23  ;;  %v1271_v50 = vrot.slane %v1269_v43, 4  ;;  %v1274_v51 = vrot.slane %v1272_v44, 5  ;;  %v472_v24 = vld [vmem:[#allocation2 + $0xc] sm:$0x1]  ;;  %v517_v29 = vld [vmem:[#allocation2] sm:$0xf] }
  0x1c   : > { %1884 = vrot.lane.b32.xlu1 %v1883_v28, %s1920_s23  ;;  %v559_v48 = vor.u32 %v558_v45, %v555_v41  ;;  %v1280_v55 = vrot.slane %v1278_v47, 5  ;;  %v487_v31 = vld [vmem:[#allocation2 + $0x20] sm:$0xf]  ;;  %v490_v32 = vld [vmem:[#allocation2 + $0x24] sm:$0x1]  ;;  %vm1095_vm1 = vcmask 191648   ;;  %s262_s23 = scalar_lea.vmem %s2459_s4, %s1773_s20 }
  0x1d   : > { %v1275_v54 = vor.u32 %v1274_v51, %v1271_v50  ;;  %525 = vst.msk [vmem:[#allocation3] sm:$0xf] %vm328_vm0, %v517_v29  ;;  %v481_v39 = vld [vmem:[#allocation2 + $0x18] sm:$0xf]  ;;  %v484_v40 = vld [vmem:[#allocation2 + $0x1c] sm:$0x1] }
  0x1e   : > { %v560_v53 = vrot.slane %v559_v48, 4  ;;  %v499_v48 = vld [vmem:[#allocation2 + $0x30] sm:$0xf]  ;;  %v514_v29 = vld [vmem:[#allocation2 + $0x44] sm:$0x1] }
  0x1f   : > { %764 = vrot.lane.b32.xlu0 %v735_v36, %s1921_s24  ;;  %v1276_v57 = vrot.slane %v1275_v54, 4 }
  0x20   : > { %1135 = vrot.lane.b32.xlu1 %v1112_v46, %s1922_s25  ;;  %v565_v56 = vsel %vm2038_vm7, %v560_v53, %v564_v49  ;;  %v502_v49 = vld [vmem:[#allocation2 + $0x34] sm:$0x1] }
  0x21   : > { %v1281_v58 = vsel %vm2038_vm7, %v1276_v57, %v1280_v55 }
  0x23   : > { %664 = vrot.lane.b32.xlu0 %v565_v56, %s1923_s26 }
  0x24   : > { %1296 = vrot.lane.b32.xlu1 %v1281_v58, %s1924_s27 }
  0x89   : > { %v1870_v59 = vpop.permute.xlu0 %1869 }
  0x8a   : > { %v1872_v60 = vunpack.i.h.bf16 %v1870_v59  ;;  %v1871_v61 = vunpack.i.l.bf16 %v1870_v59  ;;  %v1880_v62 = vpop.permute.xlu1 %1879 }
  0x8b   : > { %v1882_v63 = vunpack.i.h.bf16 %v1880_v62  ;;  %v1881_v0 = vunpack.i.l.bf16 %v1880_v62 }
  0x8c   : > { %v323_v1 = vmax.f32 %v2006_v8, %v1872_v60  ;;  %v320_v2 = vmax.f32 %v2004_v5, %v1871_v61 }
  0x8d   : > { %v325_v3 = vmax.f32 %v2010_v13, %v1882_v63  ;;  %v322_v4 = vmax.f32 %v2008_v11, %v1881_v0  ;;  %v1875_v6 = vpop.permute.xlu0 %1874 }
  0x8e   : > { %v1777_v7 = vpack.c.bf16 %v323_v1, %v323_v1  ;;  %v1774_v9 = vpack.c.bf16 %v320_v2, %v320_v2  ;;  %v1877_v10 = vunpack.i.h.bf16 %v1875_v6  ;;  %v1876_v12 = vunpack.i.l.bf16 %v1875_v6  ;;  %v1885_v14 = vpop.permute.xlu1 %1884  ;;  %v478_v6 = vld [vmem:[#allocation2 + $0x14] sm:$0x1] }
  0x8f   : > { %v1779_v15 = vpack.c.bf16 %v325_v3, %v325_v3  ;;  %v1776_v16 = vpack.c.bf16 %v322_v4, %v322_v4  ;;  %v1887_v17 = vunpack.i.h.bf16 %v1885_v14  ;;  %v1886_v20 = vunpack.i.l.bf16 %v1885_v14  ;;  %v475_v4 = vld [vmem:[#allocation2 + $0x10] sm:$0xf] }
  0x90   : > { %v407_v21 = vshrl.u32 %v1777_v7, 16  ;;  %v410_v8 = vshll.u32 %v1777_v7, 16  ;;  %v383_v22 = vshrl.u32 %v1774_v9, 16  ;;  %v386_v5 = vshll.u32 %v1774_v9, 16  ;;  %v493_v7 = vld [vmem:[#allocation2 + $0x28] sm:$0xf] }
  0x91   : > { %v423_v26 = vshrl.u32 %v1779_v15, 16  ;;  %v426_v13 = vshll.u32 %v1779_v15, 16  ;;  %v399_v28 = vshrl.u32 %v1776_v16, 16  ;;  %v402_v11 = vshll.u32 %v1776_v16, 16  ;;  %v765_v45 = vpop.permute.xlu0 %764  ;;  %v496_v9 = vld [vmem:[#allocation2 + $0x2c] sm:$0x1] }
  0x92   : > { %v409_v34 = vrot.slane %v407_v21, 7  ;;  %v385_v35 = vrot.slane %v383_v22, 7  ;;  %v321_v36 = vmax.f32 %v2014_v18, %v1877_v10  ;;  %v324_v37 = vmax.f32 %v2016_v19, %v1876_v12  ;;  %v508_v22 = vld [vmem:[#allocation2 + $0x3c] sm:$0x1] }
  0x93   : > { %v425_v41 = vrot.slane %v423_v26, 7  ;;  %v401_v42 = vrot.slane %v399_v28, 7  ;;  %v327_v43 = vmax.f32 %v2024_v27, %v1887_v17  ;;  %v326_v44 = vmax.f32 %v2020_v25, %v1886_v20 }
  0x94   : > { %v412_v18 = vor.u32 %v410_v8, %v409_v34  ;;  %v413_v46 = vrot.slane %v409_v34, 4  ;;  %v388_v19 = vor.u32 %v386_v5, %v385_v35  ;;  %v389_v47 = vrot.slane %v385_v35, 4  ;;  %v505_v8 = vld [vmem:[#allocation2 + $0x38] sm:$0xf]  ;;  %v511_v5 = vld [vmem:[#allocation2 + $0x40] sm:$0xf] }
  0x95   : > { %v428_v50 = vor.u32 %v426_v13, %v425_v41  ;;  %v429_v51 = vrot.slane %v425_v41, 4  ;;  %v404_v53 = vor.u32 %v402_v11, %v401_v42  ;;  %v405_v54 = vrot.slane %v401_v42, 4  ;;  %v665_v1 = vpop.permute.xlu0 %664 }
  0x96   : > { %v488_v55 = vsel %vm2054_vm10, %v412_v18, %v487_v31  ;;  %v491_v56 = vsel %vm2063_vm11, %v413_v46, %v490_v32  ;;  %v467_v25 = vsel %vm2054_vm10, %v388_v19, %v466_v23  ;;  %v473_v27 = vsel %vm2063_vm11, %v389_v47, %v472_v24  ;;  %689 = vst.msk [vmem:[#allocation3] sm:$0xf] %vm688_vm12, %v665_v1 }
  0x97   : > { %489 = vst [vmem:[#allocation2 + $0x20] sm:$0xf] %v488_v55  ;;  %492 = vst [vmem:[#allocation2 + $0x24] sm:$0x1] %v491_v56  ;;  %v500_v57 = vsel %vm2054_vm10, %v428_v50, %v499_v48  ;;  %v503_v58 = vsel %vm2063_vm11, %v429_v51, %v502_v49  ;;  %v482_v59 = vsel %vm2054_vm10, %v404_v53, %v481_v39 }
  0x98   : > { %468 = vst [vmem:[#allocation2 + $0x8] sm:$0xf] %v467_v25  ;;  %474 = vst [vmem:[#allocation2 + $0xc] sm:$0x1] %v473_v27  ;;  %v485_v60 = vsel %vm2063_vm11, %v405_v54, %v484_v40  ;;  %v1775_v61 = vpack.c.bf16 %v321_v36, %v321_v36  ;;  %v1778_v62 = vpack.c.bf16 %v324_v37, %v324_v37 }
  0x99   : > { %501 = vst [vmem:[#allocation2 + $0x30] sm:$0xf] %v500_v57  ;;  %504 = vst [vmem:[#allocation2 + $0x34] sm:$0x1] %v503_v58  ;;  %v1781_v63 = vpack.c.bf16 %v327_v43, %v327_v43  ;;  %v1780_v0 = vpack.c.bf16 %v326_v44, %v326_v44 }
  0x9a   : > { %483 = vst [vmem:[#allocation2 + $0x18] sm:$0xf] %v482_v59  ;;  %486 = vst [vmem:[#allocation2 + $0x1c] sm:$0x1] %v485_v60  ;;  %v391_v2 = vshrl.u32 %v1775_v61, 16  ;;  %v415_v3 = vshrl.u32 %v1778_v62, 16 }
  0x9b   : > { %v439_v10 = vshrl.u32 %v1781_v63, 16  ;;  %v442_v12 = vshll.u32 %v1781_v63, 16  ;;  %v431_v14 = vshrl.u32 %v1780_v0, 16  ;;  %v434_v15 = vshll.u32 %v1780_v0, 16  ;;  %789 = vst.msk [vmem:[#allocation3] sm:$0xf] %vm788_vm13, %v765_v45 }
  0x9c   : > { %v393_v16 = vrot.slane %v391_v2, 7  ;;  %v394_v17 = vshll.u32 %v1775_v61, 16  ;;  %v417_v20 = vrot.slane %v415_v3, 7  ;;  %v418_v21 = vshll.u32 %v1778_v62, 16 }
  0x9d   : > { %v441_v23 = vrot.slane %v439_v10, 7  ;;  %v433_v24 = vrot.slane %v431_v14, 7 }
  0x9e   : > { %v396_v26 = vor.u32 %v394_v17, %v393_v16  ;;  %v397_v13 = vrot.slane %v393_v16, 4  ;;  %v420_v28 = vor.u32 %v418_v21, %v417_v20  ;;  %v421_v11 = vrot.slane %v417_v20, 4  ;;  %v800_v48 = vld [vmem:[#allocation2 + $0x20] sm:$0xf]  ;;  %v706_v55 = vld [vmem:[#allocation2 + $0x24] sm:$0x1] }
  0x9f   : > { %v797_v31 = vld [vmem:[#allocation2 + $0x8] sm:$0xf]  ;;  %v444_v32 = vor.u32 %v442_v12, %v441_v23  ;;  %v445_v34 = vrot.slane %v441_v23, 4  ;;  %v436_v35 = vor.u32 %v434_v15, %v433_v24  ;;  %v437_v36 = vrot.slane %v433_v24, 4  ;;  %v1107_v53 = vld [vmem:[#allocation2 + $0x20] sm:$0xf] }
  0xa0   : > { %813 = vrot.lane.b32.xlu0 %v797_v31, %s1925_s28  ;;  %v476_v37 = vsel %vm2054_vm10, %v396_v26, %v475_v4  ;;  %v479_v39 = vsel %vm2063_vm11, %v397_v13, %v478_v6  ;;  %v494_v40 = vsel %vm2054_vm10, %v420_v28, %v493_v7  ;;  %v497_v41 = vsel %vm2063_vm11, %v421_v11, %v496_v9  ;;  %v802_v19 = vld [vmem:[#allocation2 + $0x30] sm:$0xf]  ;;  %v705_v54 = vld [vmem:[#allocation2 + $0x20] sm:$0xe]  ;;  %v699_v25 = vld [vmem:[#allocation2 + $0x8] sm:$0xe] }
  0xa1   : > { %477 = vst [vmem:[#allocation2 + $0x10] sm:$0xf] %v476_v37  ;;  %480 = vst [vmem:[#allocation2 + $0x14] sm:$0x1] %v479_v39  ;;  %v512_v42 = vsel %vm2054_vm10, %v444_v32, %v511_v5  ;;  %v515_v43 = vsel %vm2063_vm11, %v445_v34, %v514_v29  ;;  %v506_v44 = vsel %vm2054_vm10, %v436_v35, %v505_v8  ;;  %v799_v47 = vld [vmem:[#allocation2 + $0x18] sm:$0xf] }
  0xa2   : > { %495 = vst [vmem:[#allocation2 + $0x28] sm:$0xf] %v494_v40  ;;  %498 = vst [vmem:[#allocation2 + $0x2c] sm:$0x1] %v497_v41  ;;  %v509_v45 = vsel %vm2063_vm11, %v437_v36, %v508_v22  ;;  %v1106_v50 = vld [vmem:[#allocation2 + $0x18] sm:$0xf] }
  0xa3   : > { %513 = vst [vmem:[#allocation2 + $0x40] sm:$0xf] %v512_v42  ;;  %516 = vst [vmem:[#allocation2 + $0x44] sm:$0x1] %v515_v43  ;;  %v1109_v51 = vld [vmem:[#allocation2 + $0x30] sm:$0xf] }
  0xa4   : > { %507 = vst [vmem:[#allocation2 + $0x38] sm:$0xf] %v506_v44  ;;  %510 = vst [vmem:[#allocation2 + $0x3c] sm:$0x1] %v509_v45  ;;  %v700_v27 = vld [vmem:[#allocation2 + $0xc] sm:$0x1] }
  0xa5   : > { %v1737_v57 = vrot.slane %v705_v54, 9  ;;  %v750_v58 = vrot.slane %v706_v55, 5  ;;  %v1734_v59 = vrot.slane %v699_v25, 9  ;;  %v738_v60 = vrot.slane %v700_v27, 5  ;;  %v709_v6 = vld [vmem:[#allocation2 + $0x30] sm:$0xe] }
  0xa6   : > { %v710_v14 = vld [vmem:[#allocation2 + $0x34] sm:$0x1]  ;;  %v703_v15 = vld [vmem:[#allocation2 + $0x18] sm:$0xe]  ;;  %v704_v16 = vld [vmem:[#allocation2 + $0x1c] sm:$0x1] }
  0xa7   : > { %v751_v3 = vsel %vm2028_vm4, %v1737_v57, %v750_v58  ;;  %v739_v4 = vsel %vm2028_vm4, %v1734_v59, %v738_v60  ;;  %v1739_v17 = vrot.slane %v709_v6, 9  ;;  %v758_v20 = vrot.slane %v710_v14, 5  ;;  %v1007_v23 = vld [vmem:[#allocation2 + $0x8] sm:$0xe]  ;;  %v1008_v24 = vld [vmem:[#allocation2 + $0xc] sm:$0x1] }
  0xa8   : > { %v798_v18 = vld [vmem:[#allocation2 + $0x10] sm:$0xf]  ;;  %v702_v0 = vld [vmem:[#allocation2 + $0x14] sm:$0x1]  ;;  %v1736_v22 = vrot.slane %v703_v15, 9  ;;  %v746_v5 = vrot.slane %v704_v16, 5 }
  0xa9   : > { %v801_v46 = vld [vmem:[#allocation2 + $0x28] sm:$0xf]  ;;  %815 = vrot.lane.b32.xlu1 %v798_v18, %s1925_s28  ;;  %v1105_v49 = vld [vmem:[#allocation2 + $0x10] sm:$0xf]  ;;  %v708_v2 = vld [vmem:[#allocation2 + $0x2c] sm:$0x1]  ;;  %v759_v32 = vsel %vm2028_vm4, %v1739_v17, %v758_v20 }
  0xaa   : > { %821 = vrot.lane.b32.xlu0 %v801_v46, %s1925_s28  ;;  %v804_v38 = vld [vmem:[#allocation2 + $0x40] sm:$0xf]  ;;  %v1108_v61 = vld [vmem:[#allocation2 + $0x28] sm:$0xf]  ;;  %v701_v63 = vld [vmem:[#allocation2 + $0x10] sm:$0xe]  ;;  %v747_v34 = vsel %vm2028_vm4, %v1736_v22, %v746_v5 }
  0xab   : > { %v803_v30 = vld [vmem:[#allocation2 + $0x38] sm:$0xf]  ;;  %v1111_v62 = vld [vmem:[#allocation2 + $0x40] sm:$0xf]  ;;  %v707_v1 = vld [vmem:[#allocation2 + $0x28] sm:$0xe] }
  0xac   : > { %v1110_v56 = vld [vmem:[#allocation2 + $0x38] sm:$0xf]  ;;  %v1735_v7 = vrot.slane %v701_v63, 9  ;;  %v742_v9 = vrot.slane %v702_v0, 5  ;;  %v1738_v10 = vrot.slane %v707_v1, 9  ;;  %v754_v12 = vrot.slane %v708_v2, 5 }
  0xad   : > { %823 = vrot.lane.b32.xlu1 %v802_v19, %s1925_s28  ;;  %v711_v26 = vld [vmem:[#allocation2 + $0x38] sm:$0xe]  ;;  %v712_v13 = vld [vmem:[#allocation2 + $0x3c] sm:$0x1]  ;;  %v1741_v28 = vrot.slane %v1007_v23, 9  ;;  %v1041_v11 = vrot.slane %v1008_v24, 5 }
  0xae   : > { %817 = vrot.lane.b32.xlu0 %v799_v47, %s1925_s28  ;;  %v743_v21 = vsel %vm2028_vm4, %v1735_v7, %v742_v9  ;;  %v755_v8 = vsel %vm2028_vm4, %v1738_v10, %v754_v12  ;;  %v1015_v29 = vld [vmem:[#allocation2 + $0x28] sm:$0xe]  ;;  %v1011_v31 = vld [vmem:[#allocation2 + $0x18] sm:$0xe]  ;;  %v1740_v35 = vrot.slane %v711_v26, 9  ;;  %v762_v36 = vrot.slane %v712_v13, 5 }
  0xaf   : > { %v1012_v37 = vld [vmem:[#allocation2 + $0x1c] sm:$0x1]  ;;  %v1016_v39 = vld [vmem:[#allocation2 + $0x2c] sm:$0x1]  ;;  %v1009_v40 = vld [vmem:[#allocation2 + $0x10] sm:$0xe]  ;;  %v1042_v18 = vsel %vm2028_vm4, %v1741_v28, %v1041_v11 }
  0xb0   : > { %v1010_v41 = vld [vmem:[#allocation2 + $0x14] sm:$0x1]  ;;  %v1745_v42 = vrot.slane %v1015_v29, 9  ;;  %v1743_v43 = vrot.slane %v1011_v31, 9  ;;  %v1017_v44 = vld [vmem:[#allocation2 + $0x30] sm:$0xe] }
  0xb1   : > { %819 = vrot.lane.b32.xlu1 %v800_v48, %s1925_s28  ;;  %v1018_v45 = vld [vmem:[#allocation2 + $0x34] sm:$0x1]  ;;  %v1019_v46 = vld [vmem:[#allocation2 + $0x38] sm:$0xe]  ;;  %v1020_v19 = vld [vmem:[#allocation2 + $0x3c] sm:$0x1] }
  0xb2   : > { %825 = vrot.lane.b32.xlu0 %v803_v30, %s1925_s28  ;;  %v1013_v47 = vld [vmem:[#allocation2 + $0x20] sm:$0xe]  ;;  %v763_v30 = vsel %vm2028_vm4, %v1740_v35, %v762_v36  ;;  %v1057_v48 = vrot.slane %v1016_v39, 5  ;;  %v2142_v54 = vld [vmem:[#allocation2 + $0x10] sm:$0xe]  ;;  %v1061_v55 = vrot.slane %v1018_v45, 5 }
  0xb3   : > { %v1065_v25 = vrot.slane %v1020_v19, 5  ;;  %v1744_v27 = vrot.slane %v1013_v47, 9  ;;  %v1316_v57 = vld [vmem:[#allocation2 + $0x14] sm:$0x1]  ;;  %v2144_v58 = vld [vmem:[#allocation2 + $0x40] sm:$0xe] }
  0xb4   : > { %v1022_v59 = vld [vmem:[#allocation2 + $0x44] sm:$0x1]  ;;  %v2146_v60 = vld [vmem:[#allocation2 + $0x30] sm:$0xe]  ;;  %v1749_v0 = vrot.slane %v2142_v54, 9  ;;  %v1349_v7 = vrot.slane %v1316_v57, 5 }
  0xb5   : > { %827 = vrot.lane.b32.xlu1 %v804_v38, %s1925_s28  ;;  %v1742_v38 = vrot.slane %v1009_v40, 9  ;;  %v2153_v1 = vld [vmem:[#allocation2 + $0x34] sm:$0x1]  ;;  %v541_v2 = vld [vmem:[#allocation2 + $0x20] sm:$0xf]  ;;  %v1748_v9 = vrot.slane %v2144_v58, 9 }
  0xb6   : > { %1121 = vrot.lane.b32.xlu0 %v1105_v49, %s1922_s25  ;;  %v1045_v49 = vrot.slane %v1010_v41, 5  ;;  %v542_v6 = vld [vmem:[#allocation2 + $0x24] sm:$0x1]  ;;  %v1069_v10 = vrot.slane %v1022_v59, 5  ;;  %v1753_v12 = vrot.slane %v2146_v60, 9  ;;  %v609_v20 = vshrl.u32 %v541_v2, 16 }
  0xb7   : > { %v2163_v14 = vld [vmem:[#allocation2 + $0x20] sm:$0xe]  ;;  %v2169_v17 = vld [vmem:[#allocation2 + $0x24] sm:$0x1]  ;;  %v1365_v22 = vrot.slane %v2153_v1, 5  ;;  %v618_v24 = vshll.u32 %v542_v6, 16 }
  0xb8   : > { %v535_v26 = vld [vmem:[#allocation2 + $0x8] sm:$0xf]  ;;  %v2180_v11 = vld [vmem:[#allocation2 + $0x38] sm:$0xe]  ;;  %v2182_v29 = vld [vmem:[#allocation2 + $0x3c] sm:$0x1] }
  0xb9   : > { %1123 = vrot.lane.b32.xlu1 %v1106_v50, %s1922_s25  ;;  %v1049_v50 = vrot.slane %v1012_v37, 5  ;;  %v2184_v31 = vld [vmem:[#allocation2 + $0x28] sm:$0xe]  ;;  %v611_v37 = vrot.slane %v609_v20, 4  ;;  %v567_v40 = vshrl.u32 %v535_v26, 16  ;;  %v570_v41 = vshll.u32 %v535_v26, 16 }
  0xba   : > { %1129 = vrot.lane.b32.xlu0 %v1109_v51, %s1922_s25  ;;  %v1746_v51 = vrot.slane %v1017_v44, 9  ;;  %v2190_v44 = vrot.slane %v618_v24, 5  ;;  %v1752_v45 = vrot.slane %v2184_v31, 9  ;;  %v545_v19 = vld [vmem:[#allocation2 + $0x30] sm:$0xf] }
  0xbb   : > { %v1050_v15 = vsel %vm2028_vm4, %v1743_v43, %v1049_v50  ;;  %v1369_v43 = vrot.slane %v2182_v29, 5  ;;  %v543_v47 = vld [vmem:[#allocation2 + $0x28] sm:$0xf]  ;;  %v637_v57 = vshrl.u32 %v545_v19, 16  ;;  %v640_v58 = vshll.u32 %v545_v19, 16 }
  0xbc   : > { %v1062_v16 = vsel %vm2028_vm4, %v1746_v51, %v1061_v55  ;;  %v846_v50 = vld [vmem:[#allocation2 + $0x8] sm:$0xf]  ;;  %v521_v51 = vld [vmem:[#allocation2 + $0x20] sm:$0xf]  ;;  %v569_v55 = vrot.slane %v567_v40, 4  ;;  %v623_v59 = vshrl.u32 %v543_v47, 16 }
  0xbd   : > { %1131 = vrot.lane.b32.xlu1 %v1110_v56, %s1922_s25  ;;  %v1747_v56 = vrot.slane %v1019_v46, 9  ;;  %v538_v46 = vld [vmem:[#allocation2 + $0x14] sm:$0x1]  ;;  %529 = vst.msk [vmem:[#allocation3 + $0x10] sm:$0xf] %vm328_vm0, %v521_v51  ;;  %v626_v60 = vshll.u32 %v543_v47, 16 }
  0xbe   : > { %1125 = vrot.lane.b32.xlu0 %v1107_v53, %s1922_s25  ;;  %v1014_v53 = vld [vmem:[#allocation2 + $0x24] sm:$0x1]  ;;  %v866_v1 = vshll.u32 %v846_v50, 16  ;;  %v524_v20 = vld [vmem:[#allocation2 + $0x38] sm:$0xf] }
  0xbf   : > { %v1053_v63 = vrot.slane %v1014_v53, 5  ;;  %v1066_v13 = vsel %vm2028_vm4, %v1747_v56, %v1065_v25  ;;  %v1070_v53 = vsel %vm2028_vm4, %v1748_v9, %v1069_v10  ;;  %v572_v56 = vrot.slane %v570_v41, 5  ;;  %v546_v25 = vld [vmem:[#allocation2 + $0x34] sm:$0x1]  ;;  %v539_v10 = vld [vmem:[#allocation2 + $0x18] sm:$0xf] }
  0xc0   : > { %v590_v9 = vshll.u32 %v538_v46, 16  ;;  %532 = vst.msk [vmem:[#allocation3 + $0x1c] sm:$0xf] %vm328_vm0, %v524_v20  ;;  %v847_v24 = vld [vmem:[#allocation2 + $0xc] sm:$0x1] }
  0xc1   : > { %1127 = vrot.lane.b32.xlu1 %v1108_v61, %s1922_s25  ;;  %v1058_v61 = vsel %vm2028_vm4, %v1745_v42, %v1057_v48  ;;  %v1054_v28 = vsel %vm2028_vm4, %v1744_v27, %v1053_v63  ;;  %v1754_v42 = vrot.slane %v2180_v11, 9  ;;  %v519_v27 = vld [vmem:[#allocation2 + $0x10] sm:$0xf]  ;;  %v547_v46 = vld [vmem:[#allocation2 + $0x38] sm:$0xf] }
  0xc2   : > { %1133 = vrot.lane.b32.xlu0 %v1111_v62, %s1922_s25  ;;  %v1046_v62 = vsel %vm2028_vm4, %v1742_v38, %v1045_v49  ;;  %v536_v49 = vld [vmem:[#allocation2 + $0xc] sm:$0x1]  ;;  %527 = vst.msk [vmem:[#allocation3 + $0x8] sm:$0xf] %vm328_vm0, %v519_v27  ;;  %v850_v31 = vld [vmem:[#allocation2 + $0x18] sm:$0xf] }
  0xc3   : > { %v540_v47 = vld [vmem:[#allocation2 + $0x1c] sm:$0x1]  ;;  %v651_v51 = vshrl.u32 %v547_v46, 16  ;;  %v848_v27 = vld [vmem:[#allocation2 + $0x10] sm:$0xf] }
  0xc5   : > { %766 = vrot.lane.b32.xlu1 %v739_v4, %s1921_s24  ;;  %v2159_v4 = vld [vmem:[#allocation2 + $0x1c] sm:$0x1] }
  0xc6   : > { %772 = vrot.lane.b32.xlu0 %v751_v3, %s1921_s24  ;;  %v2157_v3 = vld [vmem:[#allocation2 + $0x18] sm:$0xe]  ;;  %v1353_v23 = vrot.slane %v2159_v4, 5 }
  0xc7   : > { %v1750_v5 = vrot.slane %v2157_v3, 9  ;;  %v522_v3 = vld [vmem:[#allocation2 + $0x28] sm:$0xf] }
  0xc8   : > { %530 = vst.msk [vmem:[#allocation3 + $0x14] sm:$0xf] %vm328_vm0, %v522_v3  ;;  %v548_v3 = vld [vmem:[#allocation2 + $0x3c] sm:$0x1] }
  0xc9   : > { %774 = vrot.lane.b32.xlu1 %v755_v8, %s1921_s24  ;;  %v537_v8 = vld [vmem:[#allocation2 + $0x10] sm:$0xf]  ;;  %v1354_v63 = vsel %vm2028_vm4, %v1750_v5, %v1353_v23  ;;  %v625_v5 = vrot.slane %v623_v59, 4  ;;  %v628_v23 = vrot.slane %v626_v60, 5  ;;  %v604_v60 = vshll.u32 %v540_v47, 16 }
  0xca   : > { %768 = vrot.lane.b32.xlu0 %v743_v21, %s1921_s24  ;;  %v612_v21 = vshll.u32 %v541_v2, 16  ;;  %v581_v35 = vshrl.u32 %v537_v8, 16  ;;  %v584_v36 = vshll.u32 %v537_v8, 16  ;;  %v523_v2 = vld [vmem:[#allocation2 + $0x30] sm:$0xf]  ;;  %v642_v8 = vrot.slane %v640_v58, 5 }
  0xcb   : > { %531 = vst.msk [vmem:[#allocation3 + $0x18] sm:$0xf] %vm328_vm0, %v523_v2  ;;  %v606_v20 = vrot.slane %v604_v60, 5 }
  0xcc   : > { %v614_v39 = vrot.slane %v612_v21, 5  ;;  %v583_v48 = vrot.slane %v581_v35, 4  ;;  %v586_v38 = vrot.slane %v584_v36, 5  ;;  %v639_v21 = vrot.slane %v637_v57, 4 }
  0xcd   : > { %770 = vrot.lane.b32.xlu1 %v747_v34, %s1921_s24  ;;  %v1357_v34 = vrot.slane %v2169_v17, 5  ;;  %v646_v17 = vshll.u32 %v546_v25, 16  ;;  %v894_v25 = vshll.u32 %v850_v31, 16 }
  0xce   : > { %776 = vrot.lane.b32.xlu0 %v759_v32, %s1921_s24  ;;  %v1751_v32 = vrot.slane %v2163_v14, 9  ;;  %v615_v54 = vor.u32 %v614_v39, %v611_v37  ;;  %v592_v37 = vrot.slane %v590_v9, 5  ;;  %v854_v39 = vld [vmem:[#allocation2 + $0x28] sm:$0xf]  ;;  %v643_v11 = vor.u32 %v642_v8, %v639_v21  ;;  %v851_v9 = vld [vmem:[#allocation2 + $0x1c] sm:$0x1] }
  0xcf   : > { %v2232_v19 = vrot.slane %v646_v17, 5  ;;  %v856_v8 = vld [vmem:[#allocation2 + $0x30] sm:$0xf] }
  0xd0   : > { %v1358_v4 = vsel %vm2028_vm4, %v1751_v32, %v1357_v34  ;;  %v616_v14 = vrot.slane %v615_v54, 4  ;;  %v598_v32 = vshll.u32 %v539_v10, 16  ;;  %v1370_v34 = vsel %vm2028_vm4, %v1754_v42, %v1369_v43 }
  0xd1   : > { %778 = vrot.lane.b32.xlu1 %v763_v30, %s1921_s24  ;;  %v1350_v30 = vsel %vm2028_vm4, %v1749_v0, %v1349_v7  ;;  %v863_v0 = vshrl.u32 %v846_v50, 16  ;;  %v587_v7 = vor.u32 %v586_v38, %v583_v48  ;;  %v629_v42 = vor.u32 %v628_v23, %v625_v5 }
  0xd2   : > { %1071 = vrot.lane.b32.xlu0 %v1042_v18, %s1926_s29  ;;  %v2195_v18 = vld [vmem:[#allocation2 + $0x2c] sm:$0x1]  ;;  %v621_v40 = vsel %vm2038_vm7, %v616_v14, %v2190_v44  ;;  %v872_v43 = vshll.u32 %v847_v24, 16  ;;  %v600_v48 = vrot.slane %v598_v32, 5  ;;  %v919_v38 = vshrl.u32 %v854_v39, 16 }
  0xd3   : > { %v1361_v6 = vrot.slane %v2195_v18, 5  ;;  %v865_v26 = vrot.slane %v863_v0, 4  ;;  %v588_v36 = vrot.slane %v587_v7, 4  ;;  %v922_v50 = vshll.u32 %v854_v39, 16 }
  0xd4   : > { %v644_v57 = vrot.slane %v643_v11, 4  ;;  %v630_v58 = vrot.slane %v629_v42, 4  ;;  %v2240_v59 = vrot.slane %v872_v43, 5  ;;  %v921_v0 = vrot.slane %v919_v38, 4 }
  0xd5   : > { %1073 = vrot.lane.b32.xlu1 %v1046_v62, %s1926_s29  ;;  %v1366_v62 = vsel %vm2028_vm4, %v1753_v12, %v1365_v22  ;;  %v520_v12 = vld [vmem:[#allocation2 + $0x18] sm:$0xf]  ;;  %v544_v22 = vld [vmem:[#allocation2 + $0x2c] sm:$0x1]  ;;  %v1362_v35 = vsel %vm2028_vm4, %v1752_v45, %v1361_v6  ;;  %v593_v44 = vsel %vm2038_vm7, %v588_v36, %v592_v37  ;;  %v924_v2 = vrot.slane %v922_v50, 5 }
  0xd6   : > { %1079 = vrot.lane.b32.xlu0 %v1058_v61, %s1926_s29  ;;  %v518_v61 = vld [vmem:[#allocation2 + $0x8] sm:$0xf]  ;;  %528 = vst.msk [vmem:[#allocation3 + $0xc] sm:$0xf] %vm328_vm0, %v520_v12  ;;  %v632_v29 = vshll.u32 %v544_v22, 16  ;;  %v877_v7 = vshrl.u32 %v848_v27, 16 }
  0xd7   : > { %526 = vst.msk [vmem:[#allocation3 + $0x4] sm:$0xf] %vm328_vm0, %v518_v61  ;;  %v858_v61 = vld [vmem:[#allocation2 + $0x38] sm:$0xf]  ;;  %v896_v12 = vrot.slane %v894_v25, 5  ;;  %v880_v14 = vshll.u32 %v848_v27, 16 }
  0xd8   : > { %v950_v21 = vshll.u32 %v858_v61, 16  ;;  %v660_v24 = vshll.u32 %v548_v3, 16  ;;  %v900_v32 = vshll.u32 %v851_v9, 16  ;;  %v849_v37 = vld [vmem:[#allocation2 + $0x14] sm:$0x1]  ;;  %vm998_vm0 = vcmask 158848  }
  0xd9   : > { %1081 = vrot.lane.b32.xlu1 %v1062_v16, %s1926_s29  ;;  %v576_v16 = vshll.u32 %v536_v49, 16  ;;  %v855_v49 = vld [vmem:[#allocation2 + $0x2c] sm:$0x1]  ;;  %v882_v39 = vrot.slane %v880_v14, 5  ;;  %v886_v38 = vshll.u32 %v849_v37, 16 }
  0xda   : > { %1075 = vrot.lane.b32.xlu0 %v1050_v15, %s1926_s29  ;;  %v573_v15 = vor.u32 %v572_v56, %v569_v55  ;;  %v634_v55 = vrot.slane %v632_v29, 5  ;;  %v891_v56 = vshrl.u32 %v850_v31, 16  ;;  %v952_v29 = vrot.slane %v950_v21, 5  ;;  %v1158_v9 = vld [vmem:[#allocation2 + $0x20] sm:$0xf] }
  0xdb   : > { %v578_v18 = vrot.slane %v576_v16, 5  ;;  %v649_v16 = vsel %vm2038_vm7, %v644_v57, %v2232_v19  ;;  %v662_v43 = vrot.slane %v660_v24, 5 }
  0xdc   : > { %v574_v41 = vrot.slane %v573_v15, 4  ;;  %v947_v15 = vshrl.u32 %v858_v61, 16  ;;  %v635_v17 = vsel %vm2038_vm7, %v630_v58, %v634_v55  ;;  %v1155_v58 = vld [vmem:[#allocation2 + $0x14] sm:$0x1] }
  0xdd   : > { %1077 = vrot.lane.b32.xlu1 %v1054_v28, %s1926_s29  ;;  %v595_v28 = vshrl.u32 %v539_v10, 16  ;;  %v893_v10 = vrot.slane %v891_v56, 4  ;;  %v857_v56 = vld [vmem:[#allocation2 + $0x34] sm:$0x1] }
  0xde   : > { %1083 = vrot.lane.b32.xlu0 %v1066_v13, %s1926_s29  ;;  %v868_v13 = vrot.slane %v866_v1, 5  ;;  %v579_v54 = vsel %vm2038_vm7, %v574_v41, %v578_v18  ;;  %v928_v1 = vshll.u32 %v855_v49, 16  ;;  %v933_v41 = vshrl.u32 %v856_v8, 16  ;;  %v859_v18 = vld [vmem:[#allocation2 + $0x3c] sm:$0x1] }
  0xdf   : > { %v897_v36 = vor.u32 %v896_v12, %v893_v10 }
  0xe0   : > { %v869_v45 = vor.u32 %v868_v13, %v865_v26  ;;  %v930_v23 = vrot.slane %v928_v1, 5  ;;  %v1154_v26 = vld [vmem:[#allocation2 + $0x10] sm:$0xf]  ;;  %v925_v13 = vor.u32 %v924_v2, %v921_v0  ;;  %v888_v0 = vrot.slane %v886_v38, 5 }
  0xe1   : > { %1085 = vrot.lane.b32.xlu1 %v1070_v53, %s1926_s29  ;;  %v654_v53 = vshll.u32 %v547_v46, 16  ;;  %v936_v46 = vshll.u32 %v856_v8, 16  ;;  %v1171_v11 = vshrl.u32 %v1154_v26, 16  ;;  %v1174_v19 = vshll.u32 %v1154_v26, 16  ;;  %v1163_v8 = vld [vmem:[#allocation2 + $0x34] sm:$0x1] }
  0xe2   : > { %1379 = vrot.lane.b32.xlu0 %v1350_v30, %s1927_s30  ;;  %v597_v30 = vrot.slane %v595_v28, 4  ;;  %v926_v47 = vrot.slane %v925_v13, 4  ;;  %v898_v49 = vrot.slane %v897_v36, 4  ;;  %v1199_v13 = vshrl.u32 %v1158_v9, 16 }
  0xe3   : > { %v656_v6 = vrot.slane %v654_v53, 5  ;;  %v935_v53 = vrot.slane %v933_v41, 4  ;;  %v938_v25 = vrot.slane %v936_v46, 5  ;;  %v1173_v27 = vrot.slane %v1171_v11, 4 }
  0xe4   : > { %v1176_v57 = vrot.slane %v1174_v19, 5  ;;  %v1236_v11 = vshll.u32 %v1163_v8, 16 }
  0xe5   : > { %1381 = vrot.lane.b32.xlu1 %v1354_v63, %s1927_s30  ;;  %v601_v63 = vor.u32 %v600_v48, %v597_v30  ;;  %v902_v48 = vrot.slane %v900_v32, 5  ;;  %v939_v14 = vor.u32 %v938_v25, %v935_v53 }
  0xe6   : > { %1387 = vrot.lane.b32.xlu0 %v1366_v62, %s1927_s30  ;;  %v2244_v62 = vrot.slane %v869_v45, 4 }
  0xe7   : > { %v602_v5 = vrot.slane %v601_v63, 4  ;;  %v931_v63 = vsel %vm2038_vm7, %v926_v47, %v930_v23  ;;  %v903_v10 = vsel %vm2038_vm7, %v898_v49, %v902_v48  ;;  %v861_v23 = vld [vmem:[#allocation2 + $0x44] sm:$0x1] }
  0xe8   : > { %v875_v22 = vsel %vm2038_vm7, %v2244_v62, %v2240_v59  ;;  %v970_v19 = vshll.u32 %v861_v23, 16 }
  0xe9   : > { %1389 = vrot.lane.b32.xlu1 %v1370_v34, %s1927_s30  ;;  %v879_v34 = vrot.slane %v877_v7, 4  ;;  %v607_v42 = vsel %vm2038_vm7, %v602_v5, %v606_v20  ;;  %v942_v7 = vshll.u32 %v857_v56, 16  ;;  %v853_v20 = vld [vmem:[#allocation2 + $0x24] sm:$0x1]  ;;  %v1238_v56 = vrot.slane %v1236_v11, 5 }
  0xea   : > { %1383 = vrot.lane.b32.xlu0 %v1358_v4, %s1927_s30  ;;  %v653_v4 = vrot.slane %v651_v51, 4  ;;  %v956_v51 = vshll.u32 %v859_v18, 16  ;;  %v914_v41 = vshll.u32 %v853_v20, 16  ;;  %v1166_v18 = vld [vmem:[#allocation2 + $0x40] sm:$0xf]  ;;  %v972_v25 = vrot.slane %v970_v19, 5 }
  0xeb   : > { %v883_v50 = vor.u32 %v882_v39, %v879_v34  ;;  %v944_v34 = vrot.slane %v942_v7, 5  ;;  %v940_v39 = vrot.slane %v939_v14, 4  ;;  %v1258_v49 = vshll.u32 %v1166_v18, 16  ;;  %v1328_v11 = vld [vmem:[#allocation2 + $0x44] sm:$0x1] }
  0xec   : > { %v657_v28 = vor.u32 %v656_v6, %v653_v4  ;;  %v958_v6 = vrot.slane %v956_v51, 5  ;;  %v916_v51 = vrot.slane %v914_v41, 5 }
  0xed   : > { %1385 = vrot.lane.b32.xlu1 %v1362_v35, %s1927_s30  ;;  %v852_v35 = vld [vmem:[#allocation2 + $0x20] sm:$0xf]  ;;  %v884_v4 = vrot.slane %v883_v50, 4  ;;  %v945_v50 = vsel %vm2038_vm7, %v940_v39, %v944_v34  ;;  %v2303_v34 = vpop.permute.xlu1 %1135  ;;  %v1161_v39 = vld [vmem:[#allocation2 + $0x2c] sm:$0x1] }
  0xee   : > { %672 = vrot.lane.b32.xlu0 %v621_v40, %s1923_s26  ;;  %v949_v40 = vrot.slane %v947_v15, 4  ;;  %v905_v31 = vshrl.u32 %v852_v35, 16  ;;  %v908_v45 = vshll.u32 %v852_v35, 16  ;;  %v658_v30 = vrot.slane %v657_v28, 4 }
  0xef   : > { %v1180_v15 = vshll.u32 %v1155_v58, 16  ;;  %v1202_v28 = vshll.u32 %v1158_v9, 16  ;;  %v889_v32 = vsel %vm2038_vm7, %v884_v4, %v888_v0  ;;  %v1167_v0 = vld [vmem:[#allocation2 + $0x44] sm:$0x1]  ;;  %v1222_v19 = vshll.u32 %v1161_v39, 16 }
  0xf0   : > { %v953_v55 = vor.u32 %v952_v29, %v949_v40  ;;  %v907_v59 = vrot.slane %v905_v31, 4  ;;  %v910_v60 = vrot.slane %v908_v45, 5  ;;  %v663_v3 = vsel %vm2038_vm7, %v658_v30, %v662_v43  ;;  %v1157_v30 = vld [vmem:[#allocation2 + $0x1c] sm:$0x1] }
  0xf1   : > { %666 = vrot.lane.b32.xlu1 %v579_v54, %s1923_s26  ;;  %v860_v54 = vld [vmem:[#allocation2 + $0x40] sm:$0xf]  ;;  %v1182_v40 = vrot.slane %v1180_v15, 5  ;;  %v1201_v45 = vrot.slane %v1199_v13, 4  ;;  %v1204_v47 = vrot.slane %v1202_v28, 5  ;;  %v1889_v13 = vld [vmem:[%s2456_s1 + $0x8] sm:$0xff]  }
  0xf2   : > { %668 = vrot.lane.b32.xlu0 %v593_v44, %s1923_s26  ;;  %v1162_v44 = vld [vmem:[#allocation2 + $0x30] sm:$0xf]  ;;  %v961_v1 = vshrl.u32 %v860_v54, 16  ;;  %v964_v2 = vshll.u32 %v860_v54, 16  ;;  %v954_v12 = vrot.slane %v953_v55, 4  ;;  %v911_v21 = vor.u32 %v910_v60, %v907_v59 }
  0xf3   : > { %v1227_v61 = vshrl.u32 %v1162_v44, 16  ;;  %v1230_v62 = vshll.u32 %v1162_v44, 16  ;;  %v1255_v44 = vshrl.u32 %v1166_v18, 16  ;;  %v1159_v60 = vld [vmem:[#allocation2 + $0x24] sm:$0x1] }
  0xf4   : > { %v963_v24 = vrot.slane %v961_v1, 4  ;;  %v966_v26 = vrot.slane %v964_v2, 5  ;;  %v959_v37 = vsel %vm2038_vm7, %v954_v12, %v958_v6  ;;  %v912_v46 = vrot.slane %v911_v21, 4  ;;  %v1888_v12 = vld [vmem:[%s2456_s1] sm:$0xff]  }
  0xf5   : > { %674 = vrot.lane.b32.xlu1 %v635_v17, %s1923_s26  ;;  %v1177_v17 = vor.u32 %v1176_v57, %v1173_v27  ;;  %v1232_v5 = vrot.slane %v1230_v62, 5  ;;  %v1160_v27 = vld [vmem:[#allocation2 + $0x28] sm:$0xf]  ;;  %v1205_v62 = vor.u32 %v1204_v47, %v1201_v45  ;;  %v1257_v1 = vrot.slane %v1255_v44, 4  ;;  %1812 = vmatprep.subr.bf16.mxu0 %v1888_v12  ;;  %v1330_v45 = vld [vmem:[#allocation2 + $0x4c] sm:$0x1]  ;;  %v2317_v44 = vpop.permute.xlu1 %1296 }
  0xf6   : > { %676 = vrot.lane.b32.xlu0 %v649_v16, %s1923_s26  ;;  %v1156_v16 = vld [vmem:[#allocation2 + $0x18] sm:$0xf]  ;;  %v967_v31 = vor.u32 %v966_v26, %v963_v24  ;;  %v917_v57 = vsel %vm2038_vm7, %v912_v46, %v916_v51  ;;  %v1260_v2 = vrot.slane %v1258_v49, 5  ;;  %v1213_v7 = vshrl.u32 %v1160_v27, 16  ;;  %1826 = vmatprep.subr.bf16.mxu1 %v1888_v12 }
  0xf7   : > { %v1185_v35 = vshrl.u32 %v1156_v16, 16  ;;  %v1188_v36 = vshll.u32 %v1156_v16, 16  ;;  %v1178_v29 = vrot.slane %v1177_v17, 4  ;;  %v1216_v9 = vshll.u32 %v1160_v27, 16  ;;  %1813 = vmatpush3.bf16.msra.mxu0 %v1888_v12  ;;  %1829 = vmatpush3.bf16.msra.mxu1 %v1888_v12 }
  0xf8   : > { %v968_v59 = vrot.slane %v967_v31, 4  ;;  %v1264_v16 = vshll.u32 %v1167_v0, 16  ;;  %v1206_v20 = vrot.slane %v1205_v62, 4  ;;  %v1215_v23 = vrot.slane %v1213_v7, 4  ;;  %1814 = vmatprep.subr.bf16.mxu0 %v1889_v13  ;;  %1827 = vmatprep.subr.bf16.mxu1 %v1889_v13  ;;  %v1329_v31 = vld [vmem:[#allocation2 + $0x48] sm:$0xe] }
  0xf9   : > { %670 = vrot.lane.b32.xlu1 %v607_v42, %s1923_s26  ;;  %v1164_v42 = vld [vmem:[#allocation2 + $0x38] sm:$0xf]  ;;  %v1187_v48 = vrot.slane %v1185_v35, 4  ;;  %v1190_v38 = vrot.slane %v1188_v36, 5  ;;  %v1183_v55 = vsel %vm2038_vm7, %v1178_v29, %v1182_v40  ;;  %v1218_v24 = vrot.slane %v1216_v9, 5 }
  0xfa   : > { %974 = vrot.lane.b32.xlu0 %v875_v22, %s1928_s5  ;;  %v1229_v22 = vrot.slane %v1227_v61, 4  ;;  %v1241_v53 = vshrl.u32 %v1164_v42, 16  ;;  %v1244_v54 = vshll.u32 %v1164_v42, 16  ;;  %v1194_v61 = vshll.u32 %v1157_v30, 16 }
  0xfb   : > { %v973_v17 = vsel %vm2038_vm7, %v968_v59, %v972_v25  ;;  %v1266_v35 = vrot.slane %v1264_v16, 5  ;;  %v1219_v18 = vor.u32 %v1218_v24, %v1215_v23  ;;  %1815 = vmatpush3.bf16.msra.mxu0 %v1889_v13  ;;  %1830 = vmatpush3.bf16.msra.mxu1 %v1889_v13  ;;  %v1891_v29 = vld [vmem:[%s2456_s1 + $0x10] ss:$0 sps:$4 sm:$0x33]   ;;  %v1224_v49 = vrot.slane %v1222_v19, 5 }
  0xfc   : > { %v1233_v43 = vor.u32 %v1232_v5, %v1229_v22  ;;  %v1243_v4 = vrot.slane %v1241_v53, 4  ;;  %v1246_v6 = vrot.slane %v1244_v54, 5  ;;  %v1196_v15 = vrot.slane %v1194_v61, 5  ;;  %1832 = vmatprep.subr.msk.bf16.mxu0 %vm1473_vm15, %v1891_v29  ;;  %1833 = vmatprep.subr.msk.bf16.mxu1 %vm1473_vm15, %v1891_v29 }
  0xfd   : > { %678 = vrot.lane.b32.xlu1 %v663_v3, %s1923_s26  ;;  %v1165_v3 = vld [vmem:[#allocation2 + $0x3c] sm:$0x1]  ;;  %v1261_v22 = vor.u32 %v1260_v2, %v1257_v1  ;;  %v1475_v42 = vsel %vm1473_vm15, %v1891_v29, 0  ;;  %v1377_v51 = vrot.slane %v1330_v45, 5 }
  0xfe   : > { %982 = vrot.lane.b32.xlu0 %v931_v63, %s1928_s5  ;;  %v1234_v58 = vrot.slane %v1233_v43, 4  ;;  %v1191_v63 = vor.u32 %v1190_v38, %v1187_v48  ;;  %v1250_v8 = vshll.u32 %v1165_v3, 16  ;;  %v1247_v5 = vor.u32 %v1246_v6, %v1243_v4 }
  0xff   : > { %v1262_v40 = vrot.slane %v1261_v22, 4  ;;  %v1373_v48 = vrot.slane %v1328_v11, 5  ;;  %v1220_v38 = vrot.slane %v1219_v18, 4  ;;  %1817 = vmatpush3.bf16.msra.mxu0 %v1475_v42  ;;  %1831 = vmatpush3.bf16.msra.mxu1 %v1475_v42 }
 0x100   : > { %v1239_v14 = vsel %vm2038_vm7, %v1234_v58, %v1238_v56  ;;  %v1192_v21 = vrot.slane %v1191_v63, 4  ;;  %v1252_v36 = vrot.slane %v1250_v8, 5  ;;  %v1248_v41 = vrot.slane %v1247_v5, 4 }
 0x101   : > { %976 = vrot.lane.b32.xlu1 %v889_v32, %s1928_s5  ;;  %v1267_v47 = vsel %vm2038_vm7, %v1262_v40, %v1266_v35  ;;  %v1225_v54 = vsel %vm2038_vm7, %v1220_v38, %v1224_v49 }
 0x102   : > { %978 = vrot.lane.b32.xlu0 %v903_v10, %s1928_s5  ;;  %v1208_v10 = vshll.u32 %v1159_v60, 16  ;;  %v1197_v32 = vsel %vm2038_vm7, %v1192_v21, %v1196_v15  ;;  %v1253_v30 = vsel %vm2038_vm7, %v1248_v41, %v1252_v36 }
 0x104   : > { %v1210_v26 = vrot.slane %v1208_v10, 5 }
 0x105   : > { %984 = vrot.lane.b32.xlu1 %v945_v50, %s1928_s5  ;;  %v1756_v50 = vrot.slane %v1329_v31, 9 }
 0x106   : > { %986 = vrot.lane.b32.xlu0 %v959_v37, %s1928_s5  ;;  %v1211_v28 = vsel %vm2038_vm7, %v1206_v20, %v1210_v26  ;;  %v1327_v37 = vld [vmem:[#allocation2 + $0x40] sm:$0xe] }
 0x107   : > { %v1755_v43 = vrot.slane %v1327_v37, 9 }
 0x109   : > { %980 = vrot.lane.b32.xlu1 %v917_v57, %s1928_s5  ;;  %v1374_v53 = vsel %vm2028_vm4, %v1755_v43, %v1373_v48 }
 0x10a   : > { %1282 = vrot.lane.b32.xlu0 %v1183_v55, %s1924_s27  ;;  %v1378_v55 = vsel %vm2028_vm4, %v1756_v50, %v1377_v51  ;;  %vm1403_vm4 = vcmask 290048  }
 0x10d   : > { %988 = vrot.lane.b32.xlu1 %v973_v17, %s1928_s5 }
 0x10e   : > { %1290 = vrot.lane.b32.xlu0 %v1239_v14, %s1924_s27 }
 0x111   : > { %1284 = vrot.lane.b32.xlu1 %v1197_v32, %s1924_s27 }
 0x112   : > { %1286 = vrot.lane.b32.xlu0 %v1211_v28, %s1924_s27  ;;  %v814_v46 = vpop.permute.xlu0 %813 }
 0x113   : > { %838 = vst.msk [vmem:[#allocation3] sm:$0xf] %vm837_vm14, %v814_v46 }
 0x115   : > { %1292 = vrot.lane.b32.xlu1 %v1253_v30, %s1924_s27 }
 0x116   : > { %1294 = vrot.lane.b32.xlu0 %v1267_v47, %s1924_s27 }
 0x119   : > { %1288 = vrot.lane.b32.xlu1 %v1225_v54, %s1924_s27 }
 0x11a   : > { %1391 = vrot.lane.b32.xlu0 %v1374_v53, %s1927_s30 }
 0x11b   : > { %v816_v56 = vpop.permute.xlu1 %815 }
 0x11c   : > { %v822_v25 = vpop.permute.xlu0 %821 }
 0x11d   : > { %1393 = vrot.lane.b32.xlu1 %v1378_v55, %s1927_s30  ;;  %v1768_v55 = vld [vmem:[%s2457_s2] ss:$0 sm:$0xff] }
 0x11f   : > { %v824_v27 = vpop.permute.xlu1 %823 }
 0x120   : > { %v818_v57 = vpop.permute.xlu0 %817 }
 0x123   : > { %v820_v58 = vpop.permute.xlu1 %819 }
 0x124   : > { %v826_v59 = vpop.permute.xlu0 %825 }
 0x127   : > { %v2328_v60 = vpop.permute.xlu1 %827 }
 0x128   : > { %v1122_v61 = vpop.permute.xlu0 %1121 }
 0x12b   : > { %v2330_v52 = vpop.permute.xlu1 %1123 }
 0x12c   : > { %v2332_v62 = vpop.permute.xlu0 %1129 }
 0x12f   : > { %v2334_v63 = vpop.permute.xlu1 %1131 }
 0x130   : > { %v2336_v0 = vpop.permute.xlu0 %1125 }
 0x133   : > { %v2338_v33 = vpop.permute.xlu1 %1127 }
 0x134   : > { %v2340_v1 = vpop.permute.xlu0 %1133 }
 0x137   : > { %v767_v3 = vpop.permute.xlu1 %766 }
 0x138   : > { %v773_v2 = vpop.permute.xlu0 %772 }
 0x13b   : > { %v775_v6 = vpop.permute.xlu1 %774 }
 0x13c   : > { %v769_v4 = vpop.permute.xlu0 %768 }
 0x13f   : > { %v771_v9 = vpop.permute.xlu1 %770 }
 0x140   : > { %v777_v7 = vpop.permute.xlu0 %776 }
 0x143   : > { %v779_v12 = vpop.permute.xlu1 %778 }
 0x144   : > { %v1072_v10 = vpop.permute.xlu0 %1071 }
 0x147   : > { %v1074_v15 = vpop.permute.xlu1 %1073 }
 0x148   : > { %v1080_v14 = vpop.permute.xlu0 %1079 }
 0x14b   : > { %v1082_v17 = vpop.permute.xlu1 %1081 }
 0x14c   : > { %v1076_v16 = vpop.permute.xlu0 %1075 }
 0x14f   : > { %v2342_v21 = vpop.permute.xlu1 %1077 }
 0x150   : > { %v1084_v20 = vpop.permute.xlu0 %1083 }
 0x153   : > { %v2346_v22 = vpop.permute.xlu1 %1085 }
 0x154   : > { %v2344_v8 = vpop.permute.xlu0 %1379 }
 0x157   : > { %v2350_v23 = vpop.permute.xlu1 %1381 }
 0x158   : > { %v2348_v5 = vpop.permute.xlu0 %1387 }
 0x15b   : > { %v2354_v26 = vpop.permute.xlu1 %1389 }
 0x15c   : > { %v2352_v24 = vpop.permute.xlu0 %1383 }
 0x15f   : > { %v2356_v28 = vpop.permute.xlu1 %1385 }
 0x160   : > { %v673_v13 = vpop.permute.xlu0 %672 }
 0x161   : > { %693 = vst.msk [vmem:[#allocation3 + $0x10] sm:$0xf] %vm688_vm12, %v673_v13 }
 0x162   : > { %793 = vst.msk [vmem:[#allocation3 + $0x10] sm:$0xf] %vm788_vm13, %v773_v2 }
 0x163   : > { %842 = vst.msk [vmem:[#allocation3 + $0x10] sm:$0xf] %vm837_vm14, %v822_v25  ;;  %v667_v35 = vpop.permute.xlu1 %666  ;;  %v1769_v25 = vld [vmem:[%s2458_s3] ss:$0 sm:$0xff] }
 0x164   : > { %v669_v32 = vpop.permute.xlu0 %668  ;;  %690 = vst.msk [vmem:[#allocation3 + $0x4] sm:$0xf] %vm688_vm12, %v667_v35 }
 0x165   : > { %691 = vst.msk [vmem:[#allocation3 + $0x8] sm:$0xf] %vm688_vm12, %v669_v32 }
 0x166   : > { %791 = vst.msk [vmem:[#allocation3 + $0x8] sm:$0xf] %vm788_vm13, %v769_v4  ;;  %790 = vst.msk [vmem:[#allocation3 + $0x4] sm:$0xf] %vm788_vm13, %v767_v3 }
 0x167   : > { %840 = vst.msk [vmem:[#allocation3 + $0x8] sm:$0xf] %vm837_vm14, %v818_v57  ;;  %839 = vst.msk [vmem:[#allocation3 + $0x4] sm:$0xf] %vm837_vm14, %v816_v56  ;;  %v675_v37 = vpop.permute.xlu1 %674 }
 0x168   : > { %v677_v36 = vpop.permute.xlu0 %676  ;;  %694 = vst.msk [vmem:[#allocation3 + $0x14] sm:$0xf] %vm688_vm12, %v675_v37 }
 0x169   : > { %695 = vst.msk [vmem:[#allocation3 + $0x18] sm:$0xf] %vm688_vm12, %v677_v36 }
 0x16a   : > { %795 = vst.msk [vmem:[#allocation3 + $0x18] sm:$0xf] %vm788_vm13, %v777_v7  ;;  %794 = vst.msk [vmem:[#allocation3 + $0x14] sm:$0xf] %vm788_vm13, %v775_v6 }
 0x16b   : > { %844 = vst.msk [vmem:[#allocation3 + $0x18] sm:$0xf] %vm837_vm14, %v826_v59  ;;  %843 = vst.msk [vmem:[#allocation3 + $0x14] sm:$0xf] %vm837_vm14, %v824_v27  ;;  %v671_v40 = vpop.permute.xlu1 %670 }
 0x16c   : > { %v975_v39 = vpop.permute.xlu0 %974  ;;  %692 = vst.msk [vmem:[#allocation3 + $0xc] sm:$0xf] %vm688_vm12, %v671_v40 }
 0x16d   : > { %999 = vst.msk [vmem:[#allocation3] sm:$0xf] %vm998_vm0, %v975_v39 }
 0x16e   : > { %1096 = vst.msk [vmem:[#allocation3] sm:$0xf] %vm1095_vm1, %v1072_v10 }
 0x16f   : > { %792 = vst.msk [vmem:[#allocation3 + $0xc] sm:$0xf] %vm788_vm13, %v771_v9  ;;  %v679_v18 = vpop.permute.xlu1 %678 }
 0x170   : > { %841 = vst.msk [vmem:[#allocation3 + $0xc] sm:$0xf] %vm837_vm14, %v820_v58  ;;  %v983_v41 = vpop.permute.xlu0 %982 }
 0x171   : > { %1146 = vst.msk [vmem:[#allocation3] sm:$0xf] %vm1145_vm2, %v1122_v61 }
 0x172   : > { %1003 = vst.msk [vmem:[#allocation3 + $0x10] sm:$0xf] %vm998_vm0, %v983_v41 }
 0x173   : > { %696 = vst.msk [vmem:[#allocation3 + $0x1c] sm:$0xf] %vm688_vm12, %v679_v18  ;;  %v977_v46 = vpop.permute.xlu1 %976 }
 0x174   : > { %1100 = vst.msk [vmem:[#allocation3 + $0x10] sm:$0xf] %vm1095_vm1, %v1080_v14  ;;  %v979_v29 = vpop.permute.xlu0 %978 }
 0x175   : > { %796 = vst.msk [vmem:[#allocation3 + $0x1c] sm:$0xf] %vm788_vm13, %v779_v12 }
 0x176   : > { %845 = vst.msk [vmem:[#allocation3 + $0x1c] sm:$0xf] %vm837_vm14, %v2328_v60 }
 0x177   : > { %1150 = vst.msk [vmem:[#allocation3 + $0x10] sm:$0xf] %vm1145_vm2, %v2332_v62  ;;  %v985_v19 = vpop.permute.xlu1 %984 }
 0x178   : > { %1001 = vst.msk [vmem:[#allocation3 + $0x8] sm:$0xf] %vm998_vm0, %v979_v29  ;;  %1000 = vst.msk [vmem:[#allocation3 + $0x4] sm:$0xf] %vm998_vm0, %v977_v46  ;;  %v987_v11 = vpop.permute.xlu0 %986 }
 0x179   : > { %1098 = vst.msk [vmem:[#allocation3 + $0x8] sm:$0xf] %vm1095_vm1, %v1076_v16  ;;  %1097 = vst.msk [vmem:[#allocation3 + $0x4] sm:$0xf] %vm1095_vm1, %v1074_v15 }
 0x17a   : > { %1147 = vst.msk [vmem:[#allocation3 + $0x4] sm:$0xf] %vm1145_vm2, %v2330_v52  ;;  %1148 = vst.msk [vmem:[#allocation3 + $0x8] sm:$0xf] %vm1145_vm2, %v2336_v0 }
 0x17b   : > { %1005 = vst.msk [vmem:[#allocation3 + $0x18] sm:$0xf] %vm998_vm0, %v987_v11  ;;  %1004 = vst.msk [vmem:[#allocation3 + $0x14] sm:$0xf] %vm998_vm0, %v985_v19  ;;  %v981_v43 = vpop.permute.xlu1 %980 }
 0x17c   : > { %1102 = vst.msk [vmem:[#allocation3 + $0x18] sm:$0xf] %vm1095_vm1, %v1084_v20  ;;  %1101 = vst.msk [vmem:[#allocation3 + $0x14] sm:$0xf] %vm1095_vm1, %v1082_v17  ;;  %v1283_v42 = vpop.permute.xlu0 %1282 }
 0x17d   : > { %1151 = vst.msk [vmem:[#allocation3 + $0x14] sm:$0xf] %vm1145_vm2, %v2334_v63  ;;  %1152 = vst.msk [vmem:[#allocation3 + $0x18] sm:$0xf] %vm1145_vm2, %v2340_v1 }
 0x17e   : > { %1307 = vst.msk [vmem:[#allocation3] sm:$0xf] %vm1306_vm3, %v1283_v42 }
 0x17f   : > { %1002 = vst.msk [vmem:[#allocation3 + $0xc] sm:$0xf] %vm998_vm0, %v981_v43  ;;  %v989_v45 = vpop.permute.xlu1 %988 }
 0x180   : > { %1404 = vst.msk [vmem:[#allocation3] sm:$0xf] %vm1403_vm4, %v2344_v8  ;;  %v1291_v31 = vpop.permute.xlu0 %1290 }
 0x181   : > { %1099 = vst.msk [vmem:[#allocation3 + $0xc] sm:$0xf] %vm1095_vm1, %v2342_v21 }
 0x182   : > { %1149 = vst.msk [vmem:[#allocation3 + $0xc] sm:$0xf] %vm1145_vm2, %v2338_v33 }
 0x183   : > { %1311 = vst.msk [vmem:[#allocation3 + $0x10] sm:$0xf] %vm1306_vm3, %v1291_v31  ;;  %v1285_v30 = vpop.permute.xlu1 %1284 }
 0x184   : > { %1006 = vst.msk [vmem:[#allocation3 + $0x1c] sm:$0xf] %vm998_vm0, %v989_v45  ;;  %v1287_v47 = vpop.permute.xlu0 %1286 }
 0x185   : > { %1408 = vst.msk [vmem:[#allocation3 + $0x10] sm:$0xf] %vm1403_vm4, %v2348_v5 }
 0x186   : > { %1103 = vst.msk [vmem:[#allocation3 + $0x1c] sm:$0xf] %vm1095_vm1, %v2346_v22 }
 0x187   : > { %1153 = vst.msk [vmem:[#allocation3 + $0x1c] sm:$0xf] %vm1145_vm2, %v2303_v34  ;;  %v1293_v38 = vpop.permute.xlu1 %1292 }
 0x188   : > { %1314 = vst.msk [vmem:[#allocation3 + $0x1c] sm:$0xf] %vm1306_vm3, %v2317_v44  ;;  %1309 = vst.msk [vmem:[#allocation3 + $0x8] sm:$0xf] %vm1306_vm3, %v1287_v47  ;;  %v1295_v48 = vpop.permute.xlu0 %1294 }
 0x189   : > { %1308 = vst.msk [vmem:[#allocation3 + $0x4] sm:$0xf] %vm1306_vm3, %v1285_v30  ;;  %1313 = vst.msk [vmem:[#allocation3 + $0x18] sm:$0xf] %vm1306_vm3, %v1295_v48 }
 0x18a   : > { %1406 = vst.msk [vmem:[#allocation3 + $0x8] sm:$0xf] %vm1403_vm4, %v2352_v24  ;;  %1405 = vst.msk [vmem:[#allocation3 + $0x4] sm:$0xf] %vm1403_vm4, %v2350_v23 }
 0x18b   : > { %1312 = vst.msk [vmem:[#allocation3 + $0x14] sm:$0xf] %vm1306_vm3, %v1293_v38  ;;  %v1289_v44 = vpop.permute.xlu1 %1288 }
 0x18c   : > { %1409 = vst.msk [vmem:[#allocation3 + $0x14] sm:$0xf] %vm1403_vm4, %v2354_v26  ;;  %v1392_v34 = vpop.permute.xlu0 %1391 }
 0x18d   : > { %1410 = vst.msk [vmem:[#allocation3 + $0x18] sm:$0xf] %vm1403_vm4, %v1392_v34 }
 0x18e   : > { %1310 = vst.msk [vmem:[#allocation3 + $0xc] sm:$0xf] %vm1306_vm3, %v1289_v44 }
 0x18f   : > { %1407 = vst.msk [vmem:[#allocation3 + $0xc] sm:$0xf] %vm1403_vm4, %v2356_v28  ;;  %v1394_v50 = vpop.permute.xlu1 %1393 }
 0x190   : > { %1411 = vst.msk [vmem:[#allocation3 + $0x1c] sm:$0xf] %vm1403_vm4, %v1394_v50 }
 0x191   : > { %v1890_v49 = vld [vmem:[#allocation3] sm:$0xff]  }
 0x192   : > { %1818 = vmatprep.mubr.msk.bf16.mxu0 %vm1460_vm5, %v1890_v49 }
 0x193   : > { %v1892_v51 = vld [vmem:[#allocation3 + $0x10] sm:$0xff]  }
 0x194   : > { %1822 = vmatprep.mubr.msk.bf16.mxu1 %vm1460_vm5, %v1892_v51 }
 0x196   : > { %v1893_v53 = vld [vmem:[#allocation3 + $0x8] sm:$0xff]  }
 0x197   : > { %1819 = vmatmul.mubr.msk.bf16.vlgmr.msra.gmra.mrb[0].mxu0 %vm1460_vm5, %v1893_v53  ;;  %v1894_v54 = vld [vmem:[#allocation3 + $0x18] sm:$0xff]  }
 0x198   : > { %1823 = vmatmul.mubr.msk.bf16.vlgmr.msra.gmra.mrb[0].mxu1 %vm1460_vm5, %v1894_v54 }
 0x26a   : > { %v1820_v56 = vpop.f32.mrb[0].mxu0 }
 0x26b   : > { %v1551_v27 = vmul.f32 %v1820_v56, %v1768_v55  ;;  %v1511_v57 = vpop.f32.mrb[1].mxu0  ;;  %v1824_v62 = vpop.f32.mrb[0].mxu1 }
 0x26c   : > { %v1549_v58 = vmul.f32 %v1768_v55, %v1511_v57  ;;  %v1821_v59 = vpop.f32.mrb[2].mxu0  ;;  %v1555_v33 = vmul.f32 %v1824_v62, %v1768_v55  ;;  %v1527_v1 = vpop.f32.mrb[1].mxu1 }
 0x26d   : > { %v1566_v60 = vadd.f32 %v1769_v25, %v1551_v27  ;;  %v1552_v61 = vmul.f32 %v1821_v59, %v1768_v55  ;;  %v1514_v52 = vpop.f32.mrb[3].mxu0  ;;  %v1553_v3 = vmul.f32 %v1768_v55, %v1527_v1  ;;  %v1825_v4 = vpop.f32.mrb[2].mxu1 }
 0x26e   : > { %v1564_v63 = vadd.f32 %v1769_v25, %v1549_v58  ;;  %v1550_v0 = vmul.f32 %v1768_v55, %v1514_v52  ;;  %v1570_v7 = vadd.f32 %v1769_v25, %v1555_v33  ;;  %v1556_v9 = vmul.f32 %v1825_v4, %v1768_v55  ;;  %v1530_v10 = vpop.f32.mrb[3].mxu1 }
 0x26f   : > { %v1567_v2 = vadd.f32 %v1769_v25, %v1552_v61  ;;  %v1574_v12 = vmax.f32 %v1566_v60, 0.0  ;;  %v1568_v15 = vadd.f32 %v1769_v25, %v1553_v3  ;;  %v1554_v16 = vmul.f32 %v1768_v55, %v1530_v10 }
 0x270   : > { %v1565_v6 = vadd.f32 %v1769_v25, %v1550_v0  ;;  %v1572_v17 = vmax.f32 %v1564_v63, 0.0  ;;  %v1571_v21 = vadd.f32 %v1769_v25, %v1556_v9  ;;  %v1578_v23 = vmax.f32 %v1570_v7, 0.0 }
 0x271   : > { %v1575_v14 = vmax.f32 %v1567_v2, 0.0  ;;  %v1569_v22 = vadd.f32 %v1769_v25, %v1554_v16  ;;  %v1576_v26 = vmax.f32 %v1568_v15, 0.0 }
 0x272   : > { %v1573_v20 = vmax.f32 %v1565_v6, 0.0  ;;  %v1579_v24 = vmax.f32 %v1571_v21, 0.0 }
 0x273   : > { %v1790_v8 = vpack.c.bf16 %v1575_v14, %v1574_v12  ;;  %v1577_v13 = vmax.f32 %v1569_v22, 0.0 }
 0x274   : > { %v1785_v5 = vpack.c.bf16 %v1573_v20, %v1572_v17  ;;  %v1800_v28 = vpack.c.bf16 %v1579_v24, %v1578_v23 }
 0x275   : > { %1802 = vst [vmem:[%s262_s23 + $0x8] sm:$0xff] %v1790_v8   ;;  %v1795_v32 = vpack.c.bf16 %v1577_v13, %v1576_v26 }
 0x276   : > { %1786 = vst [vmem:[%s262_s23] sm:$0xff] %v1785_v5   ;;  %1804 = vst [vmem:[%s262_s23 + $0x18] sm:$0xff] %v1800_v28  }
 0x277   : > { %1803 = vst [vmem:[%s262_s23 + $0x10] sm:$0xff] %v1795_v32  }
 0x278 PF: > { %s14_s17 = sadd.s32 1, %s1917_s17   ;;  %s2468_s15 = smov %s1913_s16 }
 0x279   : > { %p11_p5 = scmp.ge.s32.totalorder %s14_s17, 4   ;;  %s2469_s16 = smov %s2471_s18 }
 0x27b   :  { %13 = sbr.rel (!%p11_p5) target bundleno = 2 (0x2), region = 77 }

// kernel: down_conv_forward.3
= control target key start
LH: loop header
LB: loop body
LE: loop exit
PB: predicated region body
PF: predicated region fallthrough
CT: control target
= control target key end

     0   :  { %s3003_s15 = smov 0   ;;  %s3005_s16 = smov 0   ;;  %s3515_s0 = inlined_call_operand.vmem [shape: bf16[2,8,8,128], index: 0, kind: input, shape index: {}]   ;;  %s3516_s1 = inlined_call_operand.vmem [shape: bf16[1152,128], index: 1, kind: input, shape index: {}]   ;;  %s3517_s2 = inlined_call_operand.vmem [shape: f32[1,128], index: 2, kind: input, shape index: {}]   ;;  %s3518_s3 = inlined_call_operand.vmem [shape: f32[1,128], index: 3, kind: input, shape index: {}]   ;;  %s3519_s4 = inlined_call_operand.vmem [shape: f32[2,8,8,128], index: 4, kind: output, shape index: {}]  }
   0x1   :  { %s3007_s17 = smov 0  }
   0x2 LB: > { %s26_s18 = sadd.s32 1, %s2971_s16  ;;  %p2449_p0 = scmp.ge.s32.totalorder %s2975_s17, 1  ;;  %s2975_s17 = sphi %s3007_s17, %s14_s17   ;;  %s2971_s16 = sphi %s3005_s16, %s3529_s16   ;;  %s2967_s15 = sphi %s3003_s15, %s3528_s15  }
   0x3   : > { %p28_p1 = scmp.ge.s32.totalorder %s26_s18, 2  ;;  %p201_p2 = scmp.lt.s32.totalorder %s2975_s17, 3 }
   0x5   : > { %s3531_s18 = smov (%p28_p1, %s26_s18), 0  ;;  %p202_p3 = pnand %p2449_p0, %p201_p2 }
   0x6   : > { %v2829_v0 = vld [vmem:[%s3516_s1 + $0xc0] sm:$0xff] (!%p202_p3)   ;;  %v2831_v2 = vld [vmem:[%s3516_s1 + $0xc8] sm:$0xff] (!%p202_p3)   ;;  %v2977_v3 = vmov (!%p202_p3), 0   ;;  %v2835_v7 = vld [vmem:[%s3516_s1 + $0xd0] sm:$0xff] (!%p202_p3)   ;;  %p240_p4 = scmp.lt.s32.totalorder (!%p202_p3), %s2967_s15, 1  ;;  %vm373_vm0 = vcmask (!%p202_p3), 1043456  }
   0x7   : > { %205 = sbr.rel (%p202_p3) target bundleno = 394 (0x18a), region = 36  ;;  %v2830_v1 = vld [vmem:[%s3516_s1 + $0x80] sm:$0xff] (!%p202_p3)   ;;  %2632 = vmatprep.subr.bf16.mxu1 (!%p202_p3), %v2829_v0  ;;  %272 = vst [vmem:[#allocation2] sm:$0xf] (!%p202_p3), %v2977_v3  ;;  %273 = vst [vmem:[#allocation2 + $0x4] sm:$0x1] (!%p202_p3), %v2977_v3 }
   0x8   : > { %274 = vst [vmem:[#allocation2 + $0x8] sm:$0xf] (!%p202_p3), %v2977_v3  ;;  %275 = vst [vmem:[#allocation2 + $0xc] sm:$0x1] (!%p202_p3), %v2977_v3  ;;  %2633 = vmatpush3.bf16.msra.mxu1 (!%p202_p3), %v2830_v1  ;;  %v2832_v4 = vld [vmem:[%s3516_s1 + $0x40] sm:$0xff] (!%p202_p3)   ;;  %v2833_v5 = vld [vmem:[%s3516_s1 + $0x88] sm:$0xff] (!%p202_p3)  }
   0x9   : > { %276 = vst [vmem:[#allocation2 + $0x10] sm:$0xf] (!%p202_p3), %v2977_v3  ;;  %277 = vst [vmem:[#allocation2 + $0x14] sm:$0x1] (!%p202_p3), %v2977_v3  ;;  %2634 = vmatprep.subr.bf16.mxu1 (!%p202_p3), %v2831_v2  ;;  %2592 = vmatprep.subr.bf16.mxu0 (!%p202_p3), %v2832_v4  ;;  %v2834_v6 = vld [vmem:[%s3516_s1] sm:$0xff] (!%p202_p3)   ;;  %v2836_v8 = vld [vmem:[%s3516_s1 + $0x48] sm:$0xff] (!%p202_p3)  }
   0xa   : > { %278 = vst [vmem:[#allocation2 + $0x18] sm:$0xf] (!%p202_p3), %v2977_v3  ;;  %279 = vst [vmem:[#allocation2 + $0x1c] sm:$0x1] (!%p202_p3), %v2977_v3  ;;  %2593 = vmatpush3.bf16.msra.mxu0 (!%p202_p3), %v2834_v6  ;;  %v2837_v9 = vld [vmem:[%s3516_s1 + $0x90] sm:$0xff] (!%p202_p3)   ;;  %v2838_v10 = vld [vmem:[%s3516_s1 + $0x8] sm:$0xff] (!%p202_p3)  }
   0xb   : > { %280 = vst [vmem:[#allocation2 + $0x20] sm:$0xf] (!%p202_p3), %v2977_v3  ;;  %281 = vst [vmem:[#allocation2 + $0x24] sm:$0x1] (!%p202_p3), %v2977_v3  ;;  %2594 = vmatprep.subr.bf16.mxu0 (!%p202_p3), %v2836_v8  ;;  %v2839_v11 = vld [vmem:[%s3516_s1 + $0xd8] sm:$0xff] (!%p202_p3)   ;;  %v2840_v12 = vld [vmem:[%s3516_s1 + $0x50] sm:$0xff] (!%p202_p3)  }
   0xc   : > { %282 = vst [vmem:[#allocation2 + $0x28] sm:$0xf] (!%p202_p3), %v2977_v3  ;;  %283 = vst [vmem:[#allocation2 + $0x2c] sm:$0x1] (!%p202_p3), %v2977_v3  ;;  %2635 = vmatpush3.bf16.msra.mxu1 (!%p202_p3), %v2833_v5  ;;  %v2841_v13 = vld [vmem:[%s3516_s1 + $0x98] sm:$0xff] (!%p202_p3)   ;;  %v2842_v14 = vld [vmem:[%s3516_s1 + $0x10] sm:$0xff] (!%p202_p3)  }
   0xd   : > { %284 = vst [vmem:[#allocation2 + $0x30] sm:$0xf] (!%p202_p3), %v2977_v3  ;;  %285 = vst [vmem:[#allocation2 + $0x34] sm:$0x1] (!%p202_p3), %v2977_v3  ;;  %2636 = vmatprep.subr.bf16.mxu1 (!%p202_p3), %v2835_v7  ;;  %v2843_v15 = vld [vmem:[%s3516_s1 + $0xe0] sm:$0xff] (!%p202_p3)   ;;  %v2844_v16 = vld [vmem:[%s3516_s1 + $0x58] sm:$0xff] (!%p202_p3)  }
   0xe   : > { %286 = vst [vmem:[#allocation2 + $0x38] sm:$0xf] %v2977_v3  ;;  %287 = vst [vmem:[#allocation2 + $0x3c] sm:$0x1] %v2977_v3  ;;  %2595 = vmatpush3.bf16.msra.mxu0 %v2838_v10  ;;  %v2845_v17 = vld [vmem:[%s3516_s1 + $0xa0] sm:$0xff]   ;;  %v2846_v18 = vld [vmem:[%s3516_s1 + $0x18] sm:$0xff]  }
   0xf   : > { %288 = vst [vmem:[#allocation2 + $0x40] sm:$0xf] %v2977_v3  ;;  %289 = vst [vmem:[#allocation2 + $0x44] sm:$0x1] %v2977_v3  ;;  %2596 = vmatprep.subr.bf16.mxu0 %v2840_v12  ;;  %v2847_v19 = vld [vmem:[%s3516_s1 + $0xe8] sm:$0xff]   ;;  %v2848_v20 = vld [vmem:[%s3516_s1 + $0x60] sm:$0xff]  }
  0x10   : > { %290 = vst [vmem:[#allocation2 + $0x48] sm:$0xf] %v2977_v3  ;;  %291 = vst [vmem:[#allocation2 + $0x4c] sm:$0x1] %v2977_v3  ;;  %2637 = vmatpush3.bf16.msra.mxu1 %v2837_v9  ;;  %v2849_v21 = vld [vmem:[%s3516_s1 + $0xa8] sm:$0xff]   ;;  %s3533_s15 = smov (!%p240_p4, %s2967_s15), 1 }
  0x11   : > { %2638 = vmatprep.subr.bf16.mxu1 %v2839_v11  ;;  %v2850_v22 = vld [vmem:[%s3516_s1 + $0x20] sm:$0xff]   ;;  %v2851_v23 = vld [vmem:[%s3516_s1 + $0xf0] sm:$0xff]   ;;  %v2852_v24 = vld [vmem:[%s3516_s1 + $0x68] sm:$0xff]   ;;  %s2590_s25 = sshll.u32 %s3533_s15, 5  ;;  %vm379_vm1 = vcmask 1040384   ;;  %vm622_vm2 = vcmask 1042432  }
  0x12   : > { %2597 = vmatpush3.bf16.msra.mxu0 %v2842_v14  ;;  %v2853_v25 = vld [vmem:[%s3516_s1 + $0xb0] sm:$0xff]   ;;  %v2854_v26 = vld [vmem:[%s3516_s1 + $0x28] sm:$0xff]   ;;  %v2855_v27 = vld [vmem:[%s3516_s1 + $0xf8] sm:$0xff]   ;;  %s3115_s8 = scalar_lea.vmem %s3515_s0, %s2590_s25  ;;  %vm623_vm3 = vcmask 1046532   ;;  %vm374_vm4 = vsmask.f32 7938 }
  0x13   : > { %2598 = vmatprep.subr.bf16.mxu0 %v2844_v16  ;;  %v2856_v28 = vld [vmem:[%s3516_s1 + $0x70] sm:$0xff]   ;;  %v2857_v29 = vld [vmem:[%s3516_s1 + $0xb8] sm:$0xff]   ;;  %v264_v31 = vld [vmem:[%s3115_s8] sm:$0xf]  ;;  %vm380_vm5 = vsmask.f32 256 }
  0x14   : > { %2639 = vmatpush3.bf16.msra.mxu1 %v2841_v13  ;;  %v2858_v30 = vld [vmem:[%s3516_s1 + $0x30] sm:$0xff]   ;;  %v265_v32 = vld [vmem:[%s3115_s8 + $0x4] sm:$0xf]  ;;  %v293_v33 = vshrl.u32 %v264_v31, 16  ;;  %v296_v34 = vshll.u32 %v264_v31, 16  ;;  %vm3126_vm6 = vmor %vm622_vm2, %vm623_vm3  ;;  %s2591_s19 = sshll.u32 %s3533_s15, 6 }
  0x15   : > { %2640 = vmatprep.subr.bf16.mxu1 %v2843_v15  ;;  %v301_v35 = vshrl.u32 %v265_v32, 16  ;;  %v304_v36 = vshll.u32 %v265_v32, 16  ;;  %v376_v37 = vld [vmem:[#allocation2 + $0x8] sm:$0xf]  ;;  %v382_v38 = vld [vmem:[#allocation2 + $0xc] sm:$0x1]  ;;  %vm3133_vm7 = vmand %vm373_vm0, %vm374_vm4  ;;  %s3494_s22 = scalar_lea.vmem %s3519_s4, %s2591_s19 }
  0x16   : > { %2599 = vmatpush3.bf16.msra.mxu0 %v2846_v18  ;;  %v385_v39 = vld [vmem:[#allocation2 + $0x10] sm:$0xf]  ;;  %v295_v41 = vrot.slane %v293_v33, 7  ;;  %v590_v44 = vld [vmem:[#allocation2] sm:$0xe]  ;;  %vm3138_vm8 = vmand %vm379_vm1, %vm380_vm5 }
  0x17   : > { %2600 = vmatprep.subr.bf16.mxu0 %v2848_v20  ;;  %v3130_v42 = vrot.slane %v301_v35, 7  ;;  %v591_v45 = vld [vmem:[#allocation2 + $0x4] sm:$0x1]  ;;  %v2454_v47 = vrot.slane %v590_v44, 9  ;;  %v2863_v53 = vld [vmem:[%s3516_s1 + $0x78] sm:$0xff]  }
  0x18   : > { %2641 = vmatpush3.bf16.msra.mxu1 %v2845_v17  ;;  %v627_v48 = vrot.slane %v591_v45, 5  ;;  %v298_v49 = vor.u32 %v296_v34, %v295_v41  ;;  %v299_v50 = vrot.slane %v295_v41, 4  ;;  %v2862_v52 = vld [vmem:[%s3516_s1 + $0x1c0] sm:$0xff]   ;;  %v2865_v58 = vld [vmem:[%s3516_s1 + $0x38] sm:$0xff]   ;;  %vm459_vm9 = vsmask.f32 3328 }
  0x19   : > { %2642 = vmatprep.subr.bf16.mxu1 %v2847_v19  ;;  %v306_v51 = vor.u32 %v304_v36, %v3130_v42  ;;  %v427_v59 = vld [vmem:[#allocation2] sm:$0xf]  ;;  %v444_v61 = vld [vmem:[#allocation2 + $0x4] sm:$0x1]  ;;  %vm460_vm10 = vsmask.f32 7440 }
  0x1a   : > { %2601 = vmatpush3.bf16.msra.mxu0 %v2850_v22  ;;  %v628_v54 = vsel %vm3126_vm6, %v2454_v47, %v627_v48  ;;  %v377_v55 = vsel %vm3133_vm7, %v298_v49, %v376_v37  ;;  %v383_v56 = vsel %vm3138_vm8, %v299_v50, %v382_v38  ;;  %v443_v60 = vld [vmem:[#allocation2] sm:$0xf]  ;;  %435 = vst [vmem:[#allocation3] sm:$0xf] %v427_v59  ;;  %v472_v0 = vshll.u32 %v444_v61, 16  ;;  %vm3167_vm11 = vmor %vm459_vm9, %vm460_vm10 }
  0x1b   : > { %2602 = vmatprep.subr.bf16.mxu0 %v2852_v24  ;;  %v386_v57 = vsel %vm3133_vm7, %v306_v51, %v385_v39  ;;  %665 = vst [vmem:[#allocation3 + $0x8] sm:$0xf] %v628_v54  ;;  %378 = vst [vmem:[#allocation2 + $0x8] sm:$0xf] %v377_v55  ;;  %v463_v62 = vshrl.u32 %v443_v60, 16  ;;  %v466_v63 = vshll.u32 %v443_v60, 16 }
  0x1c   : > { %2643 = vmatpush3.bf16.msra.mxu1 %v2849_v21  ;;  %384 = vst [vmem:[#allocation2 + $0xc] sm:$0x1] %v383_v56  ;;  %387 = vst [vmem:[#allocation2 + $0x10] sm:$0xf] %v386_v57  ;;  %v2870_v1 = vld [vmem:[%s3516_s1 + $0x140] sm:$0xff]   ;;  %v307_v4 = vrot.slane %v3130_v42, 4 }
  0x1d   : > { %2644 = vmatprep.subr.bf16.mxu1 %v2851_v23  ;;  %v465_v2 = vrot.slane %v463_v62, 4  ;;  %v468_v3 = vrot.slane %v466_v63, 5  ;;  %v474_v5 = vrot.slane %v472_v0, 5  ;;  %v266_v6 = vld [vmem:[%s3115_s8 + $0x8] sm:$0xf]  ;;  %v2864_v48 = vld [vmem:[%s3516_s1 + $0x180] sm:$0xff]  }
  0x1e   : > { %2603 = vmatpush3.bf16.msra.mxu0 %v2854_v26  ;;  %v309_v19 = vshrl.u32 %v266_v6, 16  ;;  %v267_v24 = vld [vmem:[%s3115_s8 + $0xc] sm:$0xf]  ;;  %v391_v34 = vld [vmem:[#allocation2 + $0x18] sm:$0xf]  ;;  %v2876_v60 = vld [vmem:[%s3516_s1 + $0x1d0] sm:$0xff]  }
  0x1f   : > { %2604 = vmatprep.subr.bf16.mxu0 %v2856_v28  ;;  %v469_v10 = vor.u32 %v468_v3, %v465_v2  ;;  %v317_v28 = vshrl.u32 %v267_v24, 16  ;;  %v320_v33 = vshll.u32 %v267_v24, 16  ;;  %v394_v39 = vld [vmem:[#allocation2 + $0x1c] sm:$0x1]  ;;  %v397_v42 = vld [vmem:[#allocation2 + $0x20] sm:$0xf] }
  0x20   : > { %2645 = vmatpush3.bf16.msra.mxu1 %v2853_v25  ;;  %v311_v26 = vrot.slane %v309_v19, 7  ;;  %v2866_v55 = vld [vmem:[%s3516_s1 + $0x1c8] sm:$0xff]  }
  0x21   : > { %2646 = vmatprep.subr.bf16.mxu1 %v2855_v27  ;;  %v470_v18 = vrot.slane %v469_v10, 4  ;;  %v312_v27 = vshll.u32 %v266_v6, 16  ;;  %v3176_v37 = vrot.slane %v317_v28, 7  ;;  %v2871_v56 = vld [vmem:[%s3516_s1 + $0x188] sm:$0xff]   ;;  %v2872_v6 = vld [vmem:[%s3516_s1 + $0x100] sm:$0xff]   ;;  %v2878_v10 = vld [vmem:[%s3516_s1 + $0x190] sm:$0xff]  }
  0x22   : > { %2605 = vmatpush3.bf16.msra.mxu0 %v2858_v30  ;;  %v592_v7 = vld [vmem:[#allocation2 + $0x8] sm:$0xe]  ;;  %v315_v36 = vrot.slane %v311_v26, 4 }
  0x23   : > { %2606 = vmatprep.subr.bf16.mxu0 %v2863_v53  ;;  %v593_v8 = vld [vmem:[#allocation2 + $0xc] sm:$0x1]  ;;  %v673_v9 = vld [vmem:[#allocation2 + $0x8] sm:$0xf]  ;;  %v2455_v11 = vrot.slane %v592_v7, 9  ;;  %v475_v25 = vsel %vm3167_vm11, %v470_v18, %v474_v5  ;;  %v314_v35 = vor.u32 %v312_v27, %v311_v26  ;;  %v322_v44 = vor.u32 %v320_v33, %v3176_v37  ;;  %v2883_v33 = vld [vmem:[%s3516_s1 + $0x150] sm:$0xff]  }
  0x24   : > { %2647 = vmatpush3.bf16.msra.mxu1 %v2857_v29  ;;  %v631_v12 = vrot.slane %v593_v8, 5  ;;  %v674_v13 = vld [vmem:[#allocation2 + $0x10] sm:$0xf]  ;;  %681 = vst [vmem:[#allocation3 + $0xc] sm:$0xf] %v673_v9  ;;  %v395_v47 = vsel %vm3138_vm8, %v315_v36, %v394_v39  ;;  %v323_v28 = vrot.slane %v3176_v37, 4 }
  0x25   : > { %2712 = vmatprep.subr.bf16.mxu1 %v2862_v52  ;;  %v428_v14 = vld [vmem:[#allocation2 + $0x8] sm:$0xf]  ;;  %682 = vst [vmem:[#allocation3 + $0x30] sm:$0xf] %v674_v13  ;;  %v446_v17 = vld [vmem:[#allocation2 + $0xc] sm:$0x1]  ;;  %v392_v45 = vsel %vm3133_vm7, %v314_v35, %v391_v34  ;;  %v398_v50 = vsel %vm3133_vm7, %v322_v44, %v397_v42 }
  0x26   : > { %2607 = vmatpush3.bf16.msra.mxu0 %v2865_v58  ;;  %436 = vst [vmem:[#allocation3 + $0x24] sm:$0xf] %v428_v14  ;;  %v445_v16 = vld [vmem:[#allocation2 + $0x8] sm:$0xf]  ;;  %v632_v20 = vsel %vm3126_vm6, %v2455_v11, %v631_v12  ;;  %v486_v23 = vshll.u32 %v446_v17, 16  ;;  %v2884_v35 = vld [vmem:[%s3516_s1 + $0x198] sm:$0xff]  }
  0x27   : > { %2672 = vmatprep.subr.bf16.mxu0 %v2870_v1  ;;  %v477_v21 = vshrl.u32 %v445_v16, 16  ;;  %v480_v22 = vshll.u32 %v445_v16, 16  ;;  %666 = vst [vmem:[#allocation3 + $0x2c] sm:$0xf] %v632_v20  ;;  %v388_v29 = vld [vmem:[#allocation2 + $0x14] sm:$0x1] }
  0x28   : > { %v488_v32 = vrot.slane %v486_v23, 5  ;;  %582 = vst [vmem:[#allocation3 + $0x4] sm:$0xf] %v475_v25  ;;  %v389_v38 = vsel %vm3138_vm8, %v307_v4, %v388_v29  ;;  %393 = vst [vmem:[#allocation2 + $0x18] sm:$0xf] %v392_v45  ;;  %v2877_v14 = vld [vmem:[%s3516_s1 + $0x148] sm:$0xff]  }
  0x29   : > { %v479_v30 = vrot.slane %v477_v21, 4  ;;  %v482_v31 = vrot.slane %v480_v22, 5  ;;  %390 = vst [vmem:[#allocation2 + $0x14] sm:$0x1] %v389_v38  ;;  %396 = vst [vmem:[#allocation2 + $0x1c] sm:$0x1] %v395_v47 }
  0x2a   : > { %v594_v51 = vld [vmem:[#allocation2 + $0x10] sm:$0xe]  ;;  %399 = vst [vmem:[#allocation2 + $0x20] sm:$0xf] %v398_v50  ;;  %v2880_v23 = vld [vmem:[%s3516_s1 + $0x1d8] sm:$0xff]   ;;  %v2879_v29 = vld [vmem:[%s3516_s1 + $0x108] sm:$0xff]  }
  0x2b   : > { %v483_v41 = vor.u32 %v482_v31, %v479_v30  ;;  %v2456_v57 = vrot.slane %v594_v51, 9  ;;  %v429_v58 = vld [vmem:[#allocation2 + $0x10] sm:$0xf]  ;;  %v269_v39 = vld [vmem:[%s3115_s8 + $0x14] sm:$0xf]  ;;  %v2890_v50 = vld [vmem:[%s3516_s1 + $0x1e0] sm:$0xff]  }
  0x2c   : > { %v2861_v53 = vld [vmem:[#allocation3 + $0xc] ss:$36 sps:$4 sm:$0xff]   ;;  %437 = vst [vmem:[#allocation3 + $0x48] sm:$0xf] %v429_v58  ;;  %v447_v61 = vld [vmem:[#allocation2 + $0x10] sm:$0xf] }
  0x2d   : > { %v484_v49 = vrot.slane %v483_v41, 4  ;;  %2051 = vmatprep.mubr.bf16.mxu1 %v2861_v53  ;;  %v491_v0 = vshrl.u32 %v447_v61, 16  ;;  %v494_v1 = vshll.u32 %v447_v61, 16  ;;  %v2867_v19 = vld [vmem:[#allocation3] ss:$36 sps:$4 sm:$0xff]   ;;  %v333_v47 = vshrl.u32 %v269_v39, 16 }
  0x2e   : > { %v2859_v52 = vld [vmem:[#allocation3 + $0x8] ss:$36 sps:$4 sm:$0xff]   ;;  %v268_v36 = vld [vmem:[%s3115_s8 + $0x10] sm:$0xf]  ;;  %v400_v44 = vld [vmem:[#allocation2 + $0x24] sm:$0x1] }
  0x2f   : > { %v489_v54 = vsel %vm3167_vm11, %v484_v49, %v488_v32  ;;  %2052 = vmatmul.mubr.bf16.vlgmr.msra.gmra.mrb[0].mxu1 %v2859_v52  ;;  %v596_v3 = vld [vmem:[#allocation2 + $0x18] sm:$0xe]  ;;  %v493_v17 = vrot.slane %v491_v0, 4  ;;  %v496_v18 = vrot.slane %v494_v1, 5  ;;  %v325_v41 = vshrl.u32 %v268_v36, 16  ;;  %v2886_v45 = vld [vmem:[%s3516_s1 + $0x110] sm:$0xff]  }
  0x30   : > { %583 = vst [vmem:[#allocation3 + $0x28] sm:$0xf] %v489_v54  ;;  %v595_v59 = vld [vmem:[#allocation2 + $0x14] sm:$0x1]  ;;  %2713 = vmatpush3.bf16.msra.mxu1 %v2864_v48  ;;  %v597_v4 = vld [vmem:[#allocation2 + $0x1c] sm:$0x1]  ;;  %v401_v49 = vsel %vm3138_vm8, %v323_v28, %v400_v44 }
  0x31   : > { %v448_v62 = vld [vmem:[#allocation2 + $0x14] sm:$0x1]  ;;  %v635_v63 = vrot.slane %v595_v59, 5  ;;  %2714 = vmatprep.subr.bf16.mxu1 %v2866_v55  ;;  %v675_v5 = vld [vmem:[#allocation2 + $0x18] sm:$0xf]  ;;  %v2457_v8 = vrot.slane %v596_v3, 9  ;;  %v497_v24 = vor.u32 %v496_v18, %v493_v17 }
  0x32   : > { %v500_v2 = vshll.u32 %v448_v62, 16  ;;  %v639_v9 = vrot.slane %v597_v4, 5  ;;  %683 = vst [vmem:[#allocation3 + $0x54] sm:$0xf] %v675_v5  ;;  %v430_v11 = vld [vmem:[#allocation2 + $0x18] sm:$0xf] }
  0x33   : > { %v636_v7 = vsel %vm3126_vm6, %v2456_v57, %v635_v63  ;;  %v449_v12 = vld [vmem:[#allocation2 + $0x18] sm:$0xf]  ;;  %v676_v13 = vld [vmem:[#allocation2 + $0x20] sm:$0xf]  ;;  %438 = vst [vmem:[#allocation3 + $0x6c] sm:$0xf] %v430_v11 }
  0x34   : > { %667 = vst [vmem:[#allocation3 + $0x50] sm:$0xf] %v636_v7  ;;  %v450_v16 = vld [vmem:[#allocation2 + $0x1c] sm:$0x1]  ;;  %2715 = vmatpush3.bf16.msra.mxu1 %v2871_v56  ;;  %v640_v21 = vsel %vm3126_vm6, %v2457_v8, %v639_v9  ;;  %684 = vst [vmem:[#allocation3 + $0x78] sm:$0xf] %v676_v13 }
  0x35   : > { %v502_v22 = vrot.slane %v500_v2, 5  ;;  %668 = vst [vmem:[#allocation3 + $0x74] sm:$0xf] %v640_v21  ;;  %2716 = vmatprep.subr.bf16.mxu1 %v2876_v60  ;;  %v505_v25 = vshrl.u32 %v449_v12, 16  ;;  %v508_v26 = vshll.u32 %v449_v12, 16  ;;  %v514_v27 = vshll.u32 %v450_v16, 16 }
  0x36   : > { %v498_v30 = vrot.slane %v497_v24, 4  ;;  %v328_v42 = vshll.u32 %v268_v36, 16  ;;  %v336_v48 = vshll.u32 %v269_v39, 16  ;;  %v327_v52 = vrot.slane %v325_v41, 7  ;;  %402 = vst [vmem:[#allocation2 + $0x24] sm:$0x1] %v401_v49 }
  0x37   : > { %v2869_v20 = vld [vmem:[#allocation3 + $0x4] ss:$36 sps:$4 sm:$0xff]   ;;  %v507_v31 = vrot.slane %v505_v25, 4  ;;  %v510_v32 = vrot.slane %v508_v26, 5  ;;  %v516_v34 = vrot.slane %v514_v27, 5  ;;  %v3239_v57 = vrot.slane %v333_v47, 7 }
  0x38   : > { %1986 = vmatprep.mubr.bf16.mxu0 %v2869_v20  ;;  %2717 = vmatpush3.bf16.msra.mxu1 %v2878_v10  ;;  %v503_v37 = vsel %vm3167_vm11, %v498_v30, %v502_v22  ;;  %v403_v53 = vld [vmem:[#allocation2 + $0x28] sm:$0xf]  ;;  %v406_v54 = vld [vmem:[#allocation2 + $0x2c] sm:$0x1]  ;;  %v330_v59 = vor.u32 %v328_v42, %v327_v52  ;;  %v331_v60 = vrot.slane %v327_v52, 4  ;;  %v2891_v62 = vld [vmem:[%s3516_s1 + $0x158] sm:$0xff]  }
  0x39   : > { %1987 = vmatmul.mubr.bf16.vlgmr.msra.gmra.mrb[0].mxu0 %v2867_v19  ;;  %2718 = vmatprep.subr.bf16.mxu1 %v2880_v23  ;;  %v511_v38 = vor.u32 %v510_v32, %v507_v31  ;;  %584 = vst [vmem:[#allocation3 + $0x4c] sm:$0xf] %v503_v37  ;;  %v409_v61 = vld [vmem:[#allocation2 + $0x30] sm:$0xf]  ;;  %v338_v63 = vor.u32 %v336_v48, %v3239_v57  ;;  %v598_v0 = vld [vmem:[#allocation2 + $0x20] sm:$0xe] }
  0x3a   : > { %2673 = vmatpush3.bf16.msra.mxu0 %v2872_v6  ;;  %v404_v1 = vsel %vm3133_vm7, %v330_v59, %v403_v53  ;;  %v407_v2 = vsel %vm3138_vm8, %v331_v60, %v406_v54  ;;  %v2892_v4 = vld [vmem:[%s3516_s1 + $0x1a0] sm:$0xff]   ;;  %v2458_v5 = vrot.slane %v598_v0, 9  ;;  %v2893_v6 = vld [vmem:[%s3516_s1 + $0x118] sm:$0xff]   ;;  %v339_v7 = vrot.slane %v3239_v57, 4  ;;  %v2894_v9 = vld [vmem:[%s3516_s1 + $0x1e8] sm:$0xff]  }
  0x3b   : > { %2674 = vmatprep.subr.bf16.mxu0 %v2877_v14  ;;  %v512_v51 = vrot.slane %v511_v38, 4  ;;  %v2873_v55 = vld [vmem:[#allocation3 + $0x54] ss:$36 sps:$4 sm:$0xff]   ;;  %405 = vst [vmem:[#allocation2 + $0x28] sm:$0xf] %v404_v1  ;;  %v410_v3 = vsel %vm3133_vm7, %v338_v63, %v409_v61  ;;  %v2904_v44 = vld [vmem:[%s3516_s1 + $0x1f0] sm:$0xff]  }
  0x3c   : > { %v2875_v56 = vld [vmem:[#allocation3 + $0x50] ss:$36 sps:$4 sm:$0xff]   ;;  %2719 = vmatpush3.bf16.msra.mxu1 %v2884_v35  ;;  %2059 = vmatprep.mubr.bf16.mxu1 %v2873_v55  ;;  %408 = vst [vmem:[#allocation2 + $0x2c] sm:$0x1] %v407_v2  ;;  %411 = vst [vmem:[#allocation2 + $0x30] sm:$0xf] %v410_v3 }
  0x3d   : > { %v517_v58 = vsel %vm3167_vm11, %v512_v51, %v516_v34  ;;  %2720 = vmatprep.subr.bf16.mxu1 %v2890_v50  ;;  %2060 = vmatmul.mubr.bf16.gmra.mrb[4].mxu1 %v2875_v56  ;;  %v599_v8 = vld [vmem:[#allocation2 + $0x24] sm:$0x1]  ;;  %v431_v11 = vld [vmem:[#allocation2 + $0x20] sm:$0xf]  ;;  %v2885_v19 = vld [vmem:[#allocation3 + $0x48] ss:$36 sps:$4 sm:$0xff]  }
  0x3e   : > { %2675 = vmatpush3.bf16.msra.mxu0 %v2879_v29  ;;  %585 = vst [vmem:[#allocation3 + $0x70] sm:$0xf] %v517_v58  ;;  %v643_v10 = vrot.slane %v599_v8, 5  ;;  %v451_v12 = vld [vmem:[#allocation2 + $0x20] sm:$0xf]  ;;  %v2898_v35 = vld [vmem:[%s3516_s1 + $0x1a8] sm:$0xff]  }
  0x3f   : > { %2676 = vmatprep.subr.bf16.mxu0 %v2883_v33  ;;  %v2897_v13 = vld [vmem:[%s3516_s1 + $0x160] sm:$0xff]   ;;  %439 = vst [vmem:[#allocation3 + $0x90] sm:$0xf] %v431_v11  ;;  %v519_v16 = vshrl.u32 %v451_v12, 16  ;;  %v522_v17 = vshll.u32 %v451_v12, 16  ;;  %v2906_v2 = vld [vmem:[%s3516_s1 + $0x1b0] sm:$0xff]  }
  0x40   : > { %2721 = vmatpush3.bf16.msra.mxu1 %v2892_v4  ;;  %v452_v14 = vld [vmem:[#allocation2 + $0x24] sm:$0x1]  ;;  %v644_v20 = vsel %vm3126_vm6, %v2458_v5, %v643_v10  ;;  %v270_v49 = vld [vmem:[%s3115_s8 + $0x18] sm:$0xf]  ;;  %v271_v50 = vld [vmem:[%s3115_s8 + $0x1c] sm:$0xf] }
  0x41   : > { %2722 = vmatprep.subr.bf16.mxu1 %v2894_v9  ;;  %v528_v21 = vshll.u32 %v452_v14, 16  ;;  %669 = vst [vmem:[#allocation3 + $0x98] sm:$0xf] %v644_v20  ;;  %v521_v22 = vrot.slane %v519_v16, 4  ;;  %v524_v23 = vrot.slane %v522_v17, 5  ;;  %v2900_v41 = vld [vmem:[%s3516_s1 + $0x120] sm:$0xff]  }
  0x42   : > { %2677 = vmatpush3.bf16.msra.mxu0 %v2886_v45  ;;  %v600_v24 = vld [vmem:[#allocation2 + $0x28] sm:$0xe]  ;;  %v341_v52 = vshrl.u32 %v270_v49, 16  ;;  %v344_v53 = vshll.u32 %v270_v49, 16  ;;  %v349_v54 = vshrl.u32 %v271_v50, 16  ;;  %v352_v58 = vshll.u32 %v271_v50, 16 }
  0x43   : > { %2678 = vmatprep.subr.bf16.mxu0 %v2891_v62  ;;  %v601_v25 = vld [vmem:[#allocation2 + $0x2c] sm:$0x1]  ;;  %v677_v26 = vld [vmem:[#allocation2 + $0x28] sm:$0xf]  ;;  %v2459_v27 = vrot.slane %v600_v24, 9  ;;  %v525_v31 = vor.u32 %v524_v23, %v521_v22  ;;  %v530_v34 = vrot.slane %v528_v21, 5 }
  0x44   : > { %v647_v28 = vrot.slane %v601_v25, 5  ;;  %v678_v29 = vld [vmem:[#allocation2 + $0x30] sm:$0xf]  ;;  %685 = vst [vmem:[#allocation3 + $0x9c] sm:$0xf] %v677_v26  ;;  %2723 = vmatpush3.bf16.msra.mxu1 %v2898_v35  ;;  %v2905_v62 = vld [vmem:[%s3516_s1 + $0x168] sm:$0xff]  }
  0x45   : > { %v2881_v18 = vld [vmem:[#allocation3 + $0x4c] ss:$36 sps:$4 sm:$0xff]   ;;  %v432_v30 = vld [vmem:[#allocation2 + $0x28] sm:$0xf]  ;;  %686 = vst [vmem:[#allocation3 + $0xc0] sm:$0xf] %v678_v29  ;;  %2724 = vmatprep.subr.bf16.mxu1 %v2904_v44 }
  0x46   : > { %2679 = vmatpush3.bf16.msra.mxu0 %v2893_v6  ;;  %1994 = vmatprep.mubr.bf16.mxu0 %v2881_v18  ;;  %440 = vst [vmem:[#allocation3 + $0xb4] sm:$0xf] %v432_v30  ;;  %v453_v32 = vld [vmem:[#allocation2 + $0x28] sm:$0xf]  ;;  %v454_v33 = vld [vmem:[#allocation2 + $0x2c] sm:$0x1]  ;;  %v648_v36 = vsel %vm3126_vm6, %v2459_v27, %v647_v28 }
  0x47   : > { %2680 = vmatprep.subr.bf16.mxu0 %v2897_v13  ;;  %1995 = vmatmul.mubr.bf16.gmra.mrb[4].mxu0 %v2885_v19  ;;  %v526_v37 = vrot.slane %v525_v31, 4  ;;  %v533_v38 = vshrl.u32 %v453_v32, 16  ;;  %v536_v39 = vshll.u32 %v453_v32, 16  ;;  %670 = vst [vmem:[#allocation3 + $0xbc] sm:$0xf] %v648_v36  ;;  %v542_v42 = vshll.u32 %v454_v33, 16 }
  0x48   : > { %v412_v55 = vld [vmem:[#allocation2 + $0x34] sm:$0x1]  ;;  %v415_v60 = vld [vmem:[#allocation2 + $0x38] sm:$0xf]  ;;  %v418_v61 = vld [vmem:[#allocation2 + $0x3c] sm:$0x1]  ;;  %2725 = vmatpush3.bf16.msra.mxu1 %v2906_v2 }
  0x49   : > { %v531_v45 = vsel %vm3167_vm11, %v526_v37, %v530_v34  ;;  %v535_v47 = vrot.slane %v533_v38, 4  ;;  %v538_v48 = vrot.slane %v536_v39, 5  ;;  %v544_v51 = vrot.slane %v542_v42, 5  ;;  %v421_v1 = vld [vmem:[#allocation2 + $0x40] sm:$0xf]  ;;  %v2907_v4 = vld [vmem:[%s3516_s1 + $0x128] sm:$0xff]  }
  0x4a   : > { %2681 = vmatpush3.bf16.msra.mxu0 %v2900_v41  ;;  %586 = vst [vmem:[#allocation3 + $0x94] sm:$0xf] %v531_v45  ;;  %v413_v59 = vsel %vm3138_vm8, %v339_v7, %v412_v55  ;;  %v343_v63 = vrot.slane %v341_v52, 7  ;;  %v3290_v0 = vrot.slane %v349_v54, 7  ;;  %v602_v57 = vld [vmem:[#allocation2 + $0x30] sm:$0xe] }
  0x4b   : > { %v539_v56 = vor.u32 %v538_v48, %v535_v47  ;;  %414 = vst [vmem:[#allocation2 + $0x34] sm:$0x1] %v413_v59  ;;  %2682 = vmatprep.subr.bf16.mxu0 %v2905_v62  ;;  %v2460_v14 = vrot.slane %v602_v57, 9  ;;  %v2908_v16 = vld [vmem:[%s3516_s1 + $0x1f8] sm:$0xff]   ;;  %v433_v18 = vld [vmem:[#allocation2 + $0x30] sm:$0xf] }
  0x4c   : > { %v346_v5 = vor.u32 %v344_v53, %v343_v63  ;;  %v347_v6 = vrot.slane %v343_v63, 4  ;;  %v354_v7 = vor.u32 %v352_v58, %v3290_v0  ;;  %v2887_v8 = vld [vmem:[#allocation3 + $0x9c] ss:$36 sps:$4 sm:$0xff]   ;;  %2726 = vmatprep.subr.bf16.mxu1 %v2908_v16  ;;  %441 = vst [vmem:[#allocation3 + $0xd8] sm:$0xf] %v433_v18  ;;  %v2912_v25 = vld [vmem:[%s3516_s1 + $0x1b8] sm:$0xff]  }
  0x4d   : > { %v540_v3 = vrot.slane %v539_v56, 4  ;;  %2067 = vmatprep.mubr.bf16.mxu1 %v2887_v8  ;;  %v455_v19 = vld [vmem:[#allocation2 + $0x30] sm:$0xf]  ;;  %v2899_v30 = vld [vmem:[#allocation3 + $0x90] ss:$36 sps:$4 sm:$0xff]   ;;  %2727 = vmatpush3.bf16.msra.mxu1 %v2912_v25 }
  0x4e   : > { %v2889_v9 = vld [vmem:[#allocation3 + $0x98] ss:$36 sps:$4 sm:$0xff]   ;;  %2683 = vmatpush3.bf16.msra.mxu0 %v2907_v4  ;;  %v416_v11 = vsel %vm3133_vm7, %v346_v5, %v415_v60  ;;  %v419_v12 = vsel %vm3138_vm8, %v347_v6, %v418_v61  ;;  %v422_v13 = vsel %vm3133_vm7, %v354_v7, %v421_v1  ;;  %v547_v22 = vshrl.u32 %v455_v19, 16  ;;  %v2911_v23 = vld [vmem:[%s3516_s1 + $0x170] sm:$0xff]   ;;  %v915_v54 = vld [vmem:[#allocation2 + $0x18] sm:$0xf] }
  0x4f   : > { %v545_v10 = vsel %vm3167_vm11, %v540_v3, %v544_v51  ;;  %417 = vst [vmem:[#allocation2 + $0x38] sm:$0xf] %v416_v11  ;;  %420 = vst [vmem:[#allocation2 + $0x3c] sm:$0x1] %v419_v12  ;;  %2068 = vmatmul.mubr.bf16.gmra.mrb[8].mxu1 %v2889_v9  ;;  %v550_v43 = vshll.u32 %v455_v19, 16  ;;  %2684 = vmatprep.subr.bf16.mxu0 %v2911_v23  ;;  %v2914_v45 = vld [vmem:[%s3516_s1 + $0x130] sm:$0xff]  }
  0x50   : > { %587 = vst [vmem:[#allocation3 + $0xb8] sm:$0xf] %v545_v10  ;;  %423 = vst [vmem:[#allocation2 + $0x40] sm:$0xf] %v422_v13  ;;  %v549_v27 = vrot.slane %v547_v22, 4  ;;  %v3326_v51 = vld [vmem:[%s3516_s1 + $0x200] sm:$0xff]  }
  0x51   : > { %v552_v28 = vrot.slane %v550_v43, 5  ;;  %v914_v53 = vld [vmem:[#allocation2 + $0x10] sm:$0xf]  ;;  %923 = vst [vmem:[#allocation3 + $0x3c] sm:$0xf] %v915_v54  ;;  %2788 = vmatprep.subr.bf16.mxu1 %v3326_v51  ;;  %v2919_v60 = vld [vmem:[%s3516_s1 + $0x178] sm:$0xff]  }
  0x52   : > { %v603_v17 = vld [vmem:[#allocation2 + $0x34] sm:$0x1]  ;;  %2685 = vmatpush3.bf16.msra.mxu0 %v2914_v45  ;;  %922 = vst [vmem:[#allocation3 + $0x18] sm:$0xf] %v914_v53  ;;  %v930_v59 = vld [vmem:[#allocation2 + $0x10] sm:$0xf] }
  0x53   : > { %v651_v20 = vrot.slane %v603_v17, 5  ;;  %v456_v21 = vld [vmem:[#allocation2 + $0x34] sm:$0x1]  ;;  %v553_v35 = vor.u32 %v552_v28, %v549_v27  ;;  %v932_v62 = vld [vmem:[#allocation2 + $0x18] sm:$0xf]  ;;  %v947_v2 = vshrl.u32 %v930_v59, 16  ;;  %2686 = vmatprep.subr.bf16.mxu0 %v2919_v60 }
  0x54   : > { %v556_v24 = vshll.u32 %v456_v21, 16  ;;  %v931_v61 = vld [vmem:[#allocation2 + $0x14] sm:$0x1]  ;;  %v933_v63 = vld [vmem:[#allocation2 + $0x1c] sm:$0x1]  ;;  %v950_v3 = vshll.u32 %v930_v59, 16 }
  0x55   : > { %v652_v26 = vsel %vm3126_vm6, %v2460_v14, %v651_v20  ;;  %v554_v44 = vrot.slane %v553_v35, 4  ;;  %v956_v57 = vshll.u32 %v931_v61, 16  ;;  %v2920_v4 = vld [vmem:[%s3516_s1 + $0x138] sm:$0xff]   ;;  %v961_v5 = vshrl.u32 %v932_v62, 16  ;;  %v689_v43 = vld [vmem:[#allocation2 + $0x8] sm:$0xf] }
  0x56   : > { %671 = vst [vmem:[#allocation3 + $0xe0] sm:$0xf] %v652_v26  ;;  %v558_v31 = vrot.slane %v556_v24, 5  ;;  %v604_v32 = vld [vmem:[#allocation2 + $0x38] sm:$0xe]  ;;  %v964_v6 = vshll.u32 %v932_v62, 16  ;;  %2687 = vmatpush3.bf16.msra.mxu0 %v2920_v4 }
  0x57   : > { %v2895_v29 = vld [vmem:[#allocation3 + $0x94] ss:$36 sps:$4 sm:$0xff]   ;;  %v605_v33 = vld [vmem:[#allocation2 + $0x3c] sm:$0x1]  ;;  %v679_v34 = vld [vmem:[#allocation2 + $0x38] sm:$0xf]  ;;  %2764 = vmatprep.subr.bf16.mxu0 %v3326_v51 }
  0x58   : > { %2002 = vmatprep.mubr.bf16.mxu0 %v2895_v29  ;;  %v2461_v36 = vrot.slane %v604_v32, 9  ;;  %v655_v37 = vrot.slane %v605_v33, 5  ;;  %v680_v38 = vld [vmem:[#allocation2 + $0x40] sm:$0xf]  ;;  %687 = vst [vmem:[#allocation3 + $0xe4] sm:$0xf] %v679_v34  ;;  %v559_v52 = vsel %vm3167_vm11, %v554_v44, %v558_v31 }
  0x59   : > { %v434_v39 = vld [vmem:[#allocation2 + $0x38] sm:$0xf]  ;;  %2003 = vmatmul.mubr.bf16.gmra.mrb[8].mxu0 %v2899_v30  ;;  %688 = vst [vmem:[#allocation3 + $0x108] sm:$0xf] %v680_v38  ;;  %v458_v42 = vld [vmem:[#allocation2 + $0x3c] sm:$0x1] }
  0x5a   : > { %442 = vst [vmem:[#allocation3 + $0xfc] sm:$0xf] %v434_v39  ;;  %v457_v41 = vld [vmem:[#allocation2 + $0x38] sm:$0xf]  ;;  %v656_v47 = vsel %vm3126_vm6, %v2461_v36, %v655_v37  ;;  %v570_v50 = vshll.u32 %v458_v42, 16  ;;  %v970_v7 = vshll.u32 %v933_v63, 16 }
  0x5b   : > { %v561_v48 = vshrl.u32 %v457_v41, 16  ;;  %v564_v49 = vshll.u32 %v457_v41, 16  ;;  %672 = vst [vmem:[#allocation3 + $0x104] sm:$0xf] %v656_v47  ;;  %588 = vst [vmem:[#allocation3 + $0xdc] sm:$0xf] %v559_v52 }
  0x5c   : > { %v572_v58 = vrot.slane %v570_v50, 5  ;;  %v949_v9 = vrot.slane %v947_v2, 4  ;;  %v952_v10 = vrot.slane %v950_v3, 5  ;;  %v963_v11 = vrot.slane %v961_v5, 4  ;;  %v690_v23 = vld [vmem:[#allocation2 + $0xc] sm:$0x1] }
  0x5d   : > { %v563_v55 = vrot.slane %v561_v48, 4  ;;  %v566_v56 = vrot.slane %v564_v49, 5  ;;  %v966_v12 = vrot.slane %v964_v6, 5  ;;  %v958_v18 = vrot.slane %v956_v57, 5  ;;  %v691_v25 = vld [vmem:[#allocation2 + $0x10] sm:$0xf] }
  0x5e   : > { %v953_v17 = vor.u32 %v952_v10, %v949_v9  ;;  %v972_v20 = vrot.slane %v970_v7, 5  ;;  %v692_v26 = vld [vmem:[#allocation2 + $0x14] sm:$0x1]  ;;  %v706_v27 = vshrl.u32 %v689_v43, 16  ;;  %v709_v28 = vshll.u32 %v689_v43, 16 }
  0x5f   : > { %v567_v1 = vor.u32 %v566_v56, %v563_v55  ;;  %v967_v19 = vor.u32 %v966_v12, %v963_v11  ;;  %v715_v30 = vshll.u32 %v690_v23, 16  ;;  %v720_v31 = vshrl.u32 %v691_v25, 16  ;;  %v833_v33 = vld [vmem:[#allocation2 + $0x8] sm:$0xe]  ;;  %v834_v37 = vld [vmem:[#allocation2 + $0xc] sm:$0x1] }
  0x60   : > { %v2901_v13 = vld [vmem:[#allocation3 + $0xe4] ss:$36 sps:$4 sm:$0xff]   ;;  %v954_v21 = vrot.slane %v953_v17, 4  ;;  %v723_v32 = vshll.u32 %v691_v25, 16  ;;  %v708_v34 = vrot.slane %v706_v27, 4  ;;  %v711_v35 = vrot.slane %v709_v28, 5 }
  0x61   : > { %v568_v8 = vrot.slane %v567_v1, 4  ;;  %2075 = vmatprep.mubr.bf16.mxu1 %v2901_v13  ;;  %v968_v22 = vrot.slane %v967_v19, 4  ;;  %v729_v36 = vshll.u32 %v692_v26, 16  ;;  %v2462_v38 = vrot.slane %v833_v33, 9  ;;  %v835_v42 = vld [vmem:[#allocation2 + $0x10] sm:$0xe] }
  0x62   : > { %v2903_v14 = vld [vmem:[#allocation3 + $0xe0] ss:$36 sps:$4 sm:$0xff]   ;;  %v959_v24 = vsel %vm3167_vm11, %v954_v21, %v958_v18  ;;  %v722_v39 = vrot.slane %v720_v31, 4  ;;  %v725_v41 = vrot.slane %v723_v32, 5  ;;  %v867_v44 = vrot.slane %v834_v37, 5  ;;  %v3355_v11 = vld [vmem:[%s3516_s1 + $0x208] sm:$0xff]  }
  0x63   : > { %v573_v16 = vsel %vm3167_vm11, %v568_v8, %v572_v58  ;;  %2076 = vmatmul.mubr.bf16.gmra.mrb[12].mxu1 %v2903_v14  ;;  %v973_v29 = vsel %vm3167_vm11, %v968_v22, %v972_v20  ;;  %1066 = vst [vmem:[#allocation3 + $0x1c] sm:$0xf] %v959_v24  ;;  %v2913_v47 = vld [vmem:[#allocation3 + $0xd8] ss:$36 sps:$4 sm:$0xff]   ;;  %v712_v48 = vor.u32 %v711_v35, %v708_v34  ;;  %v717_v49 = vrot.slane %v715_v30, 5  ;;  %v3362_v27 = vld [vmem:[%s3516_s1 + $0x210] sm:$0xff]  }
  0x64   : > { %589 = vst [vmem:[#allocation3 + $0x100] sm:$0xf] %v573_v16  ;;  %1067 = vst [vmem:[#allocation3 + $0x40] sm:$0xf] %v973_v29  ;;  %v726_v50 = vor.u32 %v725_v41, %v722_v39  ;;  %v731_v52 = vrot.slane %v729_v36, 5  ;;  %v868_v54 = vsel %vm3126_vm6, %v2462_v38, %v867_v44  ;;  %v2463_v55 = vrot.slane %v835_v42, 9 }
  0x65   : > { %v836_v53 = vld [vmem:[#allocation2 + $0x14] sm:$0x1]  ;;  %v916_v56 = vld [vmem:[#allocation2 + $0x20] sm:$0xf]  ;;  %v713_v58 = vrot.slane %v712_v48, 4  ;;  %v3369_v37 = vld [vmem:[%s3516_s1 + $0x218] sm:$0xff]  }
  0x66   : > { %v871_v59 = vrot.slane %v836_v53, 5  ;;  %905 = vst [vmem:[#allocation3 + $0x14] sm:$0xf] %v868_v54  ;;  %v917_v60 = vld [vmem:[#allocation2 + $0x28] sm:$0xf]  ;;  %v727_v62 = vrot.slane %v726_v50, 4 }
  0x67   : > { %924 = vst [vmem:[#allocation3 + $0x60] sm:$0xf] %v916_v56  ;;  %v934_v61 = vld [vmem:[#allocation2 + $0x20] sm:$0xf]  ;;  %925 = vst [vmem:[#allocation3 + $0x84] sm:$0xf] %v917_v60  ;;  %v718_v3 = vsel %vm3167_vm11, %v713_v58, %v717_v49 }
  0x68   : > { %v935_v63 = vld [vmem:[#allocation2 + $0x24] sm:$0x1]  ;;  %v936_v1 = vld [vmem:[#allocation2 + $0x28] sm:$0xf]  ;;  %v975_v2 = vshrl.u32 %v934_v61, 16  ;;  %v872_v57 = vsel %vm3126_vm6, %v2463_v55, %v871_v59  ;;  %v978_v5 = vshll.u32 %v934_v61, 16  ;;  %v732_v9 = vsel %vm3167_vm11, %v727_v62, %v731_v52 }
  0x69   : > { %v937_v4 = vld [vmem:[#allocation2 + $0x2c] sm:$0x1]  ;;  %v984_v6 = vshll.u32 %v935_v63, 16  ;;  %825 = vst [vmem:[#allocation3 + $0x10] sm:$0xf] %v718_v3  ;;  %v989_v13 = vshrl.u32 %v936_v1, 16 }
  0x6a   : > { %v2915_v7 = vld [vmem:[#allocation3 + $0x18] ss:$36 sps:$4 sm:$0xff]   ;;  %906 = vst [vmem:[#allocation3 + $0x38] sm:$0xf] %v872_v57  ;;  %v977_v10 = vrot.slane %v975_v2, 4  ;;  %v980_v12 = vrot.slane %v978_v5, 5 }
  0x6b   : > { %v2909_v45 = vld [vmem:[#allocation3 + $0xdc] ss:$36 sps:$4 sm:$0xff]   ;;  %826 = vst [vmem:[#allocation3 + $0x34] sm:$0xf] %v732_v9  ;;  %v992_v14 = vshll.u32 %v936_v1, 16  ;;  %v986_v16 = vrot.slane %v984_v6, 5 }
  0x6c   : > { %2010 = vmatprep.mubr.bf16.mxu0 %v2909_v45  ;;  %v2917_v8 = vld [vmem:[#allocation3 + $0x1c] ss:$36 sps:$4 sm:$0xff]   ;;  %v998_v17 = vshll.u32 %v937_v4, 16  ;;  %v981_v18 = vor.u32 %v980_v12, %v977_v10  ;;  %v991_v19 = vrot.slane %v989_v13, 4  ;;  %v693_v21 = vld [vmem:[#allocation2 + $0x18] sm:$0xf] }
  0x6d   : > { %2011 = vmatmul.mubr.bf16.gmra.mrb[12].mxu0 %v2913_v47  ;;  %2181 = vmatprep.mubr.bf16.mxu1 %v2917_v8  ;;  %v994_v20 = vrot.slane %v992_v14, 5  ;;  %v694_v43 = vld [vmem:[#allocation2 + $0x1c] sm:$0x1]  ;;  %v695_v23 = vld [vmem:[#allocation2 + $0x20] sm:$0xf]  ;;  %v734_v24 = vshrl.u32 %v693_v21, 16 }
  0x6e   : > { %2182 = vmatmul.mubr.bf16.vlgmr.msra.gmra.mrb[16].mxu1 %v2915_v7  ;;  %v1000_v22 = vrot.slane %v998_v17, 5  ;;  %v982_v25 = vrot.slane %v981_v18, 4  ;;  %v696_v28 = vld [vmem:[#allocation2 + $0x24] sm:$0x1]  ;;  %v737_v29 = vshll.u32 %v693_v21, 16  ;;  %v743_v30 = vshll.u32 %v694_v43, 16 }
  0x6f   : > { %2796 = vmatpush3.bf16.msra.mxu1 %v3326_v51  ;;  %v995_v26 = vor.u32 %v994_v20, %v991_v19  ;;  %v736_v31 = vrot.slane %v734_v24, 4  ;;  %v748_v32 = vshrl.u32 %v695_v23, 16  ;;  %v751_v33 = vshll.u32 %v695_v23, 16  ;;  %v837_v34 = vld [vmem:[#allocation2 + $0x18] sm:$0xe]  ;;  %v3388_v9 = vld [vmem:[%s3516_s1 + $0x220] sm:$0xff]  }
  0x70   : > { %2789 = vmatprep.subr.bf16.mxu1 %v3355_v11  ;;  %v987_v35 = vsel %vm3167_vm11, %v982_v25, %v986_v16  ;;  %v739_v38 = vrot.slane %v737_v29, 5  ;;  %v757_v39 = vshll.u32 %v696_v28, 16  ;;  %v838_v41 = vld [vmem:[#allocation2 + $0x1c] sm:$0x1]  ;;  %v745_v49 = vrot.slane %v743_v30, 5  ;;  %v3398_v43 = vld [vmem:[%s3516_s1 + $0x228] sm:$0xff]  }
  0x71   : > { %v996_v36 = vrot.slane %v995_v26, 4  ;;  %v2924_v44 = vld [vmem:[#allocation3 + $0x14] ss:$36 sps:$4 sm:$0xff]   ;;  %1068 = vst [vmem:[#allocation3 + $0x64] sm:$0xf] %v987_v35  ;;  %v750_v45 = vrot.slane %v748_v32, 4 }
  0x72   : > { %v2922_v42 = vld [vmem:[#allocation3 + $0x10] ss:$36 sps:$4 sm:$0xff]   ;;  %v740_v48 = vor.u32 %v739_v38, %v736_v31  ;;  %v753_v50 = vrot.slane %v751_v33, 5  ;;  %2116 = vmatprep.mubr.bf16.mxu0 %v2924_v44  ;;  %v2464_v54 = vrot.slane %v837_v34, 9  ;;  %v875_v55 = vrot.slane %v838_v41, 5 }
  0x73   : > { %2797 = vmatpush3.bf16.msra.mxu1 %v3355_v11  ;;  %v1001_v47 = vsel %vm3167_vm11, %v996_v36, %v1000_v22  ;;  %v839_v52 = vld [vmem:[#allocation2 + $0x20] sm:$0xe]  ;;  %v840_v53 = vld [vmem:[#allocation2 + $0x24] sm:$0x1]  ;;  %v918_v59 = vld [vmem:[#allocation2 + $0x30] sm:$0xf] }
  0x74   : > { %2790 = vmatprep.subr.bf16.mxu1 %v3362_v27  ;;  %1069 = vst [vmem:[#allocation3 + $0x88] sm:$0xf] %v1001_v47  ;;  %v2465_v56 = vrot.slane %v839_v52, 9  ;;  %v879_v58 = vrot.slane %v840_v53, 5  ;;  %v741_v60 = vrot.slane %v740_v48, 4  ;;  %v754_v61 = vor.u32 %v753_v50, %v750_v45 }
  0x75   : > { %2117 = vmatmul.mubr.bf16.vlgmr.msra.gmra.mrb[16].mxu0 %v2922_v42  ;;  %v759_v62 = vrot.slane %v757_v39, 5  ;;  %v919_v63 = vld [vmem:[#allocation2 + $0x38] sm:$0xf]  ;;  %926 = vst [vmem:[#allocation3 + $0xa8] sm:$0xf] %v918_v59  ;;  %v876_v2 = vsel %vm3126_vm6, %v2464_v54, %v875_v55  ;;  %v355_v16 = vrot.slane %v3290_v0, 4 }
  0x76   : > { %v938_v1 = vld [vmem:[#allocation2 + $0x30] sm:$0xf]  ;;  %2765 = vmatpush3.bf16.msra.mxu0 %v3326_v51  ;;  %v880_v3 = vsel %vm3126_vm6, %v2465_v56, %v879_v58  ;;  %927 = vst [vmem:[#allocation3 + $0xcc] sm:$0xf] %v919_v63  ;;  %v939_v57 = vld [vmem:[#allocation2 + $0x34] sm:$0x1]  ;;  %v746_v6 = vsel %vm3167_vm11, %v741_v60, %v745_v49 }
  0x77   : > { %2798 = vmatpush3.bf16.msra.mxu1 %v3362_v27  ;;  %v940_v4 = vld [vmem:[#allocation2 + $0x38] sm:$0xf]  ;;  %v941_v5 = vld [vmem:[#allocation2 + $0x3c] sm:$0x1]  ;;  %2766 = vmatprep.subr.bf16.mxu0 %v3355_v11  ;;  %v755_v51 = vrot.slane %v754_v61, 4  ;;  %v1003_v7 = vshrl.u32 %v938_v1, 16 }
  0x78   : > { %2791 = vmatprep.subr.bf16.mxu1 %v3369_v37  ;;  %907 = vst [vmem:[#allocation3 + $0x5c] sm:$0xf] %v876_v2  ;;  %908 = vst [vmem:[#allocation3 + $0x80] sm:$0xf] %v880_v3  ;;  %v1006_v8 = vshll.u32 %v938_v1, 16  ;;  %v1012_v10 = vshll.u32 %v939_v57, 16 }
  0x79   : > { %827 = vst [vmem:[#allocation3 + $0x58] sm:$0xf] %v746_v6  ;;  %v1017_v12 = vshrl.u32 %v940_v4, 16  ;;  %v1020_v13 = vshll.u32 %v940_v4, 16  ;;  %v1026_v14 = vshll.u32 %v941_v5, 16  ;;  %v760_v17 = vsel %vm3167_vm11, %v755_v51, %v759_v62  ;;  %v3413_v55 = vld [vmem:[%s3516_s1 + $0x230] sm:$0xff]  }
  0x7a   : > { %v1005_v18 = vrot.slane %v1003_v7, 4  ;;  %v1008_v19 = vrot.slane %v1006_v8, 5  ;;  %2767 = vmatpush3.bf16.msra.mxu0 %v3355_v11  ;;  %828 = vst [vmem:[#allocation3 + $0x7c] sm:$0xf] %v760_v17  ;;  %v1014_v20 = vrot.slane %v1012_v10, 5  ;;  %v3427_v0 = vld [vmem:[%s3516_s1 + $0x238] sm:$0xff]  }
  0x7b   : > { %2799 = vmatpush3.bf16.msra.mxu1 %v3369_v37  ;;  %v1019_v21 = vrot.slane %v1017_v12, 4  ;;  %v1022_v22 = vrot.slane %v1020_v13, 5  ;;  %v2925_v23 = vld [vmem:[#allocation3 + $0x64] ss:$36 sps:$4 sm:$0xff]   ;;  %2768 = vmatprep.subr.bf16.mxu0 %v3362_v27  ;;  %v1028_v26 = vrot.slane %v1026_v14, 5 }
  0x7c   : > { %v2927_v24 = vld [vmem:[#allocation3 + $0x60] ss:$36 sps:$4 sm:$0xff]   ;;  %v1009_v25 = vor.u32 %v1008_v19, %v1005_v18  ;;  %2792 = vmatprep.subr.bf16.mxu1 %v3388_v9  ;;  %v697_v28 = vld [vmem:[#allocation2 + $0x28] sm:$0xf]  ;;  %v698_v29 = vld [vmem:[#allocation2 + $0x2c] sm:$0x1]  ;;  %2189 = vmatprep.mubr.bf16.mxu1 %v2925_v23 }
  0x7d   : > { %v1023_v11 = vor.u32 %v1022_v22, %v1019_v21  ;;  %v699_v30 = vld [vmem:[#allocation2 + $0x30] sm:$0xf]  ;;  %v700_v32 = vld [vmem:[#allocation2 + $0x34] sm:$0x1]  ;;  %v762_v33 = vshrl.u32 %v697_v28, 16  ;;  %v765_v34 = vshll.u32 %v697_v28, 16  ;;  %2190 = vmatmul.mubr.bf16.gmra.mrb[20].mxu1 %v2927_v24 }
  0x7e   : > { %v1010_v31 = vrot.slane %v1009_v25, 4  ;;  %v771_v35 = vshll.u32 %v698_v29, 16  ;;  %2769 = vmatpush3.bf16.msra.mxu0 %v3362_v27  ;;  %v776_v38 = vshrl.u32 %v699_v30, 16  ;;  %v779_v39 = vshll.u32 %v699_v30, 16  ;;  %v841_v42 = vld [vmem:[#allocation2 + $0x28] sm:$0xe] }
  0x7f   : > { %v1024_v36 = vrot.slane %v1023_v11, 4  ;;  %v785_v41 = vshll.u32 %v700_v32, 16  ;;  %2770 = vmatprep.subr.bf16.mxu0 %v3369_v37  ;;  %2800 = vmatpush3.bf16.msra.mxu1 %v3388_v9  ;;  %v764_v45 = vrot.slane %v762_v33, 4  ;;  %v767_v47 = vrot.slane %v765_v34, 5  ;;  %v842_v49 = vld [vmem:[#allocation2 + $0x2c] sm:$0x1] }
  0x80   : > { %v1015_v44 = vsel %vm3167_vm11, %v1010_v31, %v1014_v20  ;;  %v773_v48 = vrot.slane %v771_v35, 5  ;;  %2793 = vmatprep.subr.bf16.mxu1 %v3398_v43  ;;  %v778_v27 = vrot.slane %v776_v38, 4  ;;  %v781_v52 = vrot.slane %v779_v39, 5  ;;  %v843_v54 = vld [vmem:[#allocation2 + $0x30] sm:$0xe] }
  0x81   : > { %v1029_v50 = vsel %vm3167_vm11, %v1024_v36, %v1028_v26  ;;  %1070 = vst [vmem:[#allocation3 + $0xac] sm:$0xf] %v1015_v44  ;;  %v787_v53 = vrot.slane %v785_v41, 5  ;;  %v2930_v56 = vld [vmem:[#allocation3 + $0x5c] ss:$36 sps:$4 sm:$0xff]   ;;  %v768_v59 = vor.u32 %v767_v47, %v764_v45  ;;  %v2466_v60 = vrot.slane %v841_v42, 9 }
  0x82   : > { %v2932_v58 = vld [vmem:[#allocation3 + $0x58] ss:$36 sps:$4 sm:$0xff]   ;;  %1071 = vst [vmem:[#allocation3 + $0xd0] sm:$0xf] %v1029_v50  ;;  %2771 = vmatpush3.bf16.msra.mxu0 %v3369_v37  ;;  %v782_v61 = vor.u32 %v781_v52, %v778_v27  ;;  %v844_v62 = vld [vmem:[#allocation2 + $0x34] sm:$0x1]  ;;  %2124 = vmatprep.mubr.bf16.mxu0 %v2930_v56 }
  0x83   : > { %v883_v63 = vrot.slane %v842_v49, 5  ;;  %v2467_v1 = vrot.slane %v843_v54, 9  ;;  %v424_v2 = vld [vmem:[#allocation2 + $0x44] sm:$0x1]  ;;  %v769_v3 = vrot.slane %v768_v59, 4  ;;  %v887_v57 = vrot.slane %v844_v62, 5  ;;  %2772 = vmatprep.subr.bf16.mxu0 %v3388_v9  ;;  %2125 = vmatmul.mubr.bf16.gmra.mrb[20].mxu0 %v2932_v58 }
  0x84   : > { %v425_v4 = vsel %vm3138_vm8, %v355_v16, %v424_v2  ;;  %v920_v5 = vld [vmem:[#allocation2 + $0x40] sm:$0xf]  ;;  %v921_v6 = vld [vmem:[#allocation2 + $0x48] sm:$0xf]  ;;  %v783_v51 = vrot.slane %v782_v61, 4  ;;  %2801 = vmatpush3.bf16.msra.mxu1 %v3398_v43 }
  0x85   : > { %v884_v37 = vsel %vm3126_vm6, %v2466_v60, %v883_v63  ;;  %426 = vst [vmem:[#allocation2 + $0x44] sm:$0x1] %v425_v4  ;;  %928 = vst [vmem:[#allocation3 + $0xf0] sm:$0xf] %v920_v5  ;;  %v942_v7 = vld [vmem:[#allocation2 + $0x40] sm:$0xf]  ;;  %v774_v46 = vsel %vm3167_vm11, %v769_v3, %v773_v48  ;;  %v888_v10 = vsel %vm3126_vm6, %v2467_v1, %v887_v57  ;;  %2794 = vmatprep.subr.bf16.mxu1 %v3413_v55 }
  0x86   : > { %929 = vst [vmem:[#allocation3 + $0x114] sm:$0xf] %v921_v6  ;;  %v944_v8 = vld [vmem:[#allocation2 + $0x48] sm:$0xf]  ;;  %909 = vst [vmem:[#allocation3 + $0xa4] sm:$0xf] %v884_v37  ;;  %v788_v16 = vsel %vm3167_vm11, %v783_v51, %v787_v53  ;;  %2773 = vmatpush3.bf16.msra.mxu0 %v3388_v9 }
  0x87   : > { %v945_v12 = vld [vmem:[#allocation2 + $0x4c] sm:$0x1]  ;;  %v1031_v13 = vshrl.u32 %v942_v7, 16  ;;  %v1034_v14 = vshll.u32 %v942_v7, 16  ;;  %829 = vst [vmem:[#allocation3 + $0xa0] sm:$0xf] %v774_v46  ;;  %2774 = vmatprep.subr.bf16.mxu0 %v3398_v43 }
  0x88   : > { %910 = vst [vmem:[#allocation3 + $0xc8] sm:$0xf] %v888_v10  ;;  %v1045_v17 = vshrl.u32 %v944_v8, 16  ;;  %v1048_v18 = vshll.u32 %v944_v8, 16  ;;  %v1054_v19 = vshll.u32 %v945_v12, 16  ;;  %2802 = vmatpush3.bf16.msra.mxu1 %v3413_v55 }
  0x89   : > { %830 = vst [vmem:[#allocation3 + $0xc4] sm:$0xf] %v788_v16  ;;  %v1033_v20 = vrot.slane %v1031_v13, 4  ;;  %v1036_v21 = vrot.slane %v1034_v14, 5  ;;  %v2933_v22 = vld [vmem:[#allocation3 + $0xac] ss:$36 sps:$4 sm:$0xff]   ;;  %2795 = vmatprep.subr.bf16.mxu1 %v3427_v0 }
  0x8a   : > { %v2935_v23 = vld [vmem:[#allocation3 + $0xa8] ss:$36 sps:$4 sm:$0xff]   ;;  %v1047_v24 = vrot.slane %v1045_v17, 4  ;;  %v1050_v26 = vrot.slane %v1048_v18, 5  ;;  %v1056_v11 = vrot.slane %v1054_v19, 5  ;;  %2197 = vmatprep.mubr.bf16.mxu1 %v2933_v22  ;;  %2775 = vmatpush3.bf16.msra.mxu0 %v3398_v43 }
  0x8b   : > { %v1037_v25 = vor.u32 %v1036_v21, %v1033_v20  ;;  %v701_v28 = vld [vmem:[#allocation2 + $0x38] sm:$0xf]  ;;  %v702_v9 = vld [vmem:[#allocation2 + $0x3c] sm:$0x1]  ;;  %v703_v29 = vld [vmem:[#allocation2 + $0x40] sm:$0xf]  ;;  %2198 = vmatmul.mubr.bf16.gmra.mrb[24].mxu1 %v2935_v23  ;;  %2776 = vmatprep.subr.bf16.mxu0 %v3413_v55 }
  0x8c   : > { %v790_v30 = vshrl.u32 %v701_v28, 16  ;;  %v793_v31 = vshll.u32 %v701_v28, 16  ;;  %v943_v32 = vld [vmem:[#allocation2 + $0x44] sm:$0x1]  ;;  %v1051_v34 = vor.u32 %v1050_v26, %v1047_v24  ;;  %v799_v36 = vshll.u32 %v702_v9, 16  ;;  %2803 = vmatpush3.bf16.msra.mxu1 %v3427_v0 }
  0x8d   : > { %v1038_v33 = vrot.slane %v1037_v25, 4  ;;  %v704_v35 = vld [vmem:[#allocation2 + $0x44] sm:$0x1]  ;;  %v1040_v38 = vshll.u32 %v943_v32, 16  ;;  %v804_v42 = vshrl.u32 %v703_v29, 16  ;;  %v807_v47 = vshll.u32 %v703_v29, 16 }
  0x8e   : > { %v792_v39 = vrot.slane %v790_v30, 4  ;;  %v795_v41 = vrot.slane %v793_v31, 5  ;;  %v845_v44 = vld [vmem:[#allocation2 + $0x38] sm:$0xe]  ;;  %v1052_v43 = vrot.slane %v1051_v34, 4  ;;  %v801_v45 = vrot.slane %v799_v36, 5  ;;  %2777 = vmatpush3.bf16.msra.mxu0 %v3413_v55 }
  0x8f   : > { %v813_v48 = vshll.u32 %v704_v35, 16  ;;  %v2938_v49 = vld [vmem:[#allocation3 + $0xa4] ss:$36 sps:$4 sm:$0xff]   ;;  %v1042_v27 = vrot.slane %v1040_v38, 5  ;;  %v806_v54 = vrot.slane %v804_v42, 4  ;;  %v809_v56 = vrot.slane %v807_v47, 5  ;;  %2778 = vmatprep.subr.bf16.mxu0 %v3427_v0 }
  0x90   : > { %v2940_v50 = vld [vmem:[#allocation3 + $0xa0] ss:$36 sps:$4 sm:$0xff]   ;;  %v796_v52 = vor.u32 %v795_v41, %v792_v39  ;;  %v1057_v53 = vsel %vm3167_vm11, %v1052_v43, %v1056_v11  ;;  %v846_v59 = vld [vmem:[#allocation2 + $0x3c] sm:$0x1]  ;;  %2132 = vmatprep.mubr.bf16.mxu0 %v2938_v49  ;;  %v847_v62 = vld [vmem:[#allocation2 + $0x40] sm:$0xe] }
  0x91   : > { %v815_v58 = vrot.slane %v813_v48, 5  ;;  %v1043_v60 = vsel %vm3167_vm11, %v1038_v33, %v1042_v27  ;;  %1073 = vst [vmem:[#allocation3 + $0x118] sm:$0xf] %v1057_v53  ;;  %v848_v63 = vld [vmem:[#allocation2 + $0x44] sm:$0x1]  ;;  %v2468_v1 = vrot.slane %v845_v44, 9  ;;  %2133 = vmatmul.mubr.bf16.gmra.mrb[24].mxu0 %v2940_v50  ;;  %v810_v55 = vor.u32 %v809_v56, %v806_v54 }
  0x92   : > { %v797_v61 = vrot.slane %v796_v52, 4  ;;  %1072 = vst [vmem:[#allocation3 + $0xf4] sm:$0xf] %v1043_v60  ;;  %v891_v2 = vrot.slane %v846_v59, 5  ;;  %v2469_v3 = vrot.slane %v847_v62, 9  ;;  %v895_v57 = vrot.slane %v848_v63, 5  ;;  %2779 = vmatpush3.bf16.msra.mxu0 %v3427_v0 }
  0x93   : > { %v1082_v4 = vld [vmem:[#allocation2 + $0x30] sm:$0xe]  ;;  %v1083_v6 = vld [vmem:[#allocation2 + $0x34] sm:$0x1]  ;;  %v1084_v51 = vld [vmem:[#allocation2 + $0x38] sm:$0xe] }
  0x94   : > { %v802_v5 = vsel %vm3167_vm11, %v797_v61, %v801_v45  ;;  %v1085_v37 = vld [vmem:[#allocation2 + $0x3c] sm:$0x1]  ;;  %v811_v7 = vrot.slane %v810_v55, 4  ;;  %v892_v8 = vsel %vm3126_vm6, %v2468_v1, %v891_v2  ;;  %v896_v46 = vsel %vm3126_vm6, %v2469_v3, %v895_v57  ;;  %v1086_v12 = vld [vmem:[#allocation2 + $0x40] sm:$0xe] }
  0x95   : > { %831 = vst [vmem:[#allocation3 + $0xe8] sm:$0xf] %v802_v5  ;;  %v2474_v10 = vrot.slane %v1082_v4, 9  ;;  %v1087_v13 = vld [vmem:[#allocation2 + $0x44] sm:$0x1]  ;;  %v1124_v14 = vrot.slane %v1083_v6, 5 }
  0x96   : > { %911 = vst [vmem:[#allocation3 + $0xec] sm:$0xf] %v892_v8  ;;  %912 = vst [vmem:[#allocation3 + $0x110] sm:$0xf] %v896_v46  ;;  %v2475_v16 = vrot.slane %v1084_v51, 9  ;;  %v1128_v17 = vrot.slane %v1085_v37, 5  ;;  %v816_v0 = vsel %vm3167_vm11, %v811_v7, %v815_v58 }
  0x97   : > { %v1088_v18 = vld [vmem:[#allocation2 + $0x48] sm:$0xe]  ;;  %v2476_v19 = vrot.slane %v1086_v12, 9  ;;  %v1089_v20 = vld [vmem:[#allocation2 + $0x4c] sm:$0x1]  ;;  %v1132_v21 = vrot.slane %v1087_v13, 5  ;;  %v1125_v24 = vsel %vm3126_vm6, %v2474_v10, %v1124_v14 }
  0x98   : > { %v2477_v22 = vrot.slane %v1088_v18, 9  ;;  %v1074_v23 = vld [vmem:[#allocation2 + $0x10] sm:$0xe]  ;;  %832 = vst [vmem:[#allocation3 + $0x10c] sm:$0xf] %v816_v0  ;;  %v1129_v25 = vsel %vm3126_vm6, %v2475_v16, %v1128_v17  ;;  %v1136_v26 = vrot.slane %v1089_v20, 5 }
  0x99   : > { %v1075_v11 = vld [vmem:[#allocation2 + $0x14] sm:$0x1]  ;;  %v1076_v28 = vld [vmem:[#allocation2 + $0x18] sm:$0xe]  ;;  %v2470_v9 = vrot.slane %v1074_v23, 9  ;;  %v1133_v15 = vsel %vm3126_vm6, %v2476_v19, %v1132_v21 }
  0x9a   : > { %1150 = vst [vmem:[#allocation3 + $0xb0] sm:$0xf] %v1125_v24  ;;  %1151 = vst [vmem:[#allocation3 + $0xd4] sm:$0xf] %v1129_v25  ;;  %v1077_v29 = vld [vmem:[#allocation2 + $0x1c] sm:$0x1]  ;;  %v1137_v34 = vsel %vm3126_vm6, %v2477_v22, %v1136_v26 }
  0x9b   : > { %v1108_v30 = vrot.slane %v1075_v11, 5  ;;  %v2471_v31 = vrot.slane %v1076_v28, 9  ;;  %v2941_v32 = vld [vmem:[#allocation3 + $0xf4] ss:$36 sps:$4 sm:$0xff]   ;;  %1152 = vst [vmem:[#allocation3 + $0xf8] sm:$0xf] %v1133_v15 }
  0x9c   : > { %v2943_v33 = vld [vmem:[#allocation3 + $0xf0] ss:$36 sps:$4 sm:$0xff]   ;;  %v1112_v35 = vrot.slane %v1077_v29, 5  ;;  %1153 = vst [vmem:[#allocation3 + $0x11c] sm:$0xf] %v1137_v34  ;;  %2205 = vmatprep.mubr.bf16.mxu1 %v2941_v32 }
  0x9d   : > { %v1109_v36 = vsel %vm3126_vm6, %v2470_v9, %v1108_v30  ;;  %v1078_v38 = vld [vmem:[#allocation2 + $0x20] sm:$0xe]  ;;  %v1079_v39 = vld [vmem:[#allocation2 + $0x24] sm:$0x1]  ;;  %v1080_v41 = vld [vmem:[#allocation2 + $0x28] sm:$0xe]  ;;  %2206 = vmatmul.mubr.bf16.gmra.mrb[28].mxu1 %v2943_v33 }
  0x9e   : > { %v1113_v42 = vsel %vm3126_vm6, %v2471_v31, %v1112_v35  ;;  %1146 = vst [vmem:[#allocation3 + $0x20] sm:$0xf] %v1109_v36  ;;  %v1081_v44 = vld [vmem:[#allocation2 + $0x2c] sm:$0x1]  ;;  %v2472_v43 = vrot.slane %v1078_v38, 9  ;;  %v1116_v45 = vrot.slane %v1079_v39, 5 }
  0x9f   : > { %v2473_v47 = vrot.slane %v1080_v41, 9  ;;  %1147 = vst [vmem:[#allocation3 + $0x44] sm:$0xf] %v1113_v42  ;;  %v1120_v48 = vrot.slane %v1081_v44, 5  ;;  %v2946_v50 = vld [vmem:[#allocation3 + $0xec] ss:$36 sps:$4 sm:$0xff]  }
  0xa0   : > { %v1117_v49 = vsel %vm3126_vm6, %v2472_v43, %v1116_v45  ;;  %v2948_v27 = vld [vmem:[#allocation3 + $0xe8] ss:$36 sps:$4 sm:$0xff]   ;;  %2140 = vmatprep.mubr.bf16.mxu0 %v2946_v50 }
  0xa1   : > { %v1121_v52 = vsel %vm3126_vm6, %v2473_v47, %v1120_v48  ;;  %1148 = vst [vmem:[#allocation3 + $0x68] sm:$0xf] %v1117_v49  ;;  %v2949_v53 = vld [vmem:[#allocation3 + $0xb0] ss:$36 sps:$4 sm:$0xff]   ;;  %2141 = vmatmul.mubr.bf16.gmra.mrb[28].mxu0 %v2948_v27 }
  0xa2   : > { %1149 = vst [vmem:[#allocation3 + $0x8c] sm:$0xf] %v1121_v52  ;;  %2784 = vmatprep.mubr.bf16.mxu1 %v2949_v53 }
  0xa3   : > { %v2950_v54 = vld [vmem:[#allocation3 + $0xf8] ss:$36 sps:$4 sm:$0xff]  }
  0xa5   : > { %2785 = vmatmul.mubr.bf16.vlgmr.msra.gmra.mrb[32].mxu1 %v2950_v54 }
  0xa6   : > { %v2951_v56 = vld [vmem:[#allocation3 + $0x20] ss:$36 sps:$4 sm:$0xff]  }
  0xa7   : > { %2780 = vmatprep.mubr.bf16.mxu0 %v2951_v56 }
  0xa9   : > { %v2952_v58 = vld [vmem:[#allocation3 + $0x68] ss:$36 sps:$4 sm:$0xff]  }
  0xaa   : > { %2781 = vmatmul.mubr.bf16.vlgmr.msra.gmra.mrb[32].mxu0 %v2952_v58 }
 0x102   : > { %v2648_v59 = vpop.f32.mrb[0].mxu1 }
 0x103   : > { %v2649_v60 = vpop.f32.mrb[1].mxu1 }
 0x104   : > { %v2650_v61 = vadd.f32 %v2649_v60, %v2648_v59  ;;  %v2651_v62 = vpop.f32.mrb[2].mxu1 }
 0x105   : > { %v2652_v63 = vpop.f32.mrb[3].mxu1 }
 0x106   : > { %v2653_v1 = vadd.f32 %v2652_v63, %v2651_v62 }
 0x10c   : > { %v2608_v40 = vpop.f32.mrb[0].mxu0 }
 0x10d   : > { %v2609_v55 = vpop.f32.mrb[1].mxu0 }
 0x10e   : > { %v2610_v2 = vadd.f32 %v2609_v55, %v2608_v40  ;;  %v2611_v3 = vpop.f32.mrb[2].mxu0 }
 0x10f   : > { %v2612_v57 = vpop.f32.mrb[3].mxu0 }
 0x110   : > { %v2054_v4 = vadd.f32 %v2650_v61, %v2610_v2  ;;  %v2613_v5 = vadd.f32 %v2612_v57, %v2611_v3  ;;  %v2654_v51 = vpop.f32.mrb[4].mxu1 }
 0x111   : > { %v2655_v37 = vpop.f32.mrb[5].mxu1 }
 0x112   : > { %v2057_v6 = vadd.f32 %v2653_v1, %v2613_v5  ;;  %v2656_v7 = vadd.f32 %v2655_v37, %v2654_v51  ;;  %v2657_v8 = vpop.f32.mrb[6].mxu1 }
 0x113   : > { %v2658_v46 = vpop.f32.mrb[7].mxu1 }
 0x114   : > { %v2659_v10 = vadd.f32 %v2658_v46, %v2657_v8 }
 0x11a   : > { %v2614_v12 = vpop.f32.mrb[4].mxu0 }
 0x11b   : > { %v2615_v13 = vpop.f32.mrb[5].mxu0 }
 0x11c   : > { %v2616_v14 = vadd.f32 %v2615_v13, %v2614_v12  ;;  %v2617_v16 = vpop.f32.mrb[6].mxu0 }
 0x11d   : > { %v2618_v17 = vpop.f32.mrb[7].mxu0 }
 0x11e   : > { %v2062_v18 = vadd.f32 %v2656_v7, %v2616_v14  ;;  %v2619_v19 = vadd.f32 %v2618_v17, %v2617_v16 }
 0x120   : > { %v2065_v0 = vadd.f32 %v2659_v10, %v2619_v19 }
 0x122   : > { %v2660_v20 = vpop.f32.mrb[8].mxu1 }
 0x123   : > { %v2661_v21 = vpop.f32.mrb[9].mxu1 }
 0x124   : > { %v2662_v22 = vadd.f32 %v2661_v21, %v2660_v20  ;;  %v2663_v23 = vpop.f32.mrb[10].mxu1 }
 0x125   : > { %v2664_v24 = vpop.f32.mrb[11].mxu1 }
 0x126   : > { %v2665_v25 = vadd.f32 %v2664_v24, %v2663_v23 }
 0x12c   : > { %v2620_v26 = vpop.f32.mrb[8].mxu0 }
 0x12d   : > { %v2621_v11 = vpop.f32.mrb[9].mxu0 }
 0x12e   : > { %v2622_v28 = vadd.f32 %v2621_v11, %v2620_v26  ;;  %v2623_v9 = vpop.f32.mrb[10].mxu0 }
 0x12f   : > { %v2624_v15 = vpop.f32.mrb[11].mxu0 }
 0x130   : > { %v2070_v29 = vadd.f32 %v2662_v22, %v2622_v28  ;;  %v2625_v30 = vadd.f32 %v2624_v15, %v2623_v9 }
 0x132   : > { %v2073_v31 = vadd.f32 %v2665_v25, %v2625_v30 }
 0x136   : > { %v2666_v32 = vpop.f32.mrb[12].mxu1 }
 0x137   : > { %v2667_v33 = vpop.f32.mrb[13].mxu1 }
 0x138   : > { %v2668_v34 = vadd.f32 %v2667_v33, %v2666_v32  ;;  %v2669_v35 = vpop.f32.mrb[14].mxu1 }
 0x139   : > { %v2670_v36 = vpop.f32.mrb[15].mxu1 }
 0x13a   : > { %v2671_v38 = vadd.f32 %v2670_v36, %v2669_v35 }
 0x140   : > { %v2626_v39 = vpop.f32.mrb[12].mxu0 }
 0x141   : > { %v2627_v41 = vpop.f32.mrb[13].mxu0  ;;  %v2728_v48 = vpop.f32.mrb[16].mxu1 }
 0x142   : > { %v2628_v42 = vadd.f32 %v2627_v41, %v2626_v39  ;;  %v2629_v44 = vpop.f32.mrb[14].mxu0  ;;  %v2729_v50 = vpop.f32.mrb[17].mxu1 }
 0x143   : > { %v2630_v43 = vpop.f32.mrb[15].mxu0  ;;  %v2730_v27 = vadd.f32 %v2729_v50, %v2728_v48  ;;  %v2731_v52 = vpop.f32.mrb[18].mxu1 }
 0x144   : > { %v3474_v45 = vadd.f32 %v2668_v34, %v2628_v42  ;;  %v2631_v47 = vadd.f32 %v2630_v43, %v2629_v44  ;;  %v2732_v53 = vpop.f32.mrb[19].mxu1 }
 0x145   : > { %v2733_v54 = vadd.f32 %v2732_v53, %v2731_v52 }
 0x146   : > { %v3476_v49 = vadd.f32 %v2671_v38, %v2631_v47 }
 0x148   : > { %v2688_v56 = vpop.f32.mrb[16].mxu0 }
 0x149   : > { %v2689_v58 = vpop.f32.mrb[17].mxu0 }
 0x14a   : > { %v2690_v59 = vadd.f32 %v2689_v58, %v2688_v56  ;;  %v2691_v60 = vpop.f32.mrb[18].mxu0 }
 0x14b   : > { %v2692_v61 = vpop.f32.mrb[19].mxu0 }
 0x14c   : > { %v2119_v62 = vadd.f32 %v2690_v59, %v2054_v4  ;;  %v2693_v63 = vadd.f32 %v2692_v61, %v2691_v60 }
 0x14e   : > { %v2122_v1 = vadd.f32 %v2693_v63, %v2057_v6  ;;  %v3478_v40 = vadd.f32 %v2730_v27, %v2119_v62 }
 0x150   : > { %v3480_v55 = vadd.f32 %v2733_v54, %v2122_v1  ;;  %v2734_v2 = vpop.f32.mrb[20].mxu1  ;;  %v2587_v54 = vld [vmem:[%s3518_s3] ss:$0 sm:$0xff] }
 0x151   : > { %v2735_v3 = vpop.f32.mrb[21].mxu1 }
 0x152   : > { %v2736_v57 = vadd.f32 %v2735_v3, %v2734_v2  ;;  %v2737_v5 = vpop.f32.mrb[22].mxu1 }
 0x153   : > { %v2738_v51 = vpop.f32.mrb[23].mxu1 }
 0x154   : > { %v2739_v37 = vadd.f32 %v2738_v51, %v2737_v5 }
 0x156   : > { %v2694_v7 = vpop.f32.mrb[20].mxu0 }
 0x157   : > { %v2695_v8 = vpop.f32.mrb[21].mxu0 }
 0x158   : > { %v2696_v46 = vadd.f32 %v2695_v8, %v2694_v7  ;;  %v2697_v10 = vpop.f32.mrb[22].mxu0 }
 0x159   : > { %v2698_v12 = vpop.f32.mrb[23].mxu0 }
 0x15a   : > { %v2127_v13 = vadd.f32 %v2696_v46, %v2062_v18  ;;  %v2699_v14 = vadd.f32 %v2698_v12, %v2697_v10 }
 0x15c   : > { %v2130_v4 = vadd.f32 %v2699_v14, %v2065_v0  ;;  %v2192_v16 = vadd.f32 %v2736_v57, %v2127_v13 }
 0x15e   : > { %v2740_v6 = vpop.f32.mrb[24].mxu1  ;;  %v2195_v19 = vadd.f32 %v2739_v37, %v2130_v4 }
 0x15f   : > { %v2741_v17 = vpop.f32.mrb[25].mxu1 }
 0x160   : > { %v2742_v20 = vadd.f32 %v2741_v17, %v2740_v6  ;;  %v2743_v21 = vpop.f32.mrb[26].mxu1 }
 0x161   : > { %v2744_v22 = vpop.f32.mrb[27].mxu1 }
 0x162   : > { %v2745_v23 = vadd.f32 %v2744_v22, %v2743_v21 }
 0x164   : > { %v2700_v24 = vpop.f32.mrb[24].mxu0 }
 0x165   : > { %v2701_v25 = vpop.f32.mrb[25].mxu0 }
 0x166   : > { %v2702_v26 = vadd.f32 %v2701_v25, %v2700_v24  ;;  %v2703_v11 = vpop.f32.mrb[26].mxu0 }
 0x167   : > { %v2704_v28 = vpop.f32.mrb[27].mxu0 }
 0x168   : > { %v2135_v9 = vadd.f32 %v2702_v26, %v2070_v29  ;;  %v2705_v15 = vadd.f32 %v2704_v28, %v2703_v11  ;;  %v2586_v29 = vld [vmem:[%s3517_s2] ss:$0 sm:$0xff] }
 0x16a   : > { %v2138_v30 = vadd.f32 %v2705_v15, %v2073_v31  ;;  %v2200_v32 = vadd.f32 %v2742_v20, %v2135_v9 }
 0x16c   : > { %v2203_v18 = vadd.f32 %v2745_v23, %v2138_v30 }
 0x170   : > { %v2746_v33 = vpop.f32.mrb[28].mxu1 }
 0x171   : > { %v2747_v0 = vpop.f32.mrb[29].mxu1 }
 0x172   : > { %v2748_v34 = vadd.f32 %v2747_v0, %v2746_v33  ;;  %v2749_v35 = vpop.f32.mrb[30].mxu1 }
 0x173   : > { %v2750_v36 = vpop.f32.mrb[31].mxu1 }
 0x174   : > { %v2751_v38 = vadd.f32 %v2750_v36, %v2749_v35  ;;  %v2706_v39 = vpop.f32.mrb[28].mxu0 }
 0x175   : > { %v2707_v41 = vpop.f32.mrb[29].mxu0 }
 0x176   : > { %v2708_v42 = vadd.f32 %v2707_v41, %v2706_v39  ;;  %v2709_v44 = vpop.f32.mrb[30].mxu0 }
 0x177   : > { %v2710_v47 = vpop.f32.mrb[31].mxu0 }
 0x178   : > { %v2786_v43 = vpop.f32.mrb[32].mxu1  ;;  %v2143_v48 = vadd.f32 %v2708_v42, %v3474_v45  ;;  %v2711_v31 = vadd.f32 %v2710_v47, %v2709_v44 }
 0x179   : > { %v2264_v50 = vpop.f32.mrb[33].mxu1 }
 0x17a   : > { %v2265_v27 = vadd.f32 %v2264_v50, %v2200_v32  ;;  %v2787_v52 = vpop.f32.mrb[34].mxu1  ;;  %v2208_v53 = vadd.f32 %v2748_v34, %v2143_v48  ;;  %v2146_v56 = vadd.f32 %v2711_v31, %v3476_v49 }
 0x17b   : > { %v2267_v58 = vpop.f32.mrb[35].mxu1 }
 0x17c   : > { %v2290_v59 = vmul.f32 %v2586_v29, %v2265_v27  ;;  %v2268_v60 = vadd.f32 %v2267_v58, %v2203_v18  ;;  %v2273_v45 = vadd.f32 %v2786_v43, %v2208_v53  ;;  %v2211_v61 = vadd.f32 %v2751_v38, %v2146_v56 }
 0x17d   : > { %v2782_v62 = vpop.f32.mrb[32].mxu0 }
 0x17e   : > { %v2305_v63 = vadd.f32 %v2587_v54, %v2290_v59  ;;  %v2291_v1 = vmul.f32 %v2586_v29, %v2268_v60  ;;  %v2257_v2 = vadd.f32 %v2782_v62, %v2192_v16  ;;  %v2248_v3 = vpop.f32.mrb[33].mxu0  ;;  %v2292_v57 = vmul.f32 %v2586_v29, %v2273_v45 }
 0x17f   : > { %v2276_v5 = vadd.f32 %v2787_v52, %v2211_v61  ;;  %v2249_v49 = vadd.f32 %v2248_v3, %v3478_v40  ;;  %v2783_v51 = vpop.f32.mrb[34].mxu0 }
 0x180   : > { %v2313_v37 = vmax.f32 %v2305_v63, 0.0  ;;  %v2306_v7 = vadd.f32 %v2587_v54, %v2291_v1  ;;  %v2288_v8 = vmul.f32 %v2586_v29, %v2257_v2  ;;  %v2260_v46 = vadd.f32 %v2783_v51, %v2195_v19  ;;  %v2251_v10 = vpop.f32.mrb[35].mxu0 }
 0x181   : > { %v2307_v12 = vadd.f32 %v2587_v54, %v2292_v57  ;;  %v2293_v13 = vmul.f32 %v2586_v29, %v2276_v5  ;;  %v2286_v14 = vmul.f32 %v2586_v29, %v2249_v49  ;;  %v2252_v4 = vadd.f32 %v2251_v10, %v3480_v55 }
 0x182   : > { %2321 = vst [vmem:[%s3494_s22 + $0x20] sm:$0xff] %v2313_v37  ;;  %v2314_v16 = vmax.f32 %v2306_v7, 0.0  ;;  %v2303_v6 = vadd.f32 %v2587_v54, %v2288_v8  ;;  %v2289_v40 = vmul.f32 %v2586_v29, %v2260_v46 }
 0x183   : > { %v2315_v17 = vmax.f32 %v2307_v12, 0.0  ;;  %v2308_v20 = vadd.f32 %v2587_v54, %v2293_v13  ;;  %v2301_v21 = vadd.f32 %v2587_v54, %v2286_v14  ;;  %v2287_v19 = vmul.f32 %v2586_v29, %v2252_v4 }
 0x184   : > { %2322 = vst [vmem:[%s3494_s22 + $0x28] sm:$0xff] %v2314_v16  ;;  %v2311_v22 = vmax.f32 %v2303_v6, 0.0  ;;  %v2304_v23 = vadd.f32 %v2587_v54, %v2289_v40 }
 0x185   : > { %2323 = vst [vmem:[%s3494_s22 + $0x30] sm:$0xff] %v2315_v17  ;;  %v2316_v24 = vmax.f32 %v2308_v20, 0.0  ;;  %v2309_v25 = vmax.f32 %v2301_v21, 0.0  ;;  %v2302_v55 = vadd.f32 %v2587_v54, %v2287_v19 }
 0x186   : > { %2319 = vst [vmem:[%s3494_s22 + $0x10] sm:$0xff] %v2311_v22  ;;  %v2312_v26 = vmax.f32 %v2304_v23, 0.0 }
 0x187   : > { %2324 = vst [vmem:[%s3494_s22 + $0x38] sm:$0xff] %v2316_v24  ;;  %2317 = vst [vmem:[%s3494_s22] sm:$0xff] %v2309_v25  ;;  %v2310_v11 = vmax.f32 %v2302_v55, 0.0 }
 0x188   : > { %2320 = vst [vmem:[%s3494_s22 + $0x18] sm:$0xff] %v2312_v26 }
 0x189   : > { %2318 = vst [vmem:[%s3494_s22 + $0x8] sm:$0xff] %v2310_v11 }
 0x18a PF: > { %s14_s17 = sadd.s32 1, %s2975_s17   ;;  %s3528_s15 = smov %s2971_s16 }
 0x18b   : > { %p11_p5 = scmp.ge.s32.totalorder %s14_s17, 4   ;;  %s3529_s16 = smov %s3531_s18 }
 0x18d   :  { %13 = sbr.rel (!%p11_p5) target bundleno = 2 (0x2), region = 77 }

</bundles_post_ra>
